<compile_context>
chip_gen: v5e
topology: v5e:2x2
jax: 0.10.0
libtpu: 0.0.40
codegen_flags: <defaults>
</compile_context>

<pallas_src>
import functools

import numpy as np
import jax
import jax.numpy as jnp
from jax.experimental import pallas as pl
from jax.experimental.pallas import tpu as pltpu


def _round_up(x, m):
    return (x + m - 1) // m * m


# ---------------------------------------------------------------------------
# Pallas kernel: one LSTM layer for ONE stream (grid axis = stream index).
# x rows are time-major / batch-minor: row = t * B_pad + b.
# ---------------------------------------------------------------------------
def _lstm_stack_kernel(x_ref, wih_ref, whh_ref, b_ref, y_ref, cT_ref, gx_ref,
                       *, seq_len, batch_pad, hidden_pad, compute_dtype):
    Bp, Hp = batch_pad, hidden_pad

    # --- hoisted input projection: one big MXU matmul over all T*Bp rows ---
    x_all = x_ref[0].astype(compute_dtype)                        # (T*Bp, Dp)
    gx = (jnp.dot(x_all, wih_ref[0].astype(compute_dtype),
                  preferred_element_type=jnp.float32)
          + b_ref[0])                                             # (T*Bp, 4*Hp)
    gx_ref[...] = gx.reshape(seq_len, Bp, 4 * Hp)

    whh = whh_ref[0].astype(compute_dtype)                        # (Hp, 4*Hp)

    # --- serial recurrence: only the h @ W_hh matmul remains per step ---
    def step(t, carry):
        h, c = carry
        gates = gx_ref[t] + jnp.dot(h.astype(compute_dtype), whh,
                                    preferred_element_type=jnp.float32)
        # PyTorch gate order i, f, g, o — slices are Hp(=128k)-aligned.
        i_g = jax.nn.sigmoid(gates[:, 0 * Hp:1 * Hp])
        f_g = jax.nn.sigmoid(gates[:, 1 * Hp:2 * Hp])
        g_g = jnp.tanh(gates[:, 2 * Hp:3 * Hp])
        o_g = jax.nn.sigmoid(gates[:, 3 * Hp:4 * Hp])
        c_new = f_g * c + i_g * g_g
        h_new = o_g * jnp.tanh(c_new)
        y_ref[0, t] = h_new.astype(y_ref.dtype)
        return (h_new, c_new)

    h0 = jnp.zeros((Bp, Hp), jnp.float32)    # do_init=True path: zero state
    c0 = jnp.zeros((Bp, Hp), jnp.float32)
    _, cT = jax.lax.fori_loop(0, seq_len, step, (h0, c0), unroll=True)
    cT_ref[0] = cT.astype(cT_ref.dtype)      # hT is y[:, T-1]; not re-emitted


def lstm_layer_stacked(x_flat, wih_s, whh_s, b_s, *, seq_len, batch_pad,
                       hidden_pad, compute_dtype=jnp.float32):
    """One LSTM layer for all L independent streams in a single pallas_call.

    x_flat : (L, T*Bp, Dp)   zero-padded, rows ordered t-major / b-minor
    wih_s  : (L, Dp, 4*Hp)   W_ih^T with gates at Hp-aligned column offsets
    whh_s  : (L, Hp, 4*Hp)   W_hh^T (same gate layout)
    b_s    : (L, 1, 4*Hp)    b_ih + b_hh (same gate layout)
    Returns y: (L, T, Bp, Hp), cT: (L, Bp, Hp).
    """
    L, TB, Dp = x_flat.shape
    T, Bp, Hp = seq_len, batch_pad, hidden_pad
    kern = functools.partial(_lstm_stack_kernel, seq_len=T, batch_pad=Bp,
                             hidden_pad=Hp, compute_dtype=compute_dtype)
    y, cT = pl.pallas_call(
        kern,
        out_shape=(jax.ShapeDtypeStruct((L, T, Bp, Hp), jnp.float32),
                   jax.ShapeDtypeStruct((L, Bp, Hp), jnp.float32)),
        grid_spec=pltpu.PrefetchScalarGridSpec(
            num_scalar_prefetch=0,
            grid=(L,),
            in_specs=[
                pl.BlockSpec((1, TB, Dp), lambda s: (s, 0, 0)),        # x
                pl.BlockSpec((1, Dp, 4 * Hp), lambda s: (s, 0, 0)),    # W_ih^T
                pl.BlockSpec((1, Hp, 4 * Hp), lambda s: (s, 0, 0)),    # W_hh^T
                pl.BlockSpec((1, 1, 4 * Hp), lambda s: (s, 0, 0)),     # bias
            ],
            out_specs=(
                pl.BlockSpec((1, T, Bp, Hp), lambda s: (s, 0, 0, 0)),  # y
                pl.BlockSpec((1, Bp, Hp), lambda s: (s, 0, 0)),        # c_T
            ),
            scratch_shapes=[pltpu.VMEM((T, Bp, 4 * Hp), jnp.float32)], # gates_x
        ),
        compiler_params=pltpu.CompilerParams(
            dimension_semantics=("parallel",)),   # streams are independent
    )(x_flat, wih_s, whh_s, b_s)
    return y, cT


# ---------------------------------------------------------------------------
# Pallas kernel: reparameterized Normal sample  z = mean + exp(logs) * eps
# (one lane-dense call for all streams)
# ---------------------------------------------------------------------------
def _sample_kernel(mean_ref, logs_ref, eps_ref, z_ref):
    z_ref[...] = mean_ref[...] + jnp.exp(logs_ref[...]) * eps_ref[...]


def sample_normal_pallas(mean_list, logs_list, eps_list):
    flat_m = jnp.concatenate([m.reshape(-1) for m in mean_list])
    flat_l = jnp.concatenate([l.reshape(-1) for l in logs_list])
    flat_e = jnp.concatenate([e.reshape(-1) for e in eps_list])
    n = flat_m.shape[0]
    n_pad = _round_up(n, 8 * 128)
    rows = n_pad // 128

    def to2d(v):
        return jnp.pad(v, (0, n_pad - n)).reshape(rows, 128)

    m2, l2, e2 = to2d(flat_m), to2d(flat_l), to2d(flat_e)
    z2 = pl.pallas_call(
        _sample_kernel,
        out_shape=jax.ShapeDtypeStruct((rows, 128), jnp.float32),
        grid=(1,),
        in_specs=[pl.BlockSpec((rows, 128), lambda i: (0, 0))] * 3,
        out_specs=pl.BlockSpec((rows, 128), lambda i: (0, 0)),
    )(m2, l2, e2)
    z_flat = z2.reshape(-1)[:n]

    zs, off = [], 0
    for m in mean_list:
        zs.append(z_flat[off:off + m.size].reshape(m.shape))
        off += m.size
    return zs


# ---------------------------------------------------------------------------
# Weight re-layout helpers (host-side, plain JAX)
# ---------------------------------------------------------------------------
def _pad_gate_cols(w, h, h_pad):
    """(rows, 4*h) PyTorch-order gates -> (rows, 4*h_pad), gate k starting at
    the lane-aligned column offset k*h_pad (zero elsewhere)."""
    out = jnp.zeros((w.shape[0], 4 * h_pad), w.dtype)
    for k in range(4):
        out = out.at[:, k * h_pad:k * h_pad + h].set(w[:, k * h:(k + 1) * h])
    return out


# ---------------------------------------------------------------------------
# Multi_LSTMs forward (do_init=True path: zero initial hidden state), Pallas
# ---------------------------------------------------------------------------
def multi_lstms_forward_pallas(xs, all_params, eps_list, num_layers,
                               compute_dtype=jnp.float32):
    L = len(xs)
    B, _, _, T = xs[0].shape
    Bp = _round_up(B, 8)
    d_ins = [int(x.shape[1] * x.shape[2]) for x in xs]   # C*V per stream
    hids = [2 * d for d in d_ins]                        # hidden = 2*C*V
    Dp0 = _round_up(max(d_ins), 128)
    Hp = _round_up(max(hids), 128)

    # Stack all L streams into one padded, flattened, time-major input.
    x_streams = []
    for x in xs:
        B_, C, V, T_ = x.shape
        x_seq = jnp.transpose(x, (0, 3, 1, 2)).reshape(B_, T_, C * V)  # (B,T,CV)
        x_tbd = jnp.transpose(x_seq, (1, 0, 2))                        # (T,B,CV)
        x_pad = jnp.pad(x_tbd, ((0, 0), (0, Bp - B_), (0, Dp0 - C * V)))
        x_streams.append(x_pad.reshape(T_ * Bp, Dp0))
    x_cur = jnp.stack(x_streams)                                       # (L,T*Bp,Dp0)
    Dp_cur = Dp0

    hTs, cTs = [], []
    for l in range(num_layers):
        wih_s, whh_s, b_s = [], [], []
        for i in range(L):
            wihT, whhT, b = all_params[i][l]       # (d_in,4h), (h,4h), (1,4h)
            h_i = hids[i]
            wih_p = jnp.pad(_pad_gate_cols(wihT, h_i, Hp),
                            ((0, Dp_cur - wihT.shape[0]), (0, 0)))
            whh_p = jnp.pad(_pad_gate_cols(whhT, h_i, Hp),
                            ((0, Hp - h_i), (0, 0)))
            b_p = _pad_gate_cols(b, h_i, Hp)
            wih_s.append(wih_p)
            whh_s.append(whh_p)
            b_s.append(b_p)
        y, cT = lstm_layer_stacked(
            x_cur, jnp.stack(wih_s), jnp.stack(whh_s), jnp.stack(b_s),
            seq_len=T, batch_pad=Bp, hidden_pad=Hp, compute_dtype=compute_dtype)
        hTs.append(y[:, T - 1])                    # hT == last time-step of y
        cTs.append(cT)
        x_cur = y.reshape(L, T * Bp, Hp)           # next layer's flattened input
        Dp_cur = Hp

    y_final = x_cur.reshape(L, T, Bp, Hp)

    # Per-stream: unpad, reshape to (B, 2C, V, T), split into (mean, logs).
    means, logss, hiddens = [], [], []
    for i, x in enumerate(xs):
        B_, C, V, T_ = x.shape
        h_i = hids[i]                                         # = 2*C*V
        y_i = y_final[i, :, :B_, :h_i]                        # (T, B, 2CV)
        lstm_out = jnp.transpose(y_i, (1, 0, 2))              # (B, T, 2CV)
        lstm_out = jnp.transpose(lstm_out.reshape(B_, T_, 2 * C, V),
                                 (0, 2, 3, 1))                # (B, 2C, V, T)
        means.append(lstm_out[:, :C])
        logss.append(lstm_out[:, C:])
        h_n = jnp.stack([hTs[l][i, :B_, :h_i] for l in range(num_layers)])
        c_n = jnp.stack([cTs[l][i, :B_, :h_i] for l in range(num_layers)])
        hiddens.append((h_n, c_n))

    zs = sample_normal_pallas(means, logss, eps_list)
    # TODO(synk): torch.distributions.Normal object has no Pallas equivalent;
    # we return (mean, logs) which fully parameterize it, and sample with
    # pre-drawn eps (reparameterization) for determinism.
    normals = list(zip(means, logss))
    return zs, normals, hiddens


# ---------------------------------------------------------------------------
# Pure-JAX reference (for correctness check only)
# ---------------------------------------------------------------------------
def _lstm_layer_ref(x_tbd, wihT, whhT, b, h0, c0):
    H = h0.shape[-1]

    def step(carry, x_t):
        h, c = carry
        gates = x_t @ wihT + h @ whhT + b
        i = jax.nn.sigmoid(gates[:, :H])
        f = jax.nn.sigmoid(gates[:, H:2 * H])
        g = jnp.tanh(gates[:, 2 * H:3 * H])
        o = jax.nn.sigmoid(gates[:, 3 * H:])
        c = f * c + i * g
        h = o * jnp.tanh(c)
        return (h, c), h

    (hT, cT), ys = jax.lax.scan(step, (h0, c0), x_tbd)
    return ys, hT, cT


def multi_lstms_forward_ref(xs, all_params, eps_list, num_layers):
    zs, normals, hiddens = [], [], []
    for i, x in enumerate(xs):
        B, C, V, T = x.shape
        x_seq = jnp.transpose(x, (0, 3, 1, 2)).reshape(B, T, C * V)
        x_t = jnp.transpose(x_seq, (1, 0, 2))
        hs, cs = [], []
        for l in range(num_layers):
            wihT, whhT, b = all_params[i][l]
            H = whhT.shape[0]
            h0 = jnp.zeros((B, H), jnp.float32)
            c0 = jnp.zeros((B, H), jnp.float32)
            x_t, hT, cT = _lstm_layer_ref(x_t, wihT, whhT, b, h0, c0)
            hs.append(hT)
            cs.append(cT)
        hiddens.append((jnp.stack(hs), jnp.stack(cs)))
        lstm_out = jnp.transpose(x_t, (1, 0, 2))
        lstm_out = jnp.transpose(lstm_out.reshape(B, T, 2 * C, V), (0, 2, 3, 1))
        mean, logs = lstm_out[:, :C], lstm_out[:, C:]
        zs.append(mean + jnp.exp(logs) * eps_list[i])
        normals.append((mean, logs))
    return zs, normals, hiddens


# ---------------------------------------------------------------------------
# Deterministic parameter init (mimics nn.LSTM uniform(-1/sqrt(H), 1/sqrt(H)))
# ---------------------------------------------------------------------------
def init_lstm_params(key, input_dim, hidden_dim, num_layers):
    params = []
    stdv = 1.0 / np.sqrt(hidden_dim)
    for l in range(num_layers):
        d_in = input_dim if l == 0 else hidden_dim
        key, k1, k2, k3, k4 = jax.random.split(key, 5)
        w_ih = jax.random.uniform(k1, (4 * hidden_dim, d_in), jnp.float32, -stdv, stdv)
        w_hh = jax.random.uniform(k2, (4 * hidden_dim, hidden_dim), jnp.float32, -stdv, stdv)
        b_ih = jax.random.uniform(k3, (4 * hidden_dim,), jnp.float32, -stdv, stdv)
        b_hh = jax.random.uniform(k4, (4 * hidden_dim,), jnp.float32, -stdv, stdv)
        params.append((w_ih.T, w_hh.T, (b_ih + b_hh).reshape(1, 4 * hidden_dim)))
    return key, params


if __name__ == "__main__":
    num_channels, num_joints, L, num_layers = 4, 4, 2, 2
    B, T = 2, 8
    lstm_dim = num_channels * num_joints       # 16

    key = jax.random.PRNGKey(0)

    # LSTMs[0..L-2]: (lstm_dim -> 2*lstm_dim); LSTMs[L-1]: (2*lstm_dim -> 4*lstm_dim)
    all_params = []
    for i in range(L):
        d_in = lstm_dim if i < L - 1 else 2 * lstm_dim
        h_dim = 2 * lstm_dim if i < L - 1 else 4 * lstm_dim
        key, params = init_lstm_params(key, d_in, h_dim, num_layers)
        all_params.append(params)

    # Inputs xs[i]: (B, C_i, V, T); pre-drawn eps for the reparameterized sample.
    xs, eps_list = [], []
    for i in range(L):
        C = num_channels if i < L - 1 else 2 * num_channels
        key, kx, ke = jax.random.split(key, 3)
        xs.append(jax.random.normal(kx, (B, C, num_joints, T), jnp.float32))
        eps_list.append(jax.random.normal(ke, (B, C, num_joints, T), jnp.float32))

    # NOTE: on v6e/v7x pass compute_dtype=jnp.bfloat16 for the MXU matmuls at
    # real sizes; f32 is used here so tolerances vs. the f32 reference hold.
    zs, normals, hiddens = multi_lstms_forward_pallas(
        xs, all_params, eps_list, num_layers, compute_dtype=jnp.float32)
    zs = [jax.block_until_ready(z) for z in zs]

    zs_ref, normals_ref, hiddens_ref = multi_lstms_forward_ref(
        xs, all_params, eps_list, num_layers)

    ok = True
    for i in range(L):
        ok &= np.allclose(np.asarray(zs[i]), np.asarray(zs_ref[i]),
                          atol=1e-4, rtol=1e-4)
        ok &= np.allclose(np.asarray(normals[i][0]), np.asarray(normals_ref[i][0]),
                          atol=1e-5, rtol=1e-5)
        ok &= np.allclose(np.asarray(normals[i][1]), np.asarray(normals_ref[i][1]),
                          atol=1e-5, rtol=1e-5)
        ok &= np.allclose(np.asarray(hiddens[i][0]), np.asarray(hiddens_ref[i][0]),
                          atol=1e-5, rtol=1e-5)
        ok &= np.allclose(np.asarray(hiddens[i][1]), np.asarray(hiddens_ref[i][1]),
                          atol=1e-5, rtol=1e-5)
    assert ok, "Pallas Multi_LSTMs forward mismatch vs JAX reference"

    print("KERNEL_OK")
</pallas_src>

<mosaic_0001>
module attributes {stable_mosaic.version = 11 : i64} {
  func.func @_lstm_stack_kernel(%arg0: i32, %arg1: memref<1x64x128xf32, #tpu.memory_space<vmem>>, %arg2: memref<1x128x512xf32, #tpu.memory_space<vmem>>, %arg3: memref<1x128x512xf32, #tpu.memory_space<vmem>>, %arg4: memref<1x1x512xf32, #tpu.memory_space<vmem>>, %arg5: memref<1x8x8x128xf32, #tpu.memory_space<vmem>>, %arg6: memref<1x8x128xf32, #tpu.memory_space<vmem>>, %arg7: memref<8x8x512xf32, #tpu.memory_space<vmem>>) attributes {dimension_semantics = [#tpu.dimension_semantics<parallel>], iteration_bounds = array<i64: 2>, scalar_prefetch = 0 : i64, scratch_operands = 1 : i64, tpu.core_type = #tpu.core_type<tc>, window_params = [{transform_indices = @transform_0, window_bounds = array<i64: 1, 64, 128>}, {transform_indices = @transform_1, window_bounds = array<i64: 1, 128, 512>}, {transform_indices = @transform_2, window_bounds = array<i64: 1, 128, 512>}, {transform_indices = @transform_3, window_bounds = array<i64: 1, 1, 512>}, {transform_indices = @transform_4, window_bounds = array<i64: 1, 8, 8, 128>}, {transform_indices = @transform_5, window_bounds = array<i64: 1, 8, 128>}]} {
    %c0 = arith.constant 0 : index
    %c0_0 = arith.constant 0 : index
    %c0_1 = arith.constant 0 : index
    %0 = vector.load %arg1[%c0, %c0_0, %c0_1] : memref<1x64x128xf32, #tpu.memory_space<vmem>>, vector<1x64x128xf32>
    %1 = vector.shape_cast %0 : vector<1x64x128xf32> to vector<64x128xf32>
    %c0_2 = arith.constant 0 : index
    %c0_3 = arith.constant 0 : index
    %c0_4 = arith.constant 0 : index
    %2 = vector.load %arg2[%c0_2, %c0_3, %c0_4] : memref<1x128x512xf32, #tpu.memory_space<vmem>>, vector<1x128x512xf32>
    %3 = vector.shape_cast %2 : vector<1x128x512xf32> to vector<128x512xf32>
    %cst = arith.constant dense<0.000000e+00> : vector<64x512xf32>
    %4 = tpu.matmul %1, %3, %cst {dimension_numbers = #tpu.dot_dimension_numbers<[1], [0], [0], [1], [0, 0, 1, 1], [], []>} : vector<64x128xf32>, vector<128x512xf32>, vector<64x512xf32> -> vector<64x512xf32>
    %c0_5 = arith.constant 0 : index
    %c0_6 = arith.constant 0 : index
    %c0_7 = arith.constant 0 : index
    %5 = vector.load %arg4[%c0_5, %c0_6, %c0_7] : memref<1x1x512xf32, #tpu.memory_space<vmem>>, vector<1x1x512xf32>
    %6 = vector.shape_cast %5 : vector<1x1x512xf32> to vector<1x512xf32>
    %7 = vector.broadcast %6 : vector<1x512xf32> to vector<64x512xf32>
    %8 = arith.addf %4, %7 : vector<64x512xf32>
    %9 = vector.shape_cast %8 : vector<64x512xf32> to vector<8x8x512xf32>
    %c0_8 = arith.constant 0 : index
    %c0_9 = arith.constant 0 : index
    %c0_10 = arith.constant 0 : index
    %10 = vector.load %arg7[%c0_8, %c0_9, %c0_10] : memref<8x8x512xf32, #tpu.memory_space<vmem>>, vector<8x8x512xf32>
    tpu.vector_store %arg7[%c0_8, %c0_9, %c0_10], %9 {strides = array<i32>} : memref<8x8x512xf32, #tpu.memory_space<vmem>>, vector<8x8x512xf32>,
    %c0_11 = arith.constant 0 : index
    %c0_12 = arith.constant 0 : index
    %c0_13 = arith.constant 0 : index
    %11 = vector.load %arg3[%c0_11, %c0_12, %c0_13] : memref<1x128x512xf32, #tpu.memory_space<vmem>>, vector<1x128x512xf32>
    %12 = vector.shape_cast %11 : vector<1x128x512xf32> to vector<128x512xf32>
    %cst_14 = arith.constant 0.000000e+00 : f32
    %13 = vector.broadcast %cst_14 : f32 to vector<8x128xf32>
    %cst_15 = arith.constant 0.000000e+00 : f32
    %14 = vector.broadcast %cst_15 : f32 to vector<8x128xf32>
    %c0_i32 = arith.constant 0 : i32
    %15 = arith.index_cast %c0_i32 : i32 to index
    %c0_16 = arith.constant 0 : index
    %c0_17 = arith.constant 0 : index
    %16 = vector.load %arg7[%15, %c0_16, %c0_17] : memref<8x8x512xf32, #tpu.memory_space<vmem>>, vector<1x8x512xf32>
    %17 = vector.shape_cast %16 : vector<1x8x512xf32> to vector<8x512xf32>
    %cst_18 = arith.constant dense<0.000000e+00> : vector<8x512xf32>
    %18 = tpu.matmul %13, %12, %cst_18 {dimension_numbers = #tpu.dot_dimension_numbers<[1], [0], [0], [1], [0, 0, 1, 1], [], []>} : vector<8x128xf32>, vector<128x512xf32>, vector<8x512xf32> -> vector<8x512xf32>
    %19 = arith.addf %17, %18 : vector<8x512xf32>
    %20 = vector.extract_strided_slice %19 {offsets = [0, 0], sizes = [8, 128], strides = [1, 1]} : vector<8x512xf32> to vector<8x128xf32>
    %21 = arith.negf %20 : vector<8x128xf32>
    %22 = math.exp %21 : vector<8x128xf32>
    %cst_19 = arith.constant 1.000000e+00 : f32
    %23 = vector.broadcast %cst_19 : f32 to vector<8x128xf32>
    %24 = arith.addf %23, %22 : vector<8x128xf32>
    %25 = arith.divf %23, %24 : vector<8x128xf32>
    %26 = vector.extract_strided_slice %19 {offsets = [0, 128], sizes = [8, 128], strides = [1, 1]} : vector<8x512xf32> to vector<8x128xf32>
    %27 = arith.negf %26 : vector<8x128xf32>
    %28 = math.exp %27 : vector<8x128xf32>
    %cst_20 = arith.constant 1.000000e+00 : f32
    %29 = vector.broadcast %cst_20 : f32 to vector<8x128xf32>
    %30 = arith.addf %29, %28 : vector<8x128xf32>
    %31 = arith.divf %29, %30 : vector<8x128xf32>
    %32 = vector.extract_strided_slice %19 {offsets = [0, 256], sizes = [8, 128], strides = [1, 1]} : vector<8x512xf32> to vector<8x128xf32>
    %33 = math.tanh %32 : vector<8x128xf32>
    %34 = vector.extract_strided_slice %19 {offsets = [0, 384], sizes = [8, 128], strides = [1, 1]} : vector<8x512xf32> to vector<8x128xf32>
    %35 = arith.negf %34 : vector<8x128xf32>
    %36 = math.exp %35 : vector<8x128xf32>
    %cst_21 = arith.constant 1.000000e+00 : f32
    %37 = vector.broadcast %cst_21 : f32 to vector<8x128xf32>
    %38 = arith.addf %37, %36 : vector<8x128xf32>
    %39 = arith.divf %37, %38 : vector<8x128xf32>
    %40 = arith.mulf %31, %14 : vector<8x128xf32>
    %41 = arith.mulf %25, %33 : vector<8x128xf32>
    %42 = arith.addf %40, %41 : vector<8x128xf32>
    %43 = math.tanh %42 : vector<8x128xf32>
    %44 = arith.mulf %39, %43 : vector<8x128xf32>
    %c0_22 = arith.constant 0 : index
    %45 = arith.index_cast %c0_i32 : i32 to index
    %c0_23 = arith.constant 0 : index
    %c0_24 = arith.constant 0 : index
    %46 = vector.load %arg5[%c0_22, %45, %c0_23, %c0_24] : memref<1x8x8x128xf32, #tpu.memory_space<vmem>>, vector<1x1x8x128xf32>
    %47 = vector.shape_cast %46 : vector<1x1x8x128xf32> to vector<8x128xf32>
    %48 = vector.shape_cast %44 : vector<8x128xf32> to vector<1x1x8x128xf32>
    tpu.vector_store %arg5[%c0_22, %45, %c0_23, %c0_24], %48 {strides = array<i32>} : memref<1x8x8x128xf32, #tpu.memory_space<vmem>>, vector<1x1x8x128xf32>,
    %c1_i32 = arith.constant 1 : i32
    %49 = arith.index_cast %c1_i32 : i32 to index
    %c0_25 = arith.constant 0 : index
    %c0_26 = arith.constant 0 : index
    %50 = vector.load %arg7[%49, %c0_25, %c0_26] : memref<8x8x512xf32, #tpu.memory_space<vmem>>, vector<1x8x512xf32>
    %51 = vector.shape_cast %50 : vector<1x8x512xf32> to vector<8x512xf32>
    %cst_27 = arith.constant dense<0.000000e+00> : vector<8x512xf32>
    %52 = tpu.matmul %44, %12, %cst_27 {dimension_numbers = #tpu.dot_dimension_numbers<[1], [0], [0], [1], [0, 0, 1, 1], [], []>} : vector<8x128xf32>, vector<128x512xf32>, vector<8x512xf32> -> vector<8x512xf32>
    %53 = arith.addf %51, %52 : vector<8x512xf32>
    %54 = vector.extract_strided_slice %53 {offsets = [0, 0], sizes = [8, 128], strides = [1, 1]} : vector<8x512xf32> to vector<8x128xf32>
    %55 = arith.negf %54 : vector<8x128xf32>
    %56 = math.exp %55 : vector<8x128xf32>
    %cst_28 = arith.constant 1.000000e+00 : f32
    %57 = vector.broadcast %cst_28 : f32 to vector<8x128xf32>
    %58 = arith.addf %57, %56 : vector<8x128xf32>
    %59 = arith.divf %57, %58 : vector<8x128xf32>
    %60 = vector.extract_strided_slice %53 {offsets = [0, 128], sizes = [8, 128], strides = [1, 1]} : vector<8x512xf32> to vector<8x128xf32>
    %61 = arith.negf %60 : vector<8x128xf32>
    %62 = math.exp %61 : vector<8x128xf32>
    %cst_29 = arith.constant 1.000000e+00 : f32
    %63 = vector.broadcast %cst_29 : f32 to vector<8x128xf32>
    %64 = arith.addf %63, %62 : vector<8x128xf32>
    %65 = arith.divf %63, %64 : vector<8x128xf32>
    %66 = vector.extract_strided_slice %53 {offsets = [0, 256], sizes = [8, 128], strides = [1, 1]} : vector<8x512xf32> to vector<8x128xf32>
    %67 = math.tanh %66 : vector<8x128xf32>
    %68 = vector.extract_strided_slice %53 {offsets = [0, 384], sizes = [8, 128], strides = [1, 1]} : vector<8x512xf32> to vector<8x128xf32>
    %69 = arith.negf %68 : vector<8x128xf32>
    %70 = math.exp %69 : vector<8x128xf32>
    %cst_30 = arith.constant 1.000000e+00 : f32
    %71 = vector.broadcast %cst_30 : f32 to vector<8x128xf32>
    %72 = arith.addf %71, %70 : vector<8x128xf32>
    %73 = arith.divf %71, %72 : vector<8x128xf32>
    %74 = arith.mulf %65, %42 : vector<8x128xf32>
    %75 = arith.mulf %59, %67 : vector<8x128xf32>
    %76 = arith.addf %74, %75 : vector<8x128xf32>
    %77 = math.tanh %76 : vector<8x128xf32>
    %78 = arith.mulf %73, %77 : vector<8x128xf32>
    %c0_31 = arith.constant 0 : index
    %79 = arith.index_cast %c1_i32 : i32 to index
    %c0_32 = arith.constant 0 : index
    %c0_33 = arith.constant 0 : index
    %80 = vector.load %arg5[%c0_31, %79, %c0_32, %c0_33] : memref<1x8x8x128xf32, #tpu.memory_space<vmem>>, vector<1x1x8x128xf32>
    %81 = vector.shape_cast %80 : vector<1x1x8x128xf32> to vector<8x128xf32>
    %82 = vector.shape_cast %78 : vector<8x128xf32> to vector<1x1x8x128xf32>
    tpu.vector_store %arg5[%c0_31, %79, %c0_32, %c0_33], %82 {strides = array<i32>} : memref<1x8x8x128xf32, #tpu.memory_space<vmem>>, vector<1x1x8x128xf32>,
    %c2_i32 = arith.constant 2 : i32
    %83 = arith.index_cast %c2_i32 : i32 to index
    %c0_34 = arith.constant 0 : index
    %c0_35 = arith.constant 0 : index
    %84 = vector.load %arg7[%83, %c0_34, %c0_35] : memref<8x8x512xf32, #tpu.memory_space<vmem>>, vector<1x8x512xf32>
    %85 = vector.shape_cast %84 : vector<1x8x512xf32> to vector<8x512xf32>
    %cst_36 = arith.constant dense<0.000000e+00> : vector<8x512xf32>
    %86 = tpu.matmul %78, %12, %cst_36 {dimension_numbers = #tpu.dot_dimension_numbers<[1], [0], [0], [1], [0, 0, 1, 1], [], []>} : vector<8x128xf32>, vector<128x512xf32>, vector<8x512xf32> -> vector<8x512xf32>
    %87 = arith.addf %85, %86 : vector<8x512xf32>
    %88 = vector.extract_strided_slice %87 {offsets = [0, 0], sizes = [8, 128], strides = [1, 1]} : vector<8x512xf32> to vector<8x128xf32>
    %89 = arith.negf %88 : vector<8x128xf32>
    %90 = math.exp %89 : vector<8x128xf32>
    %cst_37 = arith.constant 1.000000e+00 : f32
    %91 = vector.broadcast %cst_37 : f32 to vector<8x128xf32>
    %92 = arith.addf %91, %90 : vector<8x128xf32>
    %93 = arith.divf %91, %92 : vector<8x128xf32>
    %94 = vector.extract_strided_slice %87 {offsets = [0, 128], sizes = [8, 128], strides = [1, 1]} : vector<8x512xf32> to vector<8x128xf32>
    %95 = arith.negf %94 : vector<8x128xf32>
    %96 = math.exp %95 : vector<8x128xf32>
    %cst_38 = arith.constant 1.000000e+00 : f32
    %97 = vector.broadcast %cst_38 : f32 to vector<8x128xf32>
    %98 = arith.addf %97, %96 : vector<8x128xf32>
    %99 = arith.divf %97, %98 : vector<8x128xf32>
    %100 = vector.extract_strided_slice %87 {offsets = [0, 256], sizes = [8, 128], strides = [1, 1]} : vector<8x512xf32> to vector<8x128xf32>
    %101 = math.tanh %100 : vector<8x128xf32>
    %102 = vector.extract_strided_slice %87 {offsets = [0, 384], sizes = [8, 128], strides = [1, 1]} : vector<8x512xf32> to vector<8x128xf32>
    %103 = arith.negf %102 : vector<8x128xf32>
    %104 = math.exp %103 : vector<8x128xf32>
    %cst_39 = arith.constant 1.000000e+00 : f32
    %105 = vector.broadcast %cst_39 : f32 to vector<8x128xf32>
    %106 = arith.addf %105, %104 : vector<8x128xf32>
    %107 = arith.divf %105, %106 : vector<8x128xf32>
    %108 = arith.mulf %99, %76 : vector<8x128xf32>
    %109 = arith.mulf %93, %101 : vector<8x128xf32>
    %110 = arith.addf %108, %109 : vector<8x128xf32>
    %111 = math.tanh %110 : vector<8x128xf32>
    %112 = arith.mulf %107, %111 : vector<8x128xf32>
    %c0_40 = arith.constant 0 : index
    %113 = arith.index_cast %c2_i32 : i32 to index
    %c0_41 = arith.constant 0 : index
    %c0_42 = arith.constant 0 : index
    %114 = vector.load %arg5[%c0_40, %113, %c0_41, %c0_42] : memref<1x8x8x128xf32, #tpu.memory_space<vmem>>, vector<1x1x8x128xf32>
    %115 = vector.shape_cast %114 : vector<1x1x8x128xf32> to vector<8x128xf32>
    %116 = vector.shape_cast %112 : vector<8x128xf32> to vector<1x1x8x128xf32>
    tpu.vector_store %arg5[%c0_40, %113, %c0_41, %c0_42], %116 {strides = array<i32>} : memref<1x8x8x128xf32, #tpu.memory_space<vmem>>, vector<1x1x8x128xf32>,
    %c3_i32 = arith.constant 3 : i32
    %117 = arith.index_cast %c3_i32 : i32 to index
    %c0_43 = arith.constant 0 : index
    %c0_44 = arith.constant 0 : index
    %118 = vector.load %arg7[%117, %c0_43, %c0_44] : memref<8x8x512xf32, #tpu.memory_space<vmem>>, vector<1x8x512xf32>
    %119 = vector.shape_cast %118 : vector<1x8x512xf32> to vector<8x512xf32>
    %cst_45 = arith.constant dense<0.000000e+00> : vector<8x512xf32>
    %120 = tpu.matmul %112, %12, %cst_45 {dimension_numbers = #tpu.dot_dimension_numbers<[1], [0], [0], [1], [0, 0, 1, 1], [], []>} : vector<8x128xf32>, vector<128x512xf32>, vector<8x512xf32> -> vector<8x512xf32>
    %121 = arith.addf %119, %120 : vector<8x512xf32>
    %122 = vector.extract_strided_slice %121 {offsets = [0, 0], sizes = [8, 128], strides = [1, 1]} : vector<8x512xf32> to vector<8x128xf32>
    %123 = arith.negf %122 : vector<8x128xf32>
    %124 = math.exp %123 : vector<8x128xf32>
    %cst_46 = arith.constant 1.000000e+00 : f32
    %125 = vector.broadcast %cst_46 : f32 to vector<8x128xf32>
    %126 = arith.addf %125, %124 : vector<8x128xf32>
    %127 = arith.divf %125, %126 : vector<8x128xf32>
    %128 = vector.extract_strided_slice %121 {offsets = [0, 128], sizes = [8, 128], strides = [1, 1]} : vector<8x512xf32> to vector<8x128xf32>
    %129 = arith.negf %128 : vector<8x128xf32>
    %130 = math.exp %129 : vector<8x128xf32>
    %cst_47 = arith.constant 1.000000e+00 : f32
    %131 = vector.broadcast %cst_47 : f32 to vector<8x128xf32>
    %132 = arith.addf %131, %130 : vector<8x128xf32>
    %133 = arith.divf %131, %132 : vector<8x128xf32>
    %134 = vector.extract_strided_slice %121 {offsets = [0, 256], sizes = [8, 128], strides = [1, 1]} : vector<8x512xf32> to vector<8x128xf32>
    %135 = math.tanh %134 : vector<8x128xf32>
    %136 = vector.extract_strided_slice %121 {offsets = [0, 384], sizes = [8, 128], strides = [1, 1]} : vector<8x512xf32> to vector<8x128xf32>
    %137 = arith.negf %136 : vector<8x128xf32>
    %138 = math.exp %137 : vector<8x128xf32>
    %cst_48 = arith.constant 1.000000e+00 : f32
    %139 = vector.broadcast %cst_48 : f32 to vector<8x128xf32>
    %140 = arith.addf %139, %138 : vector<8x128xf32>
    %141 = arith.divf %139, %140 : vector<8x128xf32>
    %142 = arith.mulf %133, %110 : vector<8x128xf32>
    %143 = arith.mulf %127, %135 : vector<8x128xf32>
    %144 = arith.addf %142, %143 : vector<8x128xf32>
    %145 = math.tanh %144 : vector<8x128xf32>
    %146 = arith.mulf %141, %145 : vector<8x128xf32>
    %c0_49 = arith.constant 0 : index
    %147 = arith.index_cast %c3_i32 : i32 to index
    %c0_50 = arith.constant 0 : index
    %c0_51 = arith.constant 0 : index
    %148 = vector.load %arg5[%c0_49, %147, %c0_50, %c0_51] : memref<1x8x8x128xf32, #tpu.memory_space<vmem>>, vector<1x1x8x128xf32>
    %149 = vector.shape_cast %148 : vector<1x1x8x128xf32> to vector<8x128xf32>
    %150 = vector.shape_cast %146 : vector<8x128xf32> to vector<1x1x8x128xf32>
    tpu.vector_store %arg5[%c0_49, %147, %c0_50, %c0_51], %150 {strides = array<i32>} : memref<1x8x8x128xf32, #tpu.memory_space<vmem>>, vector<1x1x8x128xf32>,
    %c4_i32 = arith.constant 4 : i32
    %151 = arith.index_cast %c4_i32 : i32 to index
    %c0_52 = arith.constant 0 : index
    %c0_53 = arith.constant 0 : index
    %152 = vector.load %arg7[%151, %c0_52, %c0_53] : memref<8x8x512xf32, #tpu.memory_space<vmem>>, vector<1x8x512xf32>
    %153 = vector.shape_cast %152 : vector<1x8x512xf32> to vector<8x512xf32>
    %cst_54 = arith.constant dense<0.000000e+00> : vector<8x512xf32>
    %154 = tpu.matmul %146, %12, %cst_54 {dimension_numbers = #tpu.dot_dimension_numbers<[1], [0], [0], [1], [0, 0, 1, 1], [], []>} : vector<8x128xf32>, vector<128x512xf32>, vector<8x512xf32> -> vector<8x512xf32>
    %155 = arith.addf %153, %154 : vector<8x512xf32>
    %156 = vector.extract_strided_slice %155 {offsets = [0, 0], sizes = [8, 128], strides = [1, 1]} : vector<8x512xf32> to vector<8x128xf32>
    %157 = arith.negf %156 : vector<8x128xf32>
    %158 = math.exp %157 : vector<8x128xf32>
    %cst_55 = arith.constant 1.000000e+00 : f32
    %159 = vector.broadcast %cst_55 : f32 to vector<8x128xf32>
    %160 = arith.addf %159, %158 : vector<8x128xf32>
    %161 = arith.divf %159, %160 : vector<8x128xf32>
    %162 = vector.extract_strided_slice %155 {offsets = [0, 128], sizes = [8, 128], strides = [1, 1]} : vector<8x512xf32> to vector<8x128xf32>
    %163 = arith.negf %162 : vector<8x128xf32>
    %164 = math.exp %163 : vector<8x128xf32>
    %cst_56 = arith.constant 1.000000e+00 : f32
    %165 = vector.broadcast %cst_56 : f32 to vector<8x128xf32>
    %166 = arith.addf %165, %164 : vector<8x128xf32>
    %167 = arith.divf %165, %166 : vector<8x128xf32>
    %168 = vector.extract_strided_slice %155 {offsets = [0, 256], sizes = [8, 128], strides = [1, 1]} : vector<8x512xf32> to vector<8x128xf32>
    %169 = math.tanh %168 : vector<8x128xf32>
    %170 = vector.extract_strided_slice %155 {offsets = [0, 384], sizes = [8, 128], strides = [1, 1]} : vector<8x512xf32> to vector<8x128xf32>
    %171 = arith.negf %170 : vector<8x128xf32>
    %172 = math.exp %171 : vector<8x128xf32>
    %cst_57 = arith.constant 1.000000e+00 : f32
    %173 = vector.broadcast %cst_57 : f32 to vector<8x128xf32>
    %174 = arith.addf %173, %172 : vector<8x128xf32>
    %175 = arith.divf %173, %174 : vector<8x128xf32>
    %176 = arith.mulf %167, %144 : vector<8x128xf32>
    %177 = arith.mulf %161, %169 : vector<8x128xf32>
    %178 = arith.addf %176, %177 : vector<8x128xf32>
    %179 = math.tanh %178 : vector<8x128xf32>
    %180 = arith.mulf %175, %179 : vector<8x128xf32>
    %c0_58 = arith.constant 0 : index
    %181 = arith.index_cast %c4_i32 : i32 to index
    %c0_59 = arith.constant 0 : index
    %c0_60 = arith.constant 0 : index
    %182 = vector.load %arg5[%c0_58, %181, %c0_59, %c0_60] : memref<1x8x8x128xf32, #tpu.memory_space<vmem>>, vector<1x1x8x128xf32>
    %183 = vector.shape_cast %182 : vector<1x1x8x128xf32> to vector<8x128xf32>
    %184 = vector.shape_cast %180 : vector<8x128xf32> to vector<1x1x8x128xf32>
    tpu.vector_store %arg5[%c0_58, %181, %c0_59, %c0_60], %184 {strides = array<i32>} : memref<1x8x8x128xf32, #tpu.memory_space<vmem>>, vector<1x1x8x128xf32>,
    %c5_i32 = arith.constant 5 : i32
    %185 = arith.index_cast %c5_i32 : i32 to index
    %c0_61 = arith.constant 0 : index
    %c0_62 = arith.constant 0 : index
    %186 = vector.load %arg7[%185, %c0_61, %c0_62] : memref<8x8x512xf32, #tpu.memory_space<vmem>>, vector<1x8x512xf32>
    %187 = vector.shape_cast %186 : vector<1x8x512xf32> to vector<8x512xf32>
    %cst_63 = arith.constant dense<0.000000e+00> : vector<8x512xf32>
    %188 = tpu.matmul %180, %12, %cst_63 {dimension_numbers = #tpu.dot_dimension_numbers<[1], [0], [0], [1], [0, 0, 1, 1], [], []>} : vector<8x128xf32>, vector<128x512xf32>, vector<8x512xf32> -> vector<8x512xf32>
    %189 = arith.addf %187, %188 : vector<8x512xf32>
    %190 = vector.extract_strided_slice %189 {offsets = [0, 0], sizes = [8, 128], strides = [1, 1]} : vector<8x512xf32> to vector<8x128xf32>
    %191 = arith.negf %190 : vector<8x128xf32>
    %192 = math.exp %191 : vector<8x128xf32>
    %cst_64 = arith.constant 1.000000e+00 : f32
    %193 = vector.broadcast %cst_64 : f32 to vector<8x128xf32>
    %194 = arith.addf %193, %192 : vector<8x128xf32>
    %195 = arith.divf %193, %194 : vector<8x128xf32>
    %196 = vector.extract_strided_slice %189 {offsets = [0, 128], sizes = [8, 128], strides = [1, 1]} : vector<8x512xf32> to vector<8x128xf32>
    %197 = arith.negf %196 : vector<8x128xf32>
    %198 = math.exp %197 : vector<8x128xf32>
    %cst_65 = arith.constant 1.000000e+00 : f32
    %199 = vector.broadcast %cst_65 : f32 to vector<8x128xf32>
    %200 = arith.addf %199, %198 : vector<8x128xf32>
    %201 = arith.divf %199, %200 : vector<8x128xf32>
    %202 = vector.extract_strided_slice %189 {offsets = [0, 256], sizes = [8, 128], strides = [1, 1]} : vector<8x512xf32> to vector<8x128xf32>
    %203 = math.tanh %202 : vector<8x128xf32>
    %204 = vector.extract_strided_slice %189 {offsets = [0, 384], sizes = [8, 128], strides = [1, 1]} : vector<8x512xf32> to vector<8x128xf32>
    %205 = arith.negf %204 : vector<8x128xf32>
    %206 = math.exp %205 : vector<8x128xf32>
    %cst_66 = arith.constant 1.000000e+00 : f32
    %207 = vector.broadcast %cst_66 : f32 to vector<8x128xf32>
    %208 = arith.addf %207, %206 : vector<8x128xf32>
    %209 = arith.divf %207, %208 : vector<8x128xf32>
    %210 = arith.mulf %201, %178 : vector<8x128xf32>
    %211 = arith.mulf %195, %203 : vector<8x128xf32>
    %212 = arith.addf %210, %211 : vector<8x128xf32>
    %213 = math.tanh %212 : vector<8x128xf32>
    %214 = arith.mulf %209, %213 : vector<8x128xf32>
    %c0_67 = arith.constant 0 : index
    %215 = arith.index_cast %c5_i32 : i32 to index
    %c0_68 = arith.constant 0 : index
    %c0_69 = arith.constant 0 : index
    %216 = vector.load %arg5[%c0_67, %215, %c0_68, %c0_69] : memref<1x8x8x128xf32, #tpu.memory_space<vmem>>, vector<1x1x8x128xf32>
    %217 = vector.shape_cast %216 : vector<1x1x8x128xf32> to vector<8x128xf32>
    %218 = vector.shape_cast %214 : vector<8x128xf32> to vector<1x1x8x128xf32>
    tpu.vector_store %arg5[%c0_67, %215, %c0_68, %c0_69], %218 {strides = array<i32>} : memref<1x8x8x128xf32, #tpu.memory_space<vmem>>, vector<1x1x8x128xf32>,
    %c6_i32 = arith.constant 6 : i32
    %219 = arith.index_cast %c6_i32 : i32 to index
    %c0_70 = arith.constant 0 : index
    %c0_71 = arith.constant 0 : index
    %220 = vector.load %arg7[%219, %c0_70, %c0_71] : memref<8x8x512xf32, #tpu.memory_space<vmem>>, vector<1x8x512xf32>
    %221 = vector.shape_cast %220 : vector<1x8x512xf32> to vector<8x512xf32>
    %cst_72 = arith.constant dense<0.000000e+00> : vector<8x512xf32>
    %222 = tpu.matmul %214, %12, %cst_72 {dimension_numbers = #tpu.dot_dimension_numbers<[1], [0], [0], [1], [0, 0, 1, 1], [], []>} : vector<8x128xf32>, vector<128x512xf32>, vector<8x512xf32> -> vector<8x512xf32>
    %223 = arith.addf %221, %222 : vector<8x512xf32>
    %224 = vector.extract_strided_slice %223 {offsets = [0, 0], sizes = [8, 128], strides = [1, 1]} : vector<8x512xf32> to vector<8x128xf32>
    %225 = arith.negf %224 : vector<8x128xf32>
    %226 = math.exp %225 : vector<8x128xf32>
    %cst_73 = arith.constant 1.000000e+00 : f32
    %227 = vector.broadcast %cst_73 : f32 to vector<8x128xf32>
    %228 = arith.addf %227, %226 : vector<8x128xf32>
    %229 = arith.divf %227, %228 : vector<8x128xf32>
    %230 = vector.extract_strided_slice %223 {offsets = [0, 128], sizes = [8, 128], strides = [1, 1]} : vector<8x512xf32> to vector<8x128xf32>
    %231 = arith.negf %230 : vector<8x128xf32>
    %232 = math.exp %231 : vector<8x128xf32>
    %cst_74 = arith.constant 1.000000e+00 : f32
    %233 = vector.broadcast %cst_74 : f32 to vector<8x128xf32>
    %234 = arith.addf %233, %232 : vector<8x128xf32>
    %235 = arith.divf %233, %234 : vector<8x128xf32>
    %236 = vector.extract_strided_slice %223 {offsets = [0, 256], sizes = [8, 128], strides = [1, 1]} : vector<8x512xf32> to vector<8x128xf32>
    %237 = math.tanh %236 : vector<8x128xf32>
    %238 = vector.extract_strided_slice %223 {offsets = [0, 384], sizes = [8, 128], strides = [1, 1]} : vector<8x512xf32> to vector<8x128xf32>
    %239 = arith.negf %238 : vector<8x128xf32>
    %240 = math.exp %239 : vector<8x128xf32>
    %cst_75 = arith.constant 1.000000e+00 : f32
    %241 = vector.broadcast %cst_75 : f32 to vector<8x128xf32>
    %242 = arith.addf %241, %240 : vector<8x128xf32>
    %243 = arith.divf %241, %242 : vector<8x128xf32>
    %244 = arith.mulf %235, %212 : vector<8x128xf32>
    %245 = arith.mulf %229, %237 : vector<8x128xf32>
    %246 = arith.addf %244, %245 : vector<8x128xf32>
    %247 = math.tanh %246 : vector<8x128xf32>
    %248 = arith.mulf %243, %247 : vector<8x128xf32>
    %c0_76 = arith.constant 0 : index
    %249 = arith.index_cast %c6_i32 : i32 to index
    %c0_77 = arith.constant 0 : index
    %c0_78 = arith.constant 0 : index
    %250 = vector.load %arg5[%c0_76, %249, %c0_77, %c0_78] : memref<1x8x8x128xf32, #tpu.memory_space<vmem>>, vector<1x1x8x128xf32>
    %251 = vector.shape_cast %250 : vector<1x1x8x128xf32> to vector<8x128xf32>
    %252 = vector.shape_cast %248 : vector<8x128xf32> to vector<1x1x8x128xf32>
    tpu.vector_store %arg5[%c0_76, %249, %c0_77, %c0_78], %252 {strides = array<i32>} : memref<1x8x8x128xf32, #tpu.memory_space<vmem>>, vector<1x1x8x128xf32>,
    %c7_i32 = arith.constant 7 : i32
    %253 = arith.index_cast %c7_i32 : i32 to index
    %c0_79 = arith.constant 0 : index
    %c0_80 = arith.constant 0 : index
    %254 = vector.load %arg7[%253, %c0_79, %c0_80] : memref<8x8x512xf32, #tpu.memory_space<vmem>>, vector<1x8x512xf32>
    %255 = vector.shape_cast %254 : vector<1x8x512xf32> to vector<8x512xf32>
    %cst_81 = arith.constant dense<0.000000e+00> : vector<8x512xf32>
    %256 = tpu.matmul %248, %12, %cst_81 {dimension_numbers = #tpu.dot_dimension_numbers<[1], [0], [0], [1], [0, 0, 1, 1], [], []>} : vector<8x128xf32>, vector<128x512xf32>, vector<8x512xf32> -> vector<8x512xf32>
    %257 = arith.addf %255, %256 : vector<8x512xf32>
    %258 = vector.extract_strided_slice %257 {offsets = [0, 0], sizes = [8, 128], strides = [1, 1]} : vector<8x512xf32> to vector<8x128xf32>
    %259 = arith.negf %258 : vector<8x128xf32>
    %260 = math.exp %259 : vector<8x128xf32>
    %cst_82 = arith.constant 1.000000e+00 : f32
    %261 = vector.broadcast %cst_82 : f32 to vector<8x128xf32>
    %262 = arith.addf %261, %260 : vector<8x128xf32>
    %263 = arith.divf %261, %262 : vector<8x128xf32>
    %264 = vector.extract_strided_slice %257 {offsets = [0, 128], sizes = [8, 128], strides = [1, 1]} : vector<8x512xf32> to vector<8x128xf32>
    %265 = arith.negf %264 : vector<8x128xf32>
    %266 = math.exp %265 : vector<8x128xf32>
    %cst_83 = arith.constant 1.000000e+00 : f32
    %267 = vector.broadcast %cst_83 : f32 to vector<8x128xf32>
    %268 = arith.addf %267, %266 : vector<8x128xf32>
    %269 = arith.divf %267, %268 : vector<8x128xf32>
    %270 = vector.extract_strided_slice %257 {offsets = [0, 256], sizes = [8, 128], strides = [1, 1]} : vector<8x512xf32> to vector<8x128xf32>
    %271 = math.tanh %270 : vector<8x128xf32>
    %272 = vector.extract_strided_slice %257 {offsets = [0, 384], sizes = [8, 128], strides = [1, 1]} : vector<8x512xf32> to vector<8x128xf32>
    %273 = arith.negf %272 : vector<8x128xf32>
    %274 = math.exp %273 : vector<8x128xf32>
    %cst_84 = arith.constant 1.000000e+00 : f32
    %275 = vector.broadcast %cst_84 : f32 to vector<8x128xf32>
    %276 = arith.addf %275, %274 : vector<8x128xf32>
    %277 = arith.divf %275, %276 : vector<8x128xf32>
    %278 = arith.mulf %269, %246 : vector<8x128xf32>
    %279 = arith.mulf %263, %271 : vector<8x128xf32>
    %280 = arith.addf %278, %279 : vector<8x128xf32>
    %281 = math.tanh %280 : vector<8x128xf32>
    %282 = arith.mulf %277, %281 : vector<8x128xf32>
    %c0_85 = arith.constant 0 : index
    %283 = arith.index_cast %c7_i32 : i32 to index
    %c0_86 = arith.constant 0 : index
    %c0_87 = arith.constant 0 : index
    %284 = vector.load %arg5[%c0_85, %283, %c0_86, %c0_87] : memref<1x8x8x128xf32, #tpu.memory_space<vmem>>, vector<1x1x8x128xf32>
    %285 = vector.shape_cast %284 : vector<1x1x8x128xf32> to vector<8x128xf32>
    %286 = vector.shape_cast %282 : vector<8x128xf32> to vector<1x1x8x128xf32>
    tpu.vector_store %arg5[%c0_85, %283, %c0_86, %c0_87], %286 {strides = array<i32>} : memref<1x8x8x128xf32, #tpu.memory_space<vmem>>, vector<1x1x8x128xf32>,
    %c8_i32 = arith.constant 8 : i32
    %c0_88 = arith.constant 0 : index
    %c0_89 = arith.constant 0 : index
    %c0_90 = arith.constant 0 : index
    %287 = vector.load %arg6[%c0_88, %c0_89, %c0_90] : memref<1x8x128xf32, #tpu.memory_space<vmem>>, vector<1x8x128xf32>
    %288 = vector.shape_cast %287 : vector<1x8x128xf32> to vector<8x128xf32>
    %289 = vector.shape_cast %280 : vector<8x128xf32> to vector<1x8x128xf32>
    tpu.vector_store %arg6[%c0_88, %c0_89, %c0_90], %289 {strides = array<i32>} : memref<1x8x128xf32, #tpu.memory_space<vmem>>, vector<1x8x128xf32>,
    return
  }
  func.func @transform_0(%arg0: i32) -> (i32, i32, i32) {
    %c0_i32 = arith.constant 0 : i32
    %c0_i32_0 = arith.constant 0 : i32
    %c0_i32_1 = arith.constant 0 : i32
    return %arg0, %c0_i32, %c0_i32_0 : i32, i32, i32
  }
  func.func @transform_1(%arg0: i32) -> (i32, i32, i32) {
    %c0_i32 = arith.constant 0 : i32
    %c0_i32_0 = arith.constant 0 : i32
    %c0_i32_1 = arith.constant 0 : i32
    return %arg0, %c0_i32, %c0_i32_0 : i32, i32, i32
  }
  func.func @transform_2(%arg0: i32) -> (i32, i32, i32) {
    %c0_i32 = arith.constant 0 : i32
    %c0_i32_0 = arith.constant 0 : i32
    %c0_i32_1 = arith.constant 0 : i32
    return %arg0, %c0_i32, %c0_i32_0 : i32, i32, i32
  }
  func.func @transform_3(%arg0: i32) -> (i32, i32, i32) {
    %c0_i32 = arith.constant 0 : i32
    %c0_i32_0 = arith.constant 0 : i32
    %c0_i32_1 = arith.constant 0 : i32
    return %arg0, %c0_i32, %c0_i32_0 : i32, i32, i32
  }
  func.func @transform_4(%arg0: i32) -> (i32, i32, i32, i32) {
    %c0_i32 = arith.constant 0 : i32
    %c0_i32_0 = arith.constant 0 : i32
    %c0_i32_1 = arith.constant 0 : i32
    %c0_i32_2 = arith.constant 0 : i32
    return %arg0, %c0_i32, %c0_i32_0, %c0_i32_1 : i32, i32, i32, i32
  }
  func.func @transform_5(%arg0: i32) -> (i32, i32, i32) {
    %c0_i32 = arith.constant 0 : i32
    %c0_i32_0 = arith.constant 0 : i32
    %c0_i32_1 = arith.constant 0 : i32
    return %arg0, %c0_i32, %c0_i32_0 : i32, i32, i32
  }
}

</mosaic_0001>

<bundles_post_ra>
// kernel: tpu_custom_call.1
= control target key start
LH: loop header
LB: loop body
LE: loop exit
PB: predicated region body
PF: predicated region fallthrough
CT: control target
= control target key end

     0   :  { %s4106_s0 = inlined_call_operand.hbm [shape: f32[2,64,128], index: 0, kind: input, shape index: {}]   ;;  %s4107_s1 = inlined_call_operand.hbm [shape: f32[2,128,512], index: 1, kind: input, shape index: {}]   ;;  %s4108_s2 = inlined_call_operand.hbm [shape: f32[2,128,512], index: 2, kind: input, shape index: {}]   ;;  %s4109_s3 = inlined_call_operand.hbm [shape: f32[2,1,512], index: 3, kind: input, shape index: {}]   ;;  %s4110_s4 = inlined_call_operand.hbm [shape: f32[2,8,8,128], index: 4, kind: output, shape index: {0}]   ;;  %s4111_s5 = inlined_call_operand.hbm [shape: f32[2,8,128], index: 5, kind: output, shape index: {1}]  }
   0x1   :  { %4204 = sst [smem:[#allocation76_spill]] %s4107_s1 }
   0x2   :  { %11 = vsyncpa [#allocation4], 0 }
   0x3   :  { %13 = vsyncpa [#allocation4 + $0x1], 0 }
   0x4   :  { %14 = vsyncpa [#allocation7], 0 }
   0x5   :  { %16 = vsyncpa [#allocation7 + $0x1], 0 }
   0x6   :  { %17 = vsyncpa [#allocation10], 0 }
   0x7   :  { %19 = vsyncpa [#allocation10 + $0x1], 0 }
   0x8   :  { %20 = vsyncpa [#allocation5], 0 }
   0x9   :  { %22 = vsyncpa [#allocation5 + $0x1], 0 }
   0xa   :  { %23 = vsyncpa [#allocation13], 0 }
   0xb   :  { %25 = vsyncpa [#allocation13 + $0x1], 0  ;;  %s2749_s18 = smov 0   ;;  %s2751_s19 = smov 0  }
   0xc   :  { %s2753_s20 = smov 0   ;;  %s2755_s21 = smov 0  }
   0xd LB: > { %4205 = sst [smem:[#allocation19_spill]] %s2706_s20  ;;  %s2770_s22 = sadd.s32 4294967295, %s2710_s21   ;;  %s2710_s21 = sphi %s2755_s21, %s4428_s21   ;;  %s2706_s20 = sphi %s2753_s20, %s4430_s20   ;;  %s2702_s19 = sphi %s2751_s19, %s4432_s19   ;;  %s2698_s18 = sphi %s2749_s18, %s4431_s18  }
   0xe   : > { %s2156_s23 = sadd.s32 4294967294, %s2710_s21   ;;  %s2774_s24 = sadd.s32 1, %s2710_s21  }
   0xf   : > { %4206 = sst [smem:[#allocation20_spill]] %s2774_s24  ;;  %s38_s25 = sadd.s32 1, %s2706_s20 }
  0x10   : > { %s35_s26 = ssub.s32 %s2710_s21, %s2774_s24  ;;  %p45_p0 = scmp.ne.s32.totalorder %s2706_s20, %s2702_s19 }
  0x11   : > { %p36_p1 = scmp.eq.s32.totalorder %s35_s26, 0  ;;  %p46_p2 = scmp.eq.s32.totalorder %s2710_s21, 0 }
  0x12   : > { %p51_p3 = scmp.ne.s32.totalorder %s2702_s19, %s2698_s18  ;;  %p52_p4 = scmp.eq.s32.totalorder %s2770_s22, 0 }
  0x13   : > { %s2786_s27 = scalar_select %p36_p1, %s2706_s20, %s38_s25  }
  0x14   : > { %p47_p5 = por %p46_p2, %p45_p0  ;;  %p2788_p6 = por %p52_p4, %p51_p3 }
  0x15   : > { %4207 = sst [smem:[#allocation21_spill]] %s2786_s27  ;;  %p153_p7 = scmp.eq.s32.totalorder %s2770_s22, 1 }
  0x16   : > { %p159_p8 = scmp.eq.s32.totalorder %s2156_s23, 1  ;;  %p2251_p10 = scmp.lt.s32.totalorder %s2710_s21, 2 }
  0x17   : > { %p2795_p11 = por %p153_p7, %p45_p0  ;;  %s2804_s6 = sand.u32 1, %s2706_s20  }
  0x18   : > { %p2799_p12 = por %p159_p8, %p51_p3  ;;  %p2806_p13 = pnand %p2251_p10, %p47_p5 }
  0x19   : > { %s227_s8 = sand.u32 1, %s2710_s21   ;;  %s4112_s9 = sshll.u32 %s2804_s6, 9 }
  0x1a   : > { %s4210_s30 = scalar_select %p2799_p12, 1, 0 }
  0x1b   : > { %s2216_s10 = sshll.u32 %s2710_s21, 9  ;;  %s4213_s1 = sld [smem:[#allocation76_spill]] }
  0x1c   : > { %4211 = sst [smem:[#allocation22_spill]] %s4210_s30  ;;  %s231_s14 = scalar_lea.vmem [#allocation6], %s4112_s9 }
  0x1d   : > { %s239_s15 = sshll.u32 %s231_s14, 4  ;;  %s2818_s17 = scalar_lea.sflag [#allocation7], %s227_s8  ;;  %s240_s15 = int_to_ptr.vmem [resolvable:$true] %s239_s15 }
  0x1e   : > { %p2488_p1 = pneg %p2806_p13 }
  0x21   : > { %s236_s13 = scalar_lea.hbm %s4213_s1, %s2216_s10  ;;  %s2491_s12 = scalar_lea.hbm %s4213_s1, 1024 }
  0x22   : > { %s237_s16 = sshll.u32 %s236_s13, 4  ;;  %s238_s16 = int_to_ptr.hbm [resolvable:$true] %s237_s16 }
  0x23   : > { %s2484_s23 = sshra.s32 %s238_s16, 4  ;;  %s2485_s23 = int_to_ptr.hbm [resolvable:$true] %s2484_s23 }
  0x24   : > { %s2486_s25 = scalar_lea.hbm %s2485_s23, 512  ;;  %p2492_p4 = scmp.lt.s32.totalorder %s2485_s23, %s4213_s1 }
  0x25   : > { %p2487_p0 = scmp.ne.s32.totalorder %s2485_s23, %s2486_s25  ;;  %p2493_p5 = scmp.lt.s32.totalorder %s2491_s12, %s2486_s25 }
  0x27   : > { %p2489_p2 = pnand %p2488_p1, %p2487_p0  ;;  %p2494_p7 = por %p2493_p5, %p2492_p4 }
  0x29   : > { %p2490_p3 = pneg %p2489_p2 }
  0x2b   : > { %p2495_p8 = pnand %p2494_p7, %p2490_p3 }
  0x2d   : > { %2498 = shalt.err (!%p2495_p8)
}
  0x2e   : > { %s4113_s8 = smov 512   ;;  %s4114_s9 = smov 32  }
  0x2f   : > { %2237 = dma.hbm_to_vmem [thread:$0]  (!%p2806_p13), %s238_s16, 8192, %s240_s15, %s2818_s17, %s4113_s8, %s4113_s8, %s4114_s9  }
  0x30   : > { %s258_s25 = scalar_lea.hbm %s4108_s2, %s2216_s10  ;;  %s4214_s11 = sshll.u32 %s2804_s6, 9 }
  0x31   : > { %s253_s12 = scalar_lea.vmem [#allocation8], %s4214_s11  ;;  %s259_s13 = sshll.u32 %s258_s25, 4  ;;  %s2844_s13 = int_to_ptr.hbm [resolvable:$true] %s259_s13 }
  0x32   : > { %s261_s14 = sshll.u32 %s253_s12, 4  ;;  %p2170_p10 = scmp.ge.s32.totalorder %s2710_s21, 1  ;;  %s2842_s14 = int_to_ptr.vmem [resolvable:$true] %s261_s14 }
  0x33   : > { %p288_p0 = scmp.lt.s32.totalorder %s2710_s21, 3  ;;  %s2159_s1 = sshll.u32 %s2804_s6, 6 }
  0x34   : > { %s2215_s27 = sshll.u32 %s2710_s21, 6  ;;  %s209_s23 = scalar_lea.vmem [#allocation3], %s2159_s1 }
  0x35   : > { %p2850_p2 = pnand %p2170_p10, %p288_p0  ;;  %s214_s26 = scalar_lea.hbm %s4106_s0, %s2215_s27 }
  0x36   : > { %s217_s11 = sshll.u32 %s209_s23, 4  ;;  %s215_s25 = sshll.u32 %s214_s26, 4  ;;  %s218_s11 = int_to_ptr.vmem [resolvable:$true] %s217_s11  ;;  %s216_s25 = int_to_ptr.hbm [resolvable:$true] %s215_s25 }
  0x37   : > { %s206_s12 = scalar_lea.sflag [#allocation4], %s2804_s6  ;;  %s2514_s8 = sshra.s32 %s216_s25, 4  ;;  %s2515_s8 = int_to_ptr.hbm [resolvable:$true] %s2514_s8 }
  0x38   : > { %s2516_s9 = scalar_lea.hbm %s2515_s8, 64  ;;  %s2521_s30 = scalar_lea.hbm %s4106_s0, 128 }
  0x39   : > { %p2517_p3 = scmp.ne.s32.totalorder %s2515_s8, %s2516_s9  ;;  %p2522_p7 = scmp.lt.s32.totalorder %s2515_s8, %s4106_s0 }
  0x3a   : > { %p2523_p8 = scmp.lt.s32.totalorder %s2521_s30, %s2516_s9 }
  0x3b   : > { %p2519_p4 = pnand %p2517_p3, %p2488_p1 }
  0x3c   : > { %p2524_p10 = por %p2523_p8, %p2522_p7 }
  0x3d   : > { %p2520_p5 = pneg %p2519_p4 }
  0x3f   : > { %p2525_p0 = pnand %p2524_p10, %p2520_p5 }
  0x41   : > { %2528 = shalt.err (!%p2525_p0)
}
  0x42   : > { %s2714_s1 = smov 128   ;;  %s2715_s10 = smov 8  }
  0x43   : > { %2234 = dma.hbm_to_vmem [thread:$0]  (!%p2806_p13), %s216_s25, 1024, %s218_s11, %s206_s12, %s2714_s1, %s2714_s1, %s2715_s10  }
  0x44   : > { %s2544_s26 = sshra.s32 %s2844_s13, 4  ;;  %s2551_s30 = scalar_lea.hbm %s4108_s2, 1024  ;;  %s2545_s26 = int_to_ptr.hbm [resolvable:$true] %s2544_s26 }
  0x45   : > { %s2546_s23 = scalar_lea.hbm %s2545_s26, 512  ;;  %p2552_p5 = scmp.lt.s32.totalorder %s2545_s26, %s4108_s2 }
  0x46   : > { %p2547_p3 = scmp.ne.s32.totalorder %s2545_s26, %s2546_s23  ;;  %p2553_p7 = scmp.lt.s32.totalorder %s2551_s30, %s2546_s23 }
  0x48   : > { %p2549_p4 = pnand %p2547_p3, %p2488_p1  ;;  %p2554_p8 = por %p2553_p7, %p2552_p5 }
  0x4a   : > { %p2550_p9 = pneg %p2549_p4 }
  0x4c   : > { %p2555_p10 = pnand %p2554_p8, %p2550_p9 }
  0x4e   : > { %2558 = shalt.err (!%p2555_p10)
}
  0x4f   : > { %s4216_s11 = smov 32   ;;  %s4217_s25 = smov 512  }
  0x50   : > { %2240 = dma.hbm_to_vmem [thread:$0]  (!%p2806_p13), %s2844_s13, 8192, %s2842_s14, %s2818_s17, %s4217_s25, %s4217_s25, %s4216_s11  }
  0x51   : > { %s2168_s12 = sshll.u32 %s2804_s6, 2  ;;  %s2169_s16 = sshll.u32 %s2710_s21, 2 }
  0x52   : > { %s279_s10 = scalar_lea.hbm %s4109_s3, %s2169_s16  ;;  %s275_s23 = scalar_lea.vmem [#allocation9], %s2168_s12 }
  0x53   : > { %s281_s26 = sshll.u32 %s279_s10, 4  ;;  %s283_s20 = sshll.u32 %s275_s23, 4  ;;  %s282_s26 = int_to_ptr.hbm [resolvable:$true] %s281_s26  ;;  %s284_s20 = int_to_ptr.vmem [resolvable:$true] %s283_s20 }
  0x54   : > { %s272_s24 = scalar_lea.sflag [#allocation10], %s2804_s6  ;;  %s2574_s30 = sshra.s32 %s282_s26, 4  ;;  %s2575_s30 = int_to_ptr.hbm [resolvable:$true] %s2574_s30 }
  0x55   : > { %s2576_s9 = scalar_lea.hbm %s2575_s30, 4  ;;  %s2581_s13 = scalar_lea.hbm %s4109_s3, 8 }
  0x56   : > { %p2577_p9 = scmp.ne.s32.totalorder %s2575_s30, %s2576_s9  ;;  %p2582_p4 = scmp.lt.s32.totalorder %s2575_s30, %s4109_s3 }
  0x57   : > { %p2583_p5 = scmp.lt.s32.totalorder %s2581_s13, %s2576_s9 }
  0x58   : > { %p2579_p0 = pnand %p2577_p9, %p2488_p1 }
  0x59   : > { %p2584_p7 = por %p2583_p5, %p2582_p4 }
  0x5a   : > { %p2580_p3 = pneg %p2579_p0 }
  0x5c   : > { %p2585_p8 = pnand %p2584_p7, %p2580_p3 }
  0x5e   : > { %2588 = shalt.err (!%p2585_p8)
}
  0x5f   : > { %2243 = dma.hbm_to_vmem [thread:$0]  (!%p2806_p13), %s282_s26, 64, %s284_s20, %s272_s24  }
  0x60   : > { %292 = sbr.rel (%p2850_p2) target bundleno = 1576 (0x628), region = 36 }
  0x65   : > { %s2907_s6 = sand.u32 1, %s2702_s19  }
  0x66   : > { %s2171_s25 = sshll.u32 %s2907_s6, 6  ;;  %s295_s12 = scalar_lea.sflag [#allocation4], %s2907_s6 }
  0x67   : > { %s2913_s16 = scalar_lea.vmem [#allocation3], %s2171_s25 }
  0x68   : > { %2677 = dma.done.wait (%p2788_p6), %s295_s12, 1024  }
  0x69   : > { %2679 = vsyncadd (%p2788_p6), %s295_s12, 4294966272  ;;  %s304_s7 = sand.u32 1, %s2770_s22   ;;  %s2172_s15 = sshll.u32 %s2907_s6, 9 }
  0x6a   : > { %s305_s27 = scalar_lea.sflag [#allocation7], %s304_s7  ;;  %s2921_s1 = scalar_lea.vmem [#allocation6], %s2172_s15 }
  0x6b   : > { %2681 = dma.done.wait (%p2788_p6), %s305_s27, 16384  }
  0x6c   : > { %2683 = vsyncadd (%p2788_p6), %s305_s27, 4294950912  ;;  %s2174_s10 = sshll.u32 %s2907_s6, 2  ;;  %s2928_s26 = scalar_lea.vmem [#allocation8], %s2172_s15 }
  0x6d   : > { %s325_s23 = scalar_lea.sflag [#allocation10], %s2907_s6  ;;  %s2931_s20 = scalar_lea.vmem [#allocation9], %s2174_s10 }
  0x6e   : > { %2685 = dma.done.wait (%p2788_p6), %s325_s23, 64  }
  0x6f   : > { %2687 = vsyncadd (%p2788_p6), %s325_s23, 4294967232  ;;  %v444_v0 = vld [vmem:[%s2921_s1 + $0x1e0] sm:$0xff]  ;;  %v445_v1 = vld [vmem:[%s2921_s1 + $0x1e8] sm:$0xff]  ;;  %s3471_s28 = scalar_lea.vmem [#allocation11], %s2171_s25  ;;  %s2212_s24 = sshll.u32 %s2770_s22, 3 }
  0x70   : > { %v446_v2 = vld [vmem:[%s2921_s1 + $0x1f0] sm:$0xff]  ;;  %458 = vmatpush.msra.mxu0 %v444_v0  ;;  %499 = vmatpush.msra.mxu1 %v445_v1  ;;  %v447_v3 = vld [vmem:[%s2921_s1 + $0x1f8] sm:$0xff]  ;;  %v440_v4 = vld [vmem:[%s2921_s1 + $0x1c0] sm:$0xff]  ;;  %s2176_s30 = sshll.u32 %s2907_s6, 3  ;;  %s1982_s14 = scalar_lea.hbm %s4111_s5, %s2212_s24 }
  0x71   : > { %v441_v5 = vld [vmem:[%s2921_s1 + $0x1c8] sm:$0xff]  ;;  %540 = vmatpush.msra.mxu2 %v446_v2  ;;  %581 = vmatpush.msra.mxu3 %v447_v3  ;;  %v442_v6 = vld [vmem:[%s2921_s1 + $0x1d0] sm:$0xff]  ;;  %v443_v7 = vld [vmem:[%s2921_s1 + $0x1d8] sm:$0xff]  ;;  %s375_s13 = scalar_lea.vmem [#allocation12], %s2176_s30  ;;  %s1986_s11 = sshll.u32 %s1982_s14, 4  ;;  %s1987_s11 = int_to_ptr.hbm [resolvable:$true] %s1986_s11 }
  0x72   : > { %v436_v8 = vld [vmem:[%s2921_s1 + $0x1a0] sm:$0xff]  ;;  %459 = vmatpush.msra.mxu0 %v440_v4  ;;  %500 = vmatpush.msra.mxu1 %v441_v5  ;;  %v437_v9 = vld [vmem:[%s2921_s1 + $0x1a8] sm:$0xff]  ;;  %v438_v10 = vld [vmem:[%s2921_s1 + $0x1b0] sm:$0xff]  ;;  %s1984_s8 = sshll.u32 %s375_s13, 4  ;;  %s2218_s25 = sshll.u32 %s2770_s22, 6  ;;  %s1985_s8 = int_to_ptr.vmem [resolvable:$true] %s1984_s8 }
  0x73   : > { %v439_v11 = vld [vmem:[%s2921_s1 + $0x1b8] sm:$0xff]  ;;  %541 = vmatpush.msra.mxu2 %v442_v6  ;;  %582 = vmatpush.msra.mxu3 %v443_v7  ;;  %v432_v12 = vld [vmem:[%s2921_s1 + $0x180] sm:$0xff]  ;;  %v433_v13 = vld [vmem:[%s2921_s1 + $0x188] sm:$0xff]  ;;  %s1966_s7 = scalar_lea.hbm %s4110_s4, %s2218_s25  ;;  %s1955_s15 = scalar_lea.sflag [#allocation13], %s2907_s6 }
  0x74   : > { %460 = vmatpush.msra.mxu0 %v436_v8  ;;  %501 = vmatpush.msra.mxu1 %v437_v9  ;;  %v434_v14 = vld [vmem:[%s2921_s1 + $0x190] sm:$0xff]  ;;  %v435_v15 = vld [vmem:[%s2921_s1 + $0x198] sm:$0xff]  ;;  %v428_v16 = vld [vmem:[%s2921_s1 + $0x160] sm:$0xff]  ;;  %s2618_s22 = sshra.s32 %s1987_s11, 4  ;;  %s2619_s22 = int_to_ptr.hbm [resolvable:$true] %s2618_s22 }
  0x75   : > { %542 = vmatpush.msra.mxu2 %v438_v10  ;;  %583 = vmatpush.msra.mxu3 %v439_v11  ;;  %v429_v17 = vld [vmem:[%s2921_s1 + $0x168] sm:$0xff]  ;;  %v430_v18 = vld [vmem:[%s2921_s1 + $0x170] sm:$0xff]  ;;  %v431_v19 = vld [vmem:[%s2921_s1 + $0x178] sm:$0xff]  ;;  %s2620_s27 = scalar_lea.hbm %s2619_s22, 8  ;;  %p2625_p2 = scmp.lt.s32.totalorder %s2619_s22, %s4111_s5 }
  0x76   : > { %461 = vmatpush.msra.mxu0 %v432_v12  ;;  %502 = vmatpush.msra.mxu1 %v433_v13  ;;  %v424_v20 = vld [vmem:[%s2921_s1 + $0x140] sm:$0xff]  ;;  %v425_v21 = vld [vmem:[%s2921_s1 + $0x148] sm:$0xff]  ;;  %v426_v22 = vld [vmem:[%s2921_s1 + $0x150] sm:$0xff]  ;;  %p2621_p6 = scmp.ne.s32.totalorder %s2619_s22, %s2620_s27 }
  0x77   : > { %543 = vmatpush.msra.mxu2 %v434_v14  ;;  %584 = vmatpush.msra.mxu3 %v435_v15  ;;  %v427_v23 = vld [vmem:[%s2921_s1 + $0x158] sm:$0xff]  ;;  %v420_v24 = vld [vmem:[%s2921_s1 + $0x120] sm:$0xff]  ;;  %v421_v25 = vld [vmem:[%s2921_s1 + $0x128] sm:$0xff] }
  0x78   : > { %462 = vmatpush.msra.mxu0 %v428_v16  ;;  %503 = vmatpush.msra.mxu1 %v429_v17  ;;  %v422_v26 = vld [vmem:[%s2921_s1 + $0x130] sm:$0xff]  ;;  %v423_v27 = vld [vmem:[%s2921_s1 + $0x138] sm:$0xff]  ;;  %v416_v28 = vld [vmem:[%s2921_s1 + $0x100] sm:$0xff]  ;;  %p2622_p13 = pnand %p2621_p6, %p2795_p11 }
  0x79   : > { %544 = vmatpush.msra.mxu2 %v430_v18  ;;  %585 = vmatpush.msra.mxu3 %v431_v19  ;;  %v417_v29 = vld [vmem:[%s2921_s1 + $0x108] sm:$0xff]  ;;  %v418_v30 = vld [vmem:[%s2921_s1 + $0x110] sm:$0xff]  ;;  %v419_v31 = vld [vmem:[%s2921_s1 + $0x118] sm:$0xff] }
  0x7a   : > { %463 = vmatpush.msra.mxu0 %v424_v20  ;;  %504 = vmatpush.msra.mxu1 %v425_v21  ;;  %v412_v32 = vld [vmem:[%s2921_s1 + $0xe0] sm:$0xff]  ;;  %v413_v33 = vld [vmem:[%s2921_s1 + $0xe8] sm:$0xff]  ;;  %v414_v34 = vld [vmem:[%s2921_s1 + $0xf0] sm:$0xff]  ;;  %p2623_p1 = pneg %p2622_p13 }
  0x7b   : > { %545 = vmatpush.msra.mxu2 %v426_v22  ;;  %586 = vmatpush.msra.mxu3 %v427_v23  ;;  %v415_v35 = vld [vmem:[%s2921_s1 + $0xf8] sm:$0xff]  ;;  %v408_v36 = vld [vmem:[%s2921_s1 + $0xc0] sm:$0xff]  ;;  %v409_v37 = vld [vmem:[%s2921_s1 + $0xc8] sm:$0xff] }
  0x7c   : > { %464 = vmatpush.msra.mxu0 %v420_v24  ;;  %505 = vmatpush.msra.mxu1 %v421_v25  ;;  %v410_v38 = vld [vmem:[%s2921_s1 + $0xd0] sm:$0xff]  ;;  %v411_v39 = vld [vmem:[%s2921_s1 + $0xd8] sm:$0xff]  ;;  %v404_v40 = vld [vmem:[%s2921_s1 + $0xa0] sm:$0xff] }
  0x7d   : > { %546 = vmatpush.msra.mxu2 %v422_v26  ;;  %587 = vmatpush.msra.mxu3 %v423_v27  ;;  %v405_v41 = vld [vmem:[%s2921_s1 + $0xa8] sm:$0xff]  ;;  %v406_v42 = vld [vmem:[%s2921_s1 + $0xb0] sm:$0xff]  ;;  %v407_v43 = vld [vmem:[%s2921_s1 + $0xb8] sm:$0xff] }
  0x7e   : > { %465 = vmatpush.msra.mxu0 %v416_v28  ;;  %506 = vmatpush.msra.mxu1 %v417_v29  ;;  %v400_v44 = vld [vmem:[%s2921_s1 + $0x80] sm:$0xff]  ;;  %v401_v45 = vld [vmem:[%s2921_s1 + $0x88] sm:$0xff]  ;;  %v402_v46 = vld [vmem:[%s2921_s1 + $0x90] sm:$0xff] }
  0x7f   : > { %547 = vmatpush.msra.mxu2 %v418_v30  ;;  %588 = vmatpush.msra.mxu3 %v419_v31  ;;  %v403_v47 = vld [vmem:[%s2921_s1 + $0x98] sm:$0xff]  ;;  %v396_v48 = vld [vmem:[%s2921_s1 + $0x60] sm:$0xff]  ;;  %v397_v49 = vld [vmem:[%s2921_s1 + $0x68] sm:$0xff] }
  0x80   : > { %466 = vmatpush.msra.mxu0 %v412_v32  ;;  %507 = vmatpush.msra.mxu1 %v413_v33  ;;  %v398_v50 = vld [vmem:[%s2921_s1 + $0x70] sm:$0xff]  ;;  %v399_v51 = vld [vmem:[%s2921_s1 + $0x78] sm:$0xff]  ;;  %v392_v52 = vld [vmem:[%s2921_s1 + $0x40] sm:$0xff] }
  0x81   : > { %548 = vmatpush.msra.mxu2 %v414_v34  ;;  %589 = vmatpush.msra.mxu3 %v415_v35  ;;  %v393_v53 = vld [vmem:[%s2921_s1 + $0x48] sm:$0xff]  ;;  %v394_v54 = vld [vmem:[%s2921_s1 + $0x50] sm:$0xff]  ;;  %v395_v55 = vld [vmem:[%s2921_s1 + $0x58] sm:$0xff] }
  0x82   : > { %467 = vmatpush.msra.mxu0 %v408_v36  ;;  %508 = vmatpush.msra.mxu1 %v409_v37  ;;  %v388_v56 = vld [vmem:[%s2921_s1 + $0x20] sm:$0xff]  ;;  %v389_v57 = vld [vmem:[%s2921_s1 + $0x28] sm:$0xff]  ;;  %v390_v58 = vld [vmem:[%s2921_s1 + $0x30] sm:$0xff] }
  0x83   : > { %549 = vmatpush.msra.mxu2 %v410_v38  ;;  %590 = vmatpush.msra.mxu3 %v411_v39  ;;  %v391_v59 = vld [vmem:[%s2921_s1 + $0x38] sm:$0xff]  ;;  %v384_v60 = vld [vmem:[%s2921_s1] sm:$0xff]  ;;  %v385_v61 = vld [vmem:[%s2921_s1 + $0x8] sm:$0xff] }
  0x84   : > { %468 = vmatpush.msra.mxu0 %v404_v40  ;;  %509 = vmatpush.msra.mxu1 %v405_v41  ;;  %v386_v62 = vld [vmem:[%s2921_s1 + $0x10] sm:$0xff]  ;;  %v387_v63 = vld [vmem:[%s2921_s1 + $0x18] sm:$0xff]  ;;  %v376_v0 = vld [vmem:[%s2913_s16] sm:$0xff] }
  0x85   : > { %550 = vmatpush.msra.mxu2 %v406_v42  ;;  %591 = vmatpush.msra.mxu3 %v407_v43  ;;  %v3003_v1 = vld [vmem:[%s2928_s26 + $0x1e0] sm:$0xff]  ;;  %v3006_v2 = vld [vmem:[%s2928_s26 + $0x1e8] sm:$0xff]  ;;  %v3009_v3 = vld [vmem:[%s2928_s26 + $0x1f8] sm:$0xff] }
  0x86   : > { %469 = vmatpush.msra.mxu0 %v400_v44  ;;  %510 = vmatpush.msra.mxu1 %v401_v45  ;;  %v3012_v4 = vld [vmem:[%s2928_s26 + $0x1f0] sm:$0xff]  ;;  %v3015_v5 = vld [vmem:[%s2928_s26 + $0x1c0] sm:$0xff]  ;;  %v3018_v6 = vld [vmem:[%s2928_s26 + $0x1c8] sm:$0xff] }
  0x87   : > { %551 = vmatpush.msra.mxu2 %v402_v46  ;;  %592 = vmatpush.msra.mxu3 %v403_v47  ;;  %v3023_v7 = vld [vmem:[%s2928_s26 + $0x1d8] sm:$0xff]  ;;  %v3026_v8 = vld [vmem:[%s2928_s26 + $0x1d0] sm:$0xff]  ;;  %v3030_v9 = vld [vmem:[%s2928_s26 + $0x1a0] sm:$0xff] }
  0x88   : > { %470 = vmatpush.msra.mxu0 %v396_v48  ;;  %511 = vmatpush.msra.mxu1 %v397_v49  ;;  %v3033_v10 = vld [vmem:[%s2928_s26 + $0x1a8] sm:$0xff]  ;;  %v3039_v11 = vld [vmem:[%s2928_s26 + $0x1b8] sm:$0xff]  ;;  %v3042_v12 = vld [vmem:[%s2928_s26 + $0x1b0] sm:$0xff] }
  0x89   : > { %552 = vmatpush.msra.mxu2 %v398_v50  ;;  %593 = vmatpush.msra.mxu3 %v399_v51  ;;  %v377_v13 = vld [vmem:[%s2913_s16 + $0x8] sm:$0xff]  ;;  %v3050_v14 = vld [vmem:[%s2928_s26 + $0x180] sm:$0xff]  ;;  %v3058_v16 = vld [vmem:[%s2928_s26 + $0x198] sm:$0xff] }
  0x8a   : > { %471 = vmatpush.msra.mxu0 %v392_v52  ;;  %512 = vmatpush.msra.mxu1 %v393_v53  ;;  %v3053_v15 = vld [vmem:[%s2928_s26 + $0x188] sm:$0xff]  ;;  %v3061_v17 = vld [vmem:[%s2928_s26 + $0x190] sm:$0xff]  ;;  %v3064_v18 = vld [vmem:[%s2928_s26 + $0x160] sm:$0xff] }
  0x8b   : > { %553 = vmatpush.msra.mxu2 %v394_v54  ;;  %594 = vmatpush.msra.mxu3 %v395_v55  ;;  %v3067_v19 = vld [vmem:[%s2928_s26 + $0x168] sm:$0xff]  ;;  %v3072_v20 = vld [vmem:[%s2928_s26 + $0x178] sm:$0xff]  ;;  %v3075_v21 = vld [vmem:[%s2928_s26 + $0x170] sm:$0xff] }
  0x8c   : > { %472 = vmatpush.msra.mxu0 %v388_v56  ;;  %513 = vmatpush.msra.mxu1 %v389_v57  ;;  %v3079_v22 = vld [vmem:[%s2928_s26 + $0x140] sm:$0xff]  ;;  %v3082_v23 = vld [vmem:[%s2928_s26 + $0x148] sm:$0xff]  ;;  %v3088_v24 = vld [vmem:[%s2928_s26 + $0x158] sm:$0xff] }
  0x8d   : > { %554 = vmatpush.msra.mxu2 %v390_v58  ;;  %595 = vmatpush.msra.mxu3 %v391_v59  ;;  %v3091_v25 = vld [vmem:[%s2928_s26 + $0x150] sm:$0xff]  ;;  %v3099_v27 = vld [vmem:[%s2928_s26 + $0x120] sm:$0xff]  ;;  %v3102_v28 = vld [vmem:[%s2928_s26 + $0x128] sm:$0xff] }
  0x8e   : > { %473 = vmatpush.msra.mxu0 %v384_v60  ;;  %514 = vmatpush.msra.mxu1 %v385_v61  ;;  %v378_v26 = vld [vmem:[%s2913_s16 + $0x10] sm:$0xff]  ;;  %v3107_v29 = vld [vmem:[%s2928_s26 + $0x138] sm:$0xff]  ;;  %v3113_v31 = vld [vmem:[%s2928_s26 + $0x100] sm:$0xff] }
  0x8f   : > { %555 = vmatpush.msra.mxu2 %v386_v62  ;;  %596 = vmatpush.msra.mxu3 %v387_v63  ;;  %v3110_v30 = vld [vmem:[%s2928_s26 + $0x130] sm:$0xff]  ;;  %v3116_v32 = vld [vmem:[%s2928_s26 + $0x108] sm:$0xff]  ;;  %v3121_v33 = vld [vmem:[%s2928_s26 + $0x118] sm:$0xff] }
  0x90   : > { %474 = vmatmul.f32.vlgmr.msra.gmra.mxu0 %v376_v0  ;;  %515 = vmatmul.f32.vlgmr.msra.gmra.mxu1 %v376_v0  ;;  %v3124_v34 = vld [vmem:[%s2928_s26 + $0x110] sm:$0xff]  ;;  %v3128_v35 = vld [vmem:[%s2928_s26 + $0xe0] sm:$0xff]  ;;  %v3131_v36 = vld [vmem:[%s2928_s26 + $0xe8] sm:$0xff] }
  0x91   : > { %556 = vmatmul.f32.vlgmr.msra.gmra.mxu2 %v376_v0  ;;  %597 = vmatmul.f32.vlgmr.msra.gmra.mxu3 %v376_v0  ;;  %v3137_v37 = vld [vmem:[%s2928_s26 + $0xf8] sm:$0xff]  ;;  %v3140_v38 = vld [vmem:[%s2928_s26 + $0xf0] sm:$0xff]  ;;  %v3148_v40 = vld [vmem:[%s2928_s26 + $0xc0] sm:$0xff] }
  0x92   : > { %722 = vmatpush.msrb.mxu0 %v3003_v1  ;;  %742 = vmatpush.msrb.mxu1 %v3006_v2  ;;  %v379_v39 = vld [vmem:[%s2913_s16 + $0x18] sm:$0xff]  ;;  %v3151_v41 = vld [vmem:[%s2928_s26 + $0xc8] sm:$0xff]  ;;  %v3159_v43 = vld [vmem:[%s2928_s26 + $0xd0] sm:$0xff] }
  0x93   : > { %782 = vmatpush.msrb.mxu3 %v3009_v3  ;;  %762 = vmatpush.msrb.mxu2 %v3012_v4  ;;  %v3156_v42 = vld [vmem:[%s2928_s26 + $0xd8] sm:$0xff]  ;;  %v3162_v44 = vld [vmem:[%s2928_s26 + $0xa0] sm:$0xff]  ;;  %v3165_v45 = vld [vmem:[%s2928_s26 + $0xa8] sm:$0xff] }
  0x94   : > { %723 = vmatpush.msrb.mxu0 %v3015_v5  ;;  %743 = vmatpush.msrb.mxu1 %v3018_v6  ;;  %4218 = vst [vmem:[#allocation23_spill] sm:$0xff] %v3156_v42  ;;  %v3170_v46 = vld [vmem:[%s2928_s26 + $0xb8] sm:$0xff]  ;;  %v3173_v47 = vld [vmem:[%s2928_s26 + $0xb0] sm:$0xff]  ;;  %v3177_v48 = vld [vmem:[%s2928_s26 + $0x80] sm:$0xff] }
  0x95   : > { %783 = vmatpush.msrb.mxu3 %v3023_v7  ;;  %763 = vmatpush.msrb.mxu2 %v3026_v8  ;;  %4219 = vst [vmem:[#allocation24_spill] sm:$0xff] %v3162_v44  ;;  %v3180_v49 = vld [vmem:[%s2928_s26 + $0x88] sm:$0xff]  ;;  %v3186_v50 = vld [vmem:[%s2928_s26 + $0x98] sm:$0xff]  ;;  %v3189_v51 = vld [vmem:[%s2928_s26 + $0x90] sm:$0xff] }
  0x96   : > { %724 = vmatpush.msrb.mxu0 %v3030_v9  ;;  %744 = vmatpush.msrb.mxu1 %v3033_v10  ;;  %4220 = vst [vmem:[#allocation25_spill] sm:$0xff] %v3165_v45  ;;  %v380_v52 = vld [vmem:[%s2913_s16 + $0x20] sm:$0xff]  ;;  %v3200_v54 = vld [vmem:[%s2928_s26 + $0x68] sm:$0xff]  ;;  %v3205_v55 = vld [vmem:[%s2928_s26 + $0x78] sm:$0xff] }
  0x97   : > { %784 = vmatpush.msrb.mxu3 %v3039_v11  ;;  %764 = vmatpush.msrb.mxu2 %v3042_v12  ;;  %4221 = vst [vmem:[#allocation26_spill] sm:$0xff] %v3170_v46  ;;  %v3197_v53 = vld [vmem:[%s2928_s26 + $0x60] sm:$0xff]  ;;  %v3208_v56 = vld [vmem:[%s2928_s26 + $0x70] sm:$0xff]  ;;  %v3214_v58 = vld [vmem:[%s2928_s26 + $0x48] sm:$0xff] }
  0x98   : > { %477 = vmatmul.f32.gmra.mxu0 %v377_v13  ;;  %518 = vmatmul.f32.gmra.mxu1 %v377_v13  ;;  %4222 = vst [vmem:[#allocation27_spill] sm:$0xff] %v3173_v47  ;;  %v3211_v57 = vld [vmem:[%s2928_s26 + $0x40] sm:$0xff]  ;;  %v3219_v59 = vld [vmem:[%s2928_s26 + $0x58] sm:$0xff]  ;;  %v3222_v60 = vld [vmem:[%s2928_s26 + $0x50] sm:$0xff] }
  0x99   : > { %559 = vmatmul.f32.gmra.mxu2 %v377_v13  ;;  %600 = vmatmul.f32.gmra.mxu3 %v377_v13  ;;  %4223 = vst [vmem:[#allocation28_spill] sm:$0xff] %v3177_v48  ;;  %v3226_v61 = vld [vmem:[%s2928_s26 + $0x20] sm:$0xff]  ;;  %v3229_v62 = vld [vmem:[%s2928_s26 + $0x28] sm:$0xff]  ;;  %v3235_v63 = vld [vmem:[%s2928_s26 + $0x30] sm:$0xff] }
  0x9a   : > { %725 = vmatpush.msrb.mxu0 %v3050_v14  ;;  %745 = vmatpush.msrb.mxu1 %v3053_v15  ;;  %4224 = vst [vmem:[#allocation29_spill] sm:$0xff] %v3180_v49  ;;  %v3238_v0 = vld [vmem:[%s2928_s26 + $0x38] sm:$0xff]  ;;  %v381_v13 = vld [vmem:[%s2913_s16 + $0x28] sm:$0xff] }
  0x9b   : > { %785 = vmatpush.msrb.mxu3 %v3058_v16  ;;  %765 = vmatpush.msrb.mxu2 %v3061_v17  ;;  %4225 = vst [vmem:[#allocation30_spill] sm:$0xff] %v3186_v50 }
  0x9c   : > { %726 = vmatpush.msrb.mxu0 %v3064_v18  ;;  %746 = vmatpush.msrb.mxu1 %v3067_v19  ;;  %4226 = vst [vmem:[#allocation31_spill] sm:$0xff] %v3189_v51 }
  0x9d   : > { %786 = vmatpush.msrb.mxu3 %v3072_v20  ;;  %766 = vmatpush.msrb.mxu2 %v3075_v21  ;;  %4227 = vst [vmem:[#allocation32_spill] sm:$0xff] %v3197_v53 }
  0x9e   : > { %727 = vmatpush.msrb.mxu0 %v3079_v22  ;;  %747 = vmatpush.msrb.mxu1 %v3082_v23  ;;  %4228 = vst [vmem:[#allocation33_spill] sm:$0xff] %v3200_v54 }
  0x9f   : > { %787 = vmatpush.msrb.mxu3 %v3088_v24  ;;  %767 = vmatpush.msrb.mxu2 %v3091_v25  ;;  %4229 = vst [vmem:[#allocation34_spill] sm:$0xff] %v3205_v55 }
  0xa0   : > { %480 = vmatmul.f32.gmra.mxu0 %v378_v26  ;;  %521 = vmatmul.f32.gmra.mxu1 %v378_v26  ;;  %4230 = vst [vmem:[#allocation35_spill] sm:$0xff] %v3208_v56 }
  0xa1   : > { %562 = vmatmul.f32.gmra.mxu2 %v378_v26  ;;  %603 = vmatmul.f32.gmra.mxu3 %v378_v26  ;;  %4231 = vst [vmem:[#allocation36_spill] sm:$0xff] %v3211_v57  ;;  %v3246_v26 = vld [vmem:[%s2928_s26] sm:$0xff] }
  0xa2   : > { %728 = vmatpush.msrb.mxu0 %v3099_v27  ;;  %748 = vmatpush.msrb.mxu1 %v3102_v28  ;;  %4232 = vst [vmem:[#allocation37_spill] sm:$0xff] %v3214_v58 }
  0xa3   : > { %788 = vmatpush.msrb.mxu3 %v3107_v29  ;;  %768 = vmatpush.msrb.mxu2 %v3110_v30  ;;  %4233 = vst [vmem:[#allocation38_spill] sm:$0xff] %v3219_v59 }
  0xa4   : > { %729 = vmatpush.msrb.mxu0 %v3113_v31  ;;  %749 = vmatpush.msrb.mxu1 %v3116_v32  ;;  %4234 = vst [vmem:[#allocation39_spill] sm:$0xff] %v3222_v60 }
  0xa5   : > { %789 = vmatpush.msrb.mxu3 %v3121_v33  ;;  %769 = vmatpush.msrb.mxu2 %v3124_v34  ;;  %4235 = vst [vmem:[#allocation40_spill] sm:$0xff] %v3226_v61 }
  0xa6   : > { %730 = vmatpush.msrb.mxu0 %v3128_v35  ;;  %750 = vmatpush.msrb.mxu1 %v3131_v36  ;;  %4236 = vst [vmem:[#allocation41_spill] sm:$0xff] %v3229_v62 }
  0xa7   : > { %790 = vmatpush.msrb.mxu3 %v3137_v37  ;;  %770 = vmatpush.msrb.mxu2 %v3140_v38  ;;  %4237 = vst [vmem:[#allocation42_spill] sm:$0xff] %v3235_v63 }
  0xa8   : > { %483 = vmatmul.f32.gmra.mxu0 %v379_v39  ;;  %524 = vmatmul.f32.gmra.mxu1 %v379_v39  ;;  %4238 = vst [vmem:[#allocation43_spill] sm:$0xff] %v3238_v0 }
  0xa9   : > { %565 = vmatmul.f32.gmra.mxu2 %v379_v39  ;;  %606 = vmatmul.f32.gmra.mxu3 %v379_v39  ;;  %4239 = vst [vmem:[#allocation44_spill] sm:$0xff] %v3246_v26  ;;  %v3249_v39 = vld [vmem:[%s2928_s26 + $0x8] sm:$0xff] }
  0xaa   : > { %731 = vmatpush.msrb.mxu0 %v3148_v40  ;;  %751 = vmatpush.msrb.mxu1 %v3151_v41  ;;  %4240 = vst [vmem:[#allocation45_spill] sm:$0xff] %v3249_v39 }
  0xab   : > { %791 = vmatpush.msrb.mxu3 %v3156_v42  ;;  %771 = vmatpush.msrb.mxu2 %v3159_v43 }
  0xac   : > { %732 = vmatpush.msrb.mxu0 %v3162_v44  ;;  %752 = vmatpush.msrb.mxu1 %v3165_v45 }
  0xad   : > { %792 = vmatpush.msrb.mxu3 %v3170_v46  ;;  %772 = vmatpush.msrb.mxu2 %v3173_v47 }
  0xae   : > { %733 = vmatpush.msrb.mxu0 %v3177_v48  ;;  %753 = vmatpush.msrb.mxu1 %v3180_v49 }
  0xaf   : > { %793 = vmatpush.msrb.mxu3 %v3186_v50  ;;  %773 = vmatpush.msrb.mxu2 %v3189_v51 }
  0xb0   : > { %486 = vmatmul.f32.gmra.mxu0 %v380_v52  ;;  %527 = vmatmul.f32.gmra.mxu1 %v380_v52 }
  0xb1   : > { %568 = vmatmul.f32.gmra.mxu2 %v380_v52  ;;  %609 = vmatmul.f32.gmra.mxu3 %v380_v52  ;;  %v3254_v52 = vld [vmem:[%s2928_s26 + $0x10] sm:$0xff] }
  0xb2   : > { %734 = vmatpush.msrb.mxu0 %v3197_v53  ;;  %754 = vmatpush.msrb.mxu1 %v3200_v54  ;;  %4241 = vst [vmem:[#allocation46_spill] sm:$0xff] %v3254_v52 }
  0xb3   : > { %794 = vmatpush.msrb.mxu3 %v3205_v55  ;;  %774 = vmatpush.msrb.mxu2 %v3208_v56 }
  0xb4   : > { %735 = vmatpush.msrb.mxu0 %v3211_v57  ;;  %755 = vmatpush.msrb.mxu1 %v3214_v58 }
  0xb5   : > { %795 = vmatpush.msrb.mxu3 %v3219_v59  ;;  %775 = vmatpush.msrb.mxu2 %v3222_v60  ;;  %v3257_v59 = vld [vmem:[%s2928_s26 + $0x18] sm:$0xff] }
  0xb6   : > { %736 = vmatpush.msrb.mxu0 %v3226_v61  ;;  %756 = vmatpush.msrb.mxu1 %v3229_v62  ;;  %4242 = vst [vmem:[#allocation47_spill] sm:$0xff] %v3257_v59 }
  0xb7   : > { %776 = vmatpush.msrb.mxu2 %v3235_v63  ;;  %796 = vmatpush.msrb.mxu3 %v3238_v0  ;;  %v382_v0 = vld [vmem:[%s2913_s16 + $0x30] sm:$0xff] }
  0xb8   : > { %489 = vmatmul.f32.gmra.mxu0 %v381_v13  ;;  %530 = vmatmul.f32.gmra.mxu1 %v381_v13 }
  0xb9   : > { %571 = vmatmul.f32.gmra.mxu2 %v381_v13  ;;  %612 = vmatmul.f32.gmra.mxu3 %v381_v13  ;;  %v383_v13 = vld [vmem:[%s2913_s16 + $0x38] sm:$0xff] }
  0xba   : > { %737 = vmatpush.msrb.mxu0 %v3246_v26  ;;  %757 = vmatpush.msrb.mxu1 %v3249_v39 }
  0xbb   : > { %777 = vmatpush.msrb.mxu2 %v3254_v52  ;;  %797 = vmatpush.msrb.mxu3 %v3257_v59 }
  0xbc   : > { %875 = vmatpush.msra.mxu0 %v3003_v1  ;;  %895 = vmatpush.msra.mxu1 %v3006_v2 }
  0xbd   : > { %915 = vmatpush.msra.mxu2 %v3012_v4  ;;  %935 = vmatpush.msra.mxu3 %v3009_v3 }
  0xbe   : > { %876 = vmatpush.msra.mxu0 %v3015_v5  ;;  %896 = vmatpush.msra.mxu1 %v3018_v6 }
  0xbf   : > { %916 = vmatpush.msra.mxu2 %v3026_v8  ;;  %936 = vmatpush.msra.mxu3 %v3023_v7 }
  0xc0   : > { %492 = vmatmul.f32.gmra.mxu0 %v382_v0  ;;  %533 = vmatmul.f32.gmra.mxu1 %v382_v0 }
  0xc1   : > { %574 = vmatmul.f32.gmra.mxu2 %v382_v0  ;;  %615 = vmatmul.f32.gmra.mxu3 %v382_v0  ;;  %v2716_v0 = vmov 0.0  }
  0xc2   : > { %877 = vmatpush.msra.mxu0 %v3030_v9  ;;  %897 = vmatpush.msra.mxu1 %v3033_v10 }
  0xc3   : > { %917 = vmatpush.msra.mxu2 %v3042_v12  ;;  %937 = vmatpush.msra.mxu3 %v3039_v11 }
  0xc4   : > { %878 = vmatpush.msra.mxu0 %v3050_v14  ;;  %898 = vmatpush.msra.mxu1 %v3053_v15 }
  0xc5   : > { %918 = vmatpush.msra.mxu2 %v3061_v17  ;;  %938 = vmatpush.msra.mxu3 %v3058_v16 }
  0xc6   : > { %879 = vmatpush.msra.mxu0 %v3064_v18  ;;  %899 = vmatpush.msra.mxu1 %v3067_v19 }
  0xc7   : > { %919 = vmatpush.msra.mxu2 %v3075_v21  ;;  %939 = vmatpush.msra.mxu3 %v3072_v20 }
  0xc8   : > { %495 = vmatmul.f32.gmra.mxu0 %v383_v13  ;;  %536 = vmatmul.f32.gmra.mxu1 %v383_v13 }
  0xc9   : > { %577 = vmatmul.f32.gmra.mxu2 %v383_v13  ;;  %618 = vmatmul.f32.gmra.mxu3 %v383_v13  ;;  %v4243_v13 = vld [vmem:[#allocation38_spill] sm:$0xff] }
  0xca   : > { %880 = vmatpush.msra.mxu0 %v3079_v22  ;;  %900 = vmatpush.msra.mxu1 %v3082_v23 }
  0xcb   : > { %920 = vmatpush.msra.mxu2 %v3091_v25  ;;  %940 = vmatpush.msra.mxu3 %v3088_v24 }
  0xcc   : > { %881 = vmatpush.msra.mxu0 %v3099_v27  ;;  %901 = vmatpush.msra.mxu1 %v3102_v28 }
  0xcd   : > { %921 = vmatpush.msra.mxu2 %v3110_v30  ;;  %941 = vmatpush.msra.mxu3 %v3107_v29 }
  0xce   : > { %882 = vmatpush.msra.mxu0 %v3113_v31  ;;  %902 = vmatpush.msra.mxu1 %v3116_v32 }
  0xcf   : > { %922 = vmatpush.msra.mxu2 %v3124_v34  ;;  %942 = vmatpush.msra.mxu3 %v3121_v33 }
  0xd0   : > { %738 = vmatmul.f32.vlgmr.msrb.gmra.mxu0 %v2716_v0  ;;  %758 = vmatmul.f32.vlgmr.msrb.gmra.mxu1 %v2716_v0 }
  0xd1   : > { %778 = vmatmul.f32.vlgmr.msrb.gmra.mxu2 %v2716_v0  ;;  %798 = vmatmul.f32.vlgmr.msrb.gmra.mxu3 %v2716_v0  ;;  %v4244_v0 = vld [vmem:[#allocation43_spill] sm:$0xff] }
  0xd2   : > { %883 = vmatpush.msra.mxu0 %v3128_v35  ;;  %903 = vmatpush.msra.mxu1 %v3131_v36 }
  0xd3   : > { %923 = vmatpush.msra.mxu2 %v3140_v38  ;;  %943 = vmatpush.msra.mxu3 %v3137_v37 }
  0xd4   : > { %884 = vmatpush.msra.mxu0 %v3148_v40  ;;  %904 = vmatpush.msra.mxu1 %v3151_v41 }
  0xd5   : > { %924 = vmatpush.msra.mxu2 %v3159_v43  ;;  %944 = vmatpush.msra.mxu3 %v3156_v42 }
  0xd6   : > { %885 = vmatpush.msra.mxu0 %v3162_v44  ;;  %905 = vmatpush.msra.mxu1 %v3165_v45 }
  0xd7   : > { %925 = vmatpush.msra.mxu2 %v3173_v47  ;;  %945 = vmatpush.msra.mxu3 %v3170_v46 }
  0xd8   : > { %886 = vmatpush.msra.mxu0 %v3177_v48  ;;  %906 = vmatpush.msra.mxu1 %v3180_v49 }
  0xd9   : > { %926 = vmatpush.msra.mxu2 %v3189_v51  ;;  %946 = vmatpush.msra.mxu3 %v3186_v50 }
  0xda   : > { %887 = vmatpush.msra.mxu0 %v3197_v53  ;;  %907 = vmatpush.msra.mxu1 %v3200_v54 }
  0xdb   : > { %927 = vmatpush.msra.mxu2 %v3208_v56  ;;  %947 = vmatpush.msra.mxu3 %v3205_v55 }
  0xdc   : > { %888 = vmatpush.msra.mxu0 %v3211_v57  ;;  %908 = vmatpush.msra.mxu1 %v3214_v58 }
  0xdd   : > { %928 = vmatpush.msra.mxu2 %v3222_v60  ;;  %948 = vmatpush.msra.mxu3 %v4243_v13 }
  0xde   : > { %889 = vmatpush.msra.mxu0 %v3226_v61  ;;  %909 = vmatpush.msra.mxu1 %v3229_v62 }
  0xdf   : > { %929 = vmatpush.msra.mxu2 %v3235_v63  ;;  %949 = vmatpush.msra.mxu3 %v4244_v0 }
  0xe0   : > { %890 = vmatpush.msra.mxu0 %v3246_v26  ;;  %910 = vmatpush.msra.mxu1 %v3249_v39 }
  0xe1   : > { %930 = vmatpush.msra.mxu2 %v3254_v52  ;;  %950 = vmatpush.msra.mxu3 %v3257_v59 }
  0xe2   : > { %1029 = vmatpush.msrb.mxu0 %v3003_v1  ;;  %1049 = vmatpush.msrb.mxu1 %v3006_v2 }
  0xe3   : > { %1069 = vmatpush.msrb.mxu2 %v3012_v4  ;;  %1089 = vmatpush.msrb.mxu3 %v3009_v3 }
  0xe4   : > { %1030 = vmatpush.msrb.mxu0 %v3015_v5  ;;  %1050 = vmatpush.msrb.mxu1 %v3018_v6 }
  0xe5   : > { %1070 = vmatpush.msrb.mxu2 %v3026_v8  ;;  %1090 = vmatpush.msrb.mxu3 %v3023_v7 }
  0xe6   : > { %1031 = vmatpush.msrb.mxu0 %v3030_v9  ;;  %1051 = vmatpush.msrb.mxu1 %v3033_v10 }
  0xe7   : > { %1071 = vmatpush.msrb.mxu2 %v3042_v12  ;;  %1091 = vmatpush.msrb.mxu3 %v3039_v11 }
  0xe8   : > { %1032 = vmatpush.msrb.mxu0 %v3050_v14  ;;  %1052 = vmatpush.msrb.mxu1 %v3053_v15 }
  0xe9   : > { %1072 = vmatpush.msrb.mxu2 %v3061_v17  ;;  %1092 = vmatpush.msrb.mxu3 %v3058_v16 }
  0xea   : > { %1033 = vmatpush.msrb.mxu0 %v3064_v18  ;;  %1053 = vmatpush.msrb.mxu1 %v3067_v19 }
  0xeb   : > { %1073 = vmatpush.msrb.mxu2 %v3075_v21  ;;  %1093 = vmatpush.msrb.mxu3 %v3072_v20 }
  0xec   : > { %1034 = vmatpush.msrb.mxu0 %v3079_v22  ;;  %1054 = vmatpush.msrb.mxu1 %v3082_v23 }
  0xed   : > { %1074 = vmatpush.msrb.mxu2 %v3091_v25  ;;  %1094 = vmatpush.msrb.mxu3 %v3088_v24 }
  0xee   : > { %1035 = vmatpush.msrb.mxu0 %v3099_v27  ;;  %1055 = vmatpush.msrb.mxu1 %v3102_v28 }
  0xef   : > { %1075 = vmatpush.msrb.mxu2 %v3110_v30  ;;  %1095 = vmatpush.msrb.mxu3 %v3107_v29 }
  0xf0   : > { %1036 = vmatpush.msrb.mxu0 %v3113_v31  ;;  %1056 = vmatpush.msrb.mxu1 %v3116_v32 }
  0xf1   : > { %1076 = vmatpush.msrb.mxu2 %v3124_v34  ;;  %1096 = vmatpush.msrb.mxu3 %v3121_v33 }
  0xf2   : > { %1037 = vmatpush.msrb.mxu0 %v3128_v35  ;;  %1057 = vmatpush.msrb.mxu1 %v3131_v36 }
  0xf3   : > { %1077 = vmatpush.msrb.mxu2 %v3140_v38  ;;  %1097 = vmatpush.msrb.mxu3 %v3137_v37 }
  0xf4   : > { %1038 = vmatpush.msrb.mxu0 %v3148_v40  ;;  %1058 = vmatpush.msrb.mxu1 %v3151_v41 }
  0xf5   : > { %1078 = vmatpush.msrb.mxu2 %v3159_v43  ;;  %1098 = vmatpush.msrb.mxu3 %v3156_v42 }
  0xf6   : > { %1039 = vmatpush.msrb.mxu0 %v3162_v44  ;;  %1059 = vmatpush.msrb.mxu1 %v3165_v45 }
  0xf7   : > { %1079 = vmatpush.msrb.mxu2 %v3173_v47  ;;  %1099 = vmatpush.msrb.mxu3 %v3170_v46 }
  0xf8   : > { %1040 = vmatpush.msrb.mxu0 %v3177_v48  ;;  %1060 = vmatpush.msrb.mxu1 %v3180_v49 }
  0xf9   : > { %1080 = vmatpush.msrb.mxu2 %v3189_v51  ;;  %1100 = vmatpush.msrb.mxu3 %v3186_v50 }
  0xfa   : > { %1041 = vmatpush.msrb.mxu0 %v3197_v53  ;;  %1061 = vmatpush.msrb.mxu1 %v3200_v54 }
  0xfb   : > { %1081 = vmatpush.msrb.mxu2 %v3208_v56  ;;  %1101 = vmatpush.msrb.mxu3 %v3205_v55 }
  0xfc   : > { %1042 = vmatpush.msrb.mxu0 %v3211_v57  ;;  %1062 = vmatpush.msrb.mxu1 %v3214_v58  ;;  %v448_v57 = vld [vmem:[%s2931_s20] sm:$0xf] }
  0xfd   : > { %1082 = vmatpush.msrb.mxu2 %v3222_v60  ;;  %1102 = vmatpush.msrb.mxu3 %v4243_v13  ;;  %v450_v13 = vperm.slane %v448_v57, 0  ;;  %v451_v55 = vperm.slane %v448_v57, 1 }
  0xfe   : > { %1043 = vmatpush.msrb.mxu0 %v3226_v61  ;;  %1063 = vmatpush.msrb.mxu1 %v3229_v62 }
  0xff   : > { %1083 = vmatpush.msrb.mxu2 %v3235_v63  ;;  %1103 = vmatpush.msrb.mxu3 %v4244_v0 }
 0x100   : > { %1044 = vmatpush.msrb.mxu0 %v3246_v26  ;;  %1064 = vmatpush.msrb.mxu1 %v3249_v39  ;;  %v3402_v39 = vperm.slane %v448_v57, 2 }
 0x101   : > { %1084 = vmatpush.msrb.mxu2 %v3254_v52  ;;  %1104 = vmatpush.msrb.mxu3 %v3257_v59  ;;  %v453_v52 = vperm.slane %v448_v57, 3 }
 0x10d   : > { %v475_v58 = vpop.f32.mrf.mxu0  ;;  %v516_v60 = vpop.f32.mrf.mxu1 }
 0x114   : > { %v3394_v61 = vpop.f32.mrf.mxu2  ;;  %v3396_v62 = vpop.f32.mrf.mxu3 }
 0x115   : > { %v478_v63 = vpop.f32.mrf.mxu0  ;;  %v519_v56 = vpop.f32.mrf.mxu1 }
 0x116   : > { %v3398_v0 = vadd.f32 %v478_v63, %v450_v13  ;;  %v3400_v26 = vadd.f32 %v519_v56, %v451_v55 }
 0x118   : > { %4245 = vst [vmem:[#allocation48_spill] sm:$0xff] %v3398_v0 }
 0x119   : > { %4246 = vst [vmem:[#allocation49_spill] sm:$0xff] %v3400_v26 }
 0x11c   : > { %v560_v54 = vpop.f32.mrf.mxu2  ;;  %v601_v59 = vpop.f32.mrf.mxu3 }
 0x11d   : > { %v3405_v53 = vadd.f32 %v560_v54, %v3402_v39  ;;  %v3407_v50 = vadd.f32 %v601_v59, %v453_v52  ;;  %v481_v51 = vpop.f32.mrf.mxu0  ;;  %v522_v49 = vpop.f32.mrf.mxu1 }
 0x11e   : > { %v3409_v48 = vadd.f32 %v481_v51, %v450_v13  ;;  %v3411_v46 = vadd.f32 %v522_v49, %v451_v55 }
 0x11f   : > { %4247 = vst [vmem:[#allocation50_spill] sm:$0xff] %v3405_v53 }
 0x120   : > { %4248 = vst [vmem:[#allocation51_spill] sm:$0xff] %v3407_v50 }
 0x121   : > { %4249 = vst [vmem:[#allocation52_spill] sm:$0xff] %v3409_v48 }
 0x122   : > { %4250 = vst [vmem:[#allocation53_spill] sm:$0xff] %v3411_v46 }
 0x124   : > { %v563_v63 = vpop.f32.mrf.mxu2  ;;  %v604_v0 = vpop.f32.mrf.mxu3 }
 0x125   : > { %v3414_v56 = vadd.f32 %v563_v63, %v3402_v39  ;;  %v3416_v26 = vadd.f32 %v604_v0, %v453_v52  ;;  %v484_v57 = vpop.f32.mrf.mxu0  ;;  %v525_v47 = vpop.f32.mrf.mxu1 }
 0x126   : > { %v3418_v45 = vadd.f32 %v484_v57, %v450_v13  ;;  %v3420_v54 = vadd.f32 %v525_v47, %v451_v55 }
 0x127   : > { %4251 = vst [vmem:[#allocation54_spill] sm:$0xff] %v3414_v56 }
 0x128   : > { %4252 = vst [vmem:[#allocation55_spill] sm:$0xff] %v3416_v26 }
 0x129   : > { %4253 = vst [vmem:[#allocation56_spill] sm:$0xff] %v3418_v45 }
 0x12a   : > { %4254 = vst [vmem:[#allocation57_spill] sm:$0xff] %v3420_v54 }
 0x12c   : > { %v566_v59 = vpop.f32.mrf.mxu2  ;;  %v607_v53 = vpop.f32.mrf.mxu3 }
 0x12d   : > { %v3423_v51 = vadd.f32 %v566_v59, %v3402_v39  ;;  %v3425_v49 = vadd.f32 %v607_v53, %v453_v52  ;;  %v487_v46 = vpop.f32.mrf.mxu0  ;;  %v528_v48 = vpop.f32.mrf.mxu1 }
 0x12e   : > { %v3427_v50 = vadd.f32 %v487_v46, %v450_v13  ;;  %v3429_v63 = vadd.f32 %v528_v48, %v451_v55 }
 0x12f   : > { %4255 = vst [vmem:[#allocation58_spill] sm:$0xff] %v3423_v51 }
 0x130   : > { %4256 = vst [vmem:[#allocation59_spill] sm:$0xff] %v3425_v49 }
 0x131   : > { %4257 = vst [vmem:[#allocation60_spill] sm:$0xff] %v3427_v50 }
 0x132   : > { %4258 = vst [vmem:[#allocation61_spill] sm:$0xff] %v3429_v63 }
 0x134   : > { %v569_v0 = vpop.f32.mrf.mxu2  ;;  %v610_v56 = vpop.f32.mrf.mxu3 }
 0x135   : > { %v3432_v57 = vadd.f32 %v569_v0, %v3402_v39  ;;  %v3434_v47 = vadd.f32 %v610_v56, %v453_v52  ;;  %v490_v54 = vpop.f32.mrf.mxu0  ;;  %v531_v45 = vpop.f32.mrf.mxu1 }
 0x136   : > { %v3436_v26 = vadd.f32 %v490_v54, %v450_v13  ;;  %v3438_v59 = vadd.f32 %v531_v45, %v451_v55 }
 0x137   : > { %4259 = vst [vmem:[#allocation62_spill] sm:$0xff] %v3432_v57 }
 0x138   : > { %4260 = vst [vmem:[#allocation63_spill] sm:$0xff] %v3434_v47 }
 0x139   : > { %4261 = vst [vmem:[#allocation64_spill] sm:$0xff] %v3436_v26 }
 0x13a   : > { %4262 = vst [vmem:[#allocation65_spill] sm:$0xff] %v3438_v59 }
 0x13c   : > { %v572_v53 = vpop.f32.mrf.mxu2  ;;  %v613_v51 = vpop.f32.mrf.mxu3 }
 0x13d   : > { %v3441_v46 = vadd.f32 %v572_v53, %v3402_v39  ;;  %v3443_v48 = vadd.f32 %v613_v51, %v453_v52  ;;  %v493_v63 = vpop.f32.mrf.mxu0  ;;  %v534_v50 = vpop.f32.mrf.mxu1  ;;  %v476_v51 = vadd.f32 %v475_v58, %v450_v13 }
 0x13e   : > { %v3445_v49 = vadd.f32 %v493_v63, %v450_v13  ;;  %v3447_v0 = vadd.f32 %v534_v50, %v451_v55 }
 0x13f   : > { %4263 = vst [vmem:[#allocation66_spill] sm:$0xff] %v3441_v46  ;;  %v517_v46 = vadd.f32 %v516_v60, %v451_v55 }
 0x140   : > { %4264 = vst [vmem:[#allocation67_spill] sm:$0xff] %v3443_v48 }
 0x141   : > { %4265 = vst [vmem:[#allocation68_spill] sm:$0xff] %v3445_v49 }
 0x142   : > { %4266 = vst [vmem:[#allocation69_spill] sm:$0xff] %v3447_v0 }
 0x144   : > { %v575_v56 = vpop.f32.mrf.mxu2  ;;  %v616_v57 = vpop.f32.mrf.mxu3 }
 0x145   : > { %v3450_v54 = vadd.f32 %v575_v56, %v3402_v39  ;;  %v3452_v45 = vadd.f32 %v616_v57, %v453_v52  ;;  %v496_v59 = vpop.f32.mrf.mxu0  ;;  %v537_v26 = vpop.f32.mrf.mxu1 }
 0x146   : > { %v3454_v47 = vadd.f32 %v496_v59, %v450_v13  ;;  %v3456_v53 = vadd.f32 %v537_v26, %v451_v55  ;;  %v599_v59 = vadd.f32 %v3396_v62, %v453_v52 }
 0x147   : > { %4267 = vst [vmem:[#allocation70_spill] sm:$0xff] %v3450_v54 }
 0x148   : > { %4268 = vst [vmem:[#allocation71_spill] sm:$0xff] %v3452_v45 }
 0x149   : > { %4269 = vst [vmem:[#allocation72_spill] sm:$0xff] %v3454_v47 }
 0x14a   : > { %4270 = vst [vmem:[#allocation73_spill] sm:$0xff] %v3456_v53 }
 0x14c   : > { %v578_v48 = vpop.f32.mrf.mxu2  ;;  %v619_v63 = vpop.f32.mrf.mxu3 }
 0x14d   : > { %v3459_v50 = vadd.f32 %v578_v48, %v3402_v39  ;;  %v3461_v0 = vadd.f32 %v619_v63, %v453_v52  ;;  %v739_v49 = vpop.f32.mrf.mxu0  ;;  %v759_v56 = vpop.f32.mrf.mxu1 }
 0x14e   : > { %v802_v54 = vadd.f32 %v739_v49, %v476_v51  ;;  %v803_v57 = vadd.f32 %v759_v56, %v517_v46  ;;  %v558_v49 = vadd.f32 %v3394_v61, %v3402_v39 }
 0x14f   : > { %4271 = vst [vmem:[#allocation74_spill] sm:$0xff] %v3459_v50 }
 0x150   : > { %4272 = vst [vmem:[#allocation75_spill] sm:$0xff] %v3461_v0  ;;  %v2177_v45 = vmul.f32 -1.442695, %v802_v54  ;;  %v2178_v44 = vmul.f32 -1.442695, %v803_v57 }
 0x152   : > { %2292 = vpow2.f32 %v2177_v45 }
 0x153   : > { %2294 = vpow2.f32 %v2178_v44 }
 0x154   : > { %v799_v26 = vpop.f32.mrf.mxu3  ;;  %v779_v63 = vpop.f32.mrf.mxu2 }
 0x155   : > { %v805_v58 = vadd.f32 %v799_v26, %v599_v59  ;;  %v804_v45 = vadd.f32 %v779_v63, %v558_v49 }
 0x157   : > { %v2179_v55 = vmul.f32 -1.442695, %v805_v58 }
 0x158   : > { %v2293_v60 = vpop.eup %2292 }
 0x159   : > { %v2295_v13 = vpop.eup %2294  ;;  %v809_v53 = vadd.f32 1.0, %v2293_v60  ;;  %2296 = vpow2.f32 %v2179_v55 }
 0x15a   : > { %v828_v48 = vadd.f32 1.0, %v2295_v13 }
 0x15b   : > { %2298 = vrcp.f32 %v809_v53  ;;  %v821_v57 = vand.u32 2147483648, %v809_v53  ;;  %v819_v58 = vand.u32 2147483647, %v809_v53  ;;  %vm815_vm2 = vweird.f32 %v809_v53 }
 0x15c   : > { %2300 = vrcp.f32 %v828_v48  ;;  %v840_v59 = vand.u32 2147483648, %v828_v48  ;;  %v838_v60 = vand.u32 2147483647, %v828_v48  ;;  %vm834_vm3 = vweird.f32 %v828_v48 }
 0x15d   : > { %v822_v39 = vor.u32 1.1754944e-38, %v821_v57  ;;  %vm820_vm5 = vcmp.eq.f32.partialorder %v819_v58, 8.507059e+37 }
 0x15e   : > { %v841_v49 = vor.u32 1.1754944e-38, %v840_v59  ;;  %vm839_vm7 = vcmp.eq.f32.partialorder %v838_v60, 8.507059e+37 }
 0x15f   : > { %v2297_v50 = vpop.eup %2296 }
 0x160   : > { %v848_v46 = vadd.f32 1.0, %v2297_v50 }
 0x161   : > { %v2299_v54 = vpop.eup %2298 }
 0x162   : > { %v2301_v62 = vpop.eup %2300  ;;  %v811_v44 = vmul.f32 %v2299_v54, %v809_v53  ;;  %2302 = vrcp.f32 %v848_v46  ;;  %vm816_vm0 = vweird.f32 %v2299_v54  ;;  %v860_v57 = vand.u32 2147483648, %v848_v46 }
 0x163   : > { %v830_v52 = vmul.f32 %v2301_v62, %v828_v48  ;;  %2304 = vtanh.f32 %v804_v45  ;;  %vm835_vm1 = vweird.f32 %v2301_v62  ;;  %vm817_vm4 = vmor %vm815_vm2, %vm816_vm0  ;;  %vm854_vm9 = vweird.f32 %v848_v46 }
 0x164   : > { %v812_v51 = vsub.f32 1.0, %v811_v44  ;;  %vm836_vm6 = vmor %vm834_vm3, %vm835_vm1  ;;  %v861_v58 = vor.u32 1.1754944e-38, %v860_v57 }
 0x165   : > { %v831_v56 = vsub.f32 1.0, %v830_v52 }
 0x166   : > { %v813_v26 = vmul.f32 %v2299_v54, %v812_v51 }
 0x167   : > { %v832_v55 = vmul.f32 %v2301_v62, %v831_v56 }
 0x168   : > { %v2303_v13 = vpop.eup %2302  ;;  %v814_v61 = vadd.f32 %v2299_v54, %v813_v26 }
 0x169   : > { %v833_v50 = vadd.f32 %v2301_v62, %v832_v55  ;;  %v850_v63 = vmul.f32 %v2303_v13, %v848_v46  ;;  %v2305_v45 = vpop.eup %2304  ;;  %vm855_vm8 = vweird.f32 %v2303_v13 }
 0x16a   : > { %v818_v44 = vsel %vm817_vm4, %v2299_v54, %v814_v61  ;;  %v858_v54 = vand.u32 2147483647, %v848_v46  ;;  %vm856_vm10 = vmor %vm854_vm9, %vm855_vm8 }
 0x16b   : > { %v823_v52 = vsel %vm820_vm5, %v822_v39, %v818_v44  ;;  %v837_v51 = vsel %vm836_vm6, %v2301_v62, %v833_v50  ;;  %v851_v0 = vsub.f32 1.0, %v850_v63  ;;  %v4301_v39 = vld [vmem:[#allocation50_spill] sm:$0xff] }
 0x16c   : > { %v842_v56 = vsel %vm839_vm7, %v841_v49, %v837_v51  ;;  %v865_v47 = vmul.f32 %v2305_v45, %v823_v52  ;;  %vm859_vm11 = vcmp.eq.f32.partialorder %v858_v54, 8.507059e+37 }
 0x16d   : > { %v864_v42 = vmul.f32 0.0, %v842_v56  ;;  %v852_v26 = vmul.f32 %v2303_v13, %v851_v0 }
 0x16f   : > { %v3466_v53 = vadd.f32 %v865_v47, %v864_v42  ;;  %v853_v48 = vadd.f32 %v2303_v13, %v852_v26 }
 0x171   : > { %2306 = vtanh.f32 %v3466_v53  ;;  %v857_v59 = vsel %vm856_vm10, %v2303_v13, %v853_v48 }
 0x172   : > { %v862_v55 = vsel %vm859_vm11, %v861_v58, %v857_v59 }
 0x177   : > { %v2307_v62 = vpop.eup %2306 }
 0x178   : > { %v868_v60 = vmul.f32 %v2307_v62, %v862_v55 }
 0x17a   : > { %869 = vst [vmem:[%s3471_s28] sm:$0xff] %v868_v60  ;;  %891 = vmatmul.f32.vlgmr.msra.gmra.mxu0 %v868_v60  ;;  %911 = vmatmul.f32.vlgmr.msra.gmra.mxu1 %v868_v60 }
 0x17b   : > { %931 = vmatmul.f32.vlgmr.msra.gmra.mxu2 %v868_v60  ;;  %951 = vmatmul.f32.vlgmr.msra.gmra.mxu3 %v868_v60 }
 0x17c   : > { %1183 = vmatpush.msra.mxu0 %v3003_v1  ;;  %1203 = vmatpush.msra.mxu1 %v3006_v2  ;;  %v4273_v1 = vld [vmem:[#allocation23_spill] sm:$0xff]  ;;  %v4274_v2 = vld [vmem:[#allocation24_spill] sm:$0xff] }
 0x17d   : > { %1223 = vmatpush.msra.mxu2 %v3012_v4  ;;  %1243 = vmatpush.msra.mxu3 %v3009_v3  ;;  %v4275_v3 = vld [vmem:[#allocation25_spill] sm:$0xff]  ;;  %v4276_v4 = vld [vmem:[#allocation27_spill] sm:$0xff] }
 0x17e   : > { %1184 = vmatpush.msra.mxu0 %v3015_v5  ;;  %1204 = vmatpush.msra.mxu1 %v3018_v6  ;;  %v4277_v5 = vld [vmem:[#allocation26_spill] sm:$0xff]  ;;  %v4278_v6 = vld [vmem:[#allocation28_spill] sm:$0xff] }
 0x17f   : > { %1224 = vmatpush.msra.mxu2 %v3026_v8  ;;  %1244 = vmatpush.msra.mxu3 %v3023_v7  ;;  %v4279_v7 = vld [vmem:[#allocation29_spill] sm:$0xff]  ;;  %v4280_v8 = vld [vmem:[#allocation31_spill] sm:$0xff] }
 0x180   : > { %1185 = vmatpush.msra.mxu0 %v3030_v9  ;;  %1205 = vmatpush.msra.mxu1 %v3033_v10  ;;  %v4281_v9 = vld [vmem:[#allocation30_spill] sm:$0xff]  ;;  %v4282_v10 = vld [vmem:[#allocation32_spill] sm:$0xff] }
 0x181   : > { %1225 = vmatpush.msra.mxu2 %v3042_v12  ;;  %1245 = vmatpush.msra.mxu3 %v3039_v11  ;;  %v4283_v11 = vld [vmem:[#allocation33_spill] sm:$0xff]  ;;  %v4284_v12 = vld [vmem:[#allocation35_spill] sm:$0xff] }
 0x182   : > { %1186 = vmatpush.msra.mxu0 %v3050_v14  ;;  %1206 = vmatpush.msra.mxu1 %v3053_v15  ;;  %v4285_v14 = vld [vmem:[#allocation34_spill] sm:$0xff]  ;;  %v4286_v15 = vld [vmem:[#allocation36_spill] sm:$0xff] }
 0x183   : > { %1226 = vmatpush.msra.mxu2 %v3061_v17  ;;  %1246 = vmatpush.msra.mxu3 %v3058_v16  ;;  %v4287_v16 = vld [vmem:[#allocation37_spill] sm:$0xff]  ;;  %v4288_v17 = vld [vmem:[#allocation39_spill] sm:$0xff] }
 0x184   : > { %1187 = vmatpush.msra.mxu0 %v3064_v18  ;;  %1207 = vmatpush.msra.mxu1 %v3067_v19  ;;  %v4289_v18 = vld [vmem:[#allocation38_spill] sm:$0xff]  ;;  %v4290_v19 = vld [vmem:[#allocation40_spill] sm:$0xff] }
 0x185   : > { %1227 = vmatpush.msra.mxu2 %v3075_v21  ;;  %1247 = vmatpush.msra.mxu3 %v3072_v20  ;;  %v4291_v20 = vld [vmem:[#allocation41_spill] sm:$0xff]  ;;  %v4292_v21 = vld [vmem:[#allocation42_spill] sm:$0xff] }
 0x186   : > { %1188 = vmatpush.msra.mxu0 %v3079_v22  ;;  %1208 = vmatpush.msra.mxu1 %v3082_v23  ;;  %v4293_v22 = vld [vmem:[#allocation43_spill] sm:$0xff]  ;;  %v4294_v23 = vld [vmem:[#allocation44_spill] sm:$0xff] }
 0x187   : > { %1228 = vmatpush.msra.mxu2 %v3091_v25  ;;  %1248 = vmatpush.msra.mxu3 %v3088_v24  ;;  %v4295_v24 = vld [vmem:[#allocation45_spill] sm:$0xff]  ;;  %v4296_v25 = vld [vmem:[#allocation46_spill] sm:$0xff] }
 0x188   : > { %1189 = vmatpush.msra.mxu0 %v3099_v27  ;;  %1209 = vmatpush.msra.mxu1 %v3102_v28  ;;  %v4297_v27 = vld [vmem:[#allocation47_spill] sm:$0xff] }
 0x189   : > { %1229 = vmatpush.msra.mxu2 %v3110_v30  ;;  %1249 = vmatpush.msra.mxu3 %v3107_v29  ;;  %v4298_v30 = vld [vmem:[#allocation48_spill] sm:$0xff] }
 0x18a   : > { %1190 = vmatpush.msra.mxu0 %v3113_v31  ;;  %1210 = vmatpush.msra.mxu1 %v3116_v32  ;;  %v4299_v32 = vld [vmem:[#allocation49_spill] sm:$0xff] }
 0x18b   : > { %1230 = vmatpush.msra.mxu2 %v3124_v34  ;;  %1250 = vmatpush.msra.mxu3 %v3121_v33 }
 0x18c   : > { %1191 = vmatpush.msra.mxu0 %v3128_v35  ;;  %1211 = vmatpush.msra.mxu1 %v3131_v36 }
 0x18d   : > { %1231 = vmatpush.msra.mxu2 %v3140_v38  ;;  %1251 = vmatpush.msra.mxu3 %v3137_v37  ;;  %v4300_v37 = vld [vmem:[#allocation51_spill] sm:$0xff] }
 0x18e   : > { %1192 = vmatpush.msra.mxu0 %v3148_v40  ;;  %1212 = vmatpush.msra.mxu1 %v3151_v41 }
 0x18f   : > { %1232 = vmatpush.msra.mxu2 %v3159_v43  ;;  %1252 = vmatpush.msra.mxu3 %v4273_v1 }
 0x190   : > { %1193 = vmatpush.msra.mxu0 %v4274_v2  ;;  %1213 = vmatpush.msra.mxu1 %v4275_v3 }
 0x191   : > { %1233 = vmatpush.msra.mxu2 %v4276_v4  ;;  %1253 = vmatpush.msra.mxu3 %v4277_v5 }
 0x192   : > { %1194 = vmatpush.msra.mxu0 %v4278_v6  ;;  %1214 = vmatpush.msra.mxu1 %v4279_v7 }
 0x193   : > { %1234 = vmatpush.msra.mxu2 %v4280_v8  ;;  %1254 = vmatpush.msra.mxu3 %v4281_v9 }
 0x194   : > { %1195 = vmatpush.msra.mxu0 %v4282_v10  ;;  %1215 = vmatpush.msra.mxu1 %v4283_v11 }
 0x195   : > { %1235 = vmatpush.msra.mxu2 %v4284_v12  ;;  %1255 = vmatpush.msra.mxu3 %v4285_v14 }
 0x196   : > { %1196 = vmatpush.msra.mxu0 %v4286_v15  ;;  %1216 = vmatpush.msra.mxu1 %v4287_v16 }
 0x197   : > { %1236 = vmatpush.msra.mxu2 %v4288_v17  ;;  %1256 = vmatpush.msra.mxu3 %v4289_v18 }
 0x198   : > { %1197 = vmatpush.msra.mxu0 %v4290_v19  ;;  %1217 = vmatpush.msra.mxu1 %v4291_v20  ;;  %v3548_v20 = vld [vmem:[%s2928_s26 + $0x1e0] sm:$0xff] }
 0x199   : > { %1237 = vmatpush.msra.mxu2 %v4292_v21  ;;  %1257 = vmatpush.msra.mxu3 %v4293_v22  ;;  %v3552_v21 = vld [vmem:[%s2928_s26 + $0x1e8] sm:$0xff]  ;;  %v3556_v22 = vld [vmem:[%s2928_s26 + $0x1f0] sm:$0xff] }
 0x19a   : > { %1198 = vmatpush.msra.mxu0 %v4294_v23  ;;  %1218 = vmatpush.msra.mxu1 %v4295_v24 }
 0x19b   : > { %1238 = vmatpush.msra.mxu2 %v4296_v25  ;;  %1258 = vmatpush.msra.mxu3 %v4297_v27 }
 0x1f7   : > { %v892_v28 = vpop.f32.mrf.mxu0  ;;  %v912_v29 = vpop.f32.mrf.mxu1 }
 0x1f8   : > { %v955_v31 = vadd.f32 %v892_v28, %v4298_v30  ;;  %v956_v33 = vadd.f32 %v912_v29, %v4299_v32  ;;  %v3560_v28 = vld [vmem:[%s2928_s26 + $0x1f8] sm:$0xff]  ;;  %v3564_v29 = vld [vmem:[%s2928_s26 + $0x1c0] sm:$0xff]  ;;  %v3568_v30 = vld [vmem:[%s2928_s26 + $0x1c8] sm:$0xff] }
 0x1f9   : > { %v3576_v32 = vld [vmem:[%s2928_s26 + $0x1d8] sm:$0xff] }
 0x1fa   : > { %v2180_v34 = vmul.f32 -1.442695, %v955_v31  ;;  %v2181_v35 = vmul.f32 -1.442695, %v956_v33  ;;  %v3572_v31 = vld [vmem:[%s2928_s26 + $0x1d0] sm:$0xff]  ;;  %v3580_v33 = vld [vmem:[%s2928_s26 + $0x1a0] sm:$0xff] }
 0x1fc   : > { %2308 = vpow2.f32 %v2180_v34  ;;  %v3584_v34 = vld [vmem:[%s2928_s26 + $0x1a8] sm:$0xff] }
 0x1fd   : > { %2310 = vpow2.f32 %v2181_v35  ;;  %v3588_v35 = vld [vmem:[%s2928_s26 + $0x1b0] sm:$0xff] }
 0x1fe   : > { %v952_v36 = vpop.f32.mrf.mxu3  ;;  %v932_v0 = vpop.f32.mrf.mxu2 }
 0x1ff   : > { %v958_v38 = vadd.f32 %v952_v36, %v4300_v37  ;;  %v957_v50 = vadd.f32 %v932_v0, %v4301_v39  ;;  %v3592_v36 = vld [vmem:[%s2928_s26 + $0x1b8] sm:$0xff]  ;;  %v3596_v37 = vld [vmem:[%s2928_s26 + $0x180] sm:$0xff] }
 0x200   : > { %v3624_v0 = vld [vmem:[%s2928_s26 + $0x178] sm:$0xff] }
 0x201   : > { %v2182_v40 = vmul.f32 -1.442695, %v958_v38  ;;  %v3600_v38 = vld [vmem:[%s2928_s26 + $0x188] sm:$0xff]  ;;  %v3640_v39 = vld [vmem:[%s2928_s26 + $0x158] sm:$0xff] }
 0x202   : > { %v2309_v41 = vpop.eup %2308 }
 0x203   : > { %v2311_v42 = vpop.eup %2310  ;;  %v962_v43 = vadd.f32 1.0, %v2309_v41  ;;  %2312 = vpow2.f32 %v2182_v40  ;;  %v3604_v40 = vld [vmem:[%s2928_s26 + $0x190] sm:$0xff]  ;;  %v3608_v41 = vld [vmem:[%s2928_s26 + $0x198] sm:$0xff] }
 0x204   : > { %v981_v47 = vadd.f32 1.0, %v2311_v42  ;;  %v3612_v42 = vld [vmem:[%s2928_s26 + $0x160] sm:$0xff] }
 0x205   : > { %2314 = vrcp.f32 %v962_v43  ;;  %v974_v51 = vand.u32 2147483648, %v962_v43  ;;  %v972_v48 = vand.u32 2147483647, %v962_v43  ;;  %vm968_vm14 = vweird.f32 %v962_v43 }
 0x206   : > { %2316 = vrcp.f32 %v981_v47  ;;  %v993_v56 = vand.u32 2147483648, %v981_v47  ;;  %v991_v54 = vand.u32 2147483647, %v981_v47  ;;  %vm987_vm15 = vweird.f32 %v981_v47 }
 0x207   : > { %v975_v62 = vor.u32 1.1754944e-38, %v974_v51  ;;  %vm973_vm2 = vcmp.eq.f32.partialorder %v972_v48, 8.507059e+37  ;;  %v3668_v51 = vld [vmem:[%s2928_s26 + $0x110] sm:$0xff]  ;;  %v3680_v48 = vld [vmem:[%s2928_s26 + $0xe8] sm:$0xff] }
 0x208   : > { %v994_v1 = vor.u32 1.1754944e-38, %v993_v56  ;;  %vm992_vm3 = vcmp.eq.f32.partialorder %v991_v54, 8.507059e+37  ;;  %v3672_v56 = vld [vmem:[%s2928_s26 + $0x118] sm:$0xff] }
 0x209   : > { %v2313_v46 = vpop.eup %2312  ;;  %v3688_v54 = vld [vmem:[%s2928_s26 + $0xf8] sm:$0xff] }
 0x20a   : > { %v1001_v13 = vadd.f32 1.0, %v2313_v46  ;;  %v3628_v46 = vld [vmem:[%s2928_s26 + $0x140] sm:$0xff] }
 0x20b   : > { %v2315_v61 = vpop.eup %2314 }
 0x20c   : > { %v2317_v63 = vpop.eup %2316  ;;  %v964_v49 = vmul.f32 %v2315_v61, %v962_v43  ;;  %2318 = vrcp.f32 %v1001_v13  ;;  %vm969_vm12 = vweird.f32 %v2315_v61  ;;  %v1013_v14 = vand.u32 2147483648, %v1001_v13  ;;  %v3616_v43 = vld [vmem:[%s2928_s26 + $0x168] sm:$0xff] }
 0x20d   : > { %v983_v44 = vmul.f32 %v2317_v63, %v981_v47  ;;  %2320 = vtanh.f32 %v957_v50  ;;  %vm988_vm13 = vweird.f32 %v2317_v63  ;;  %vm970_vm0 = vmor %vm968_vm14, %vm969_vm12  ;;  %vm1007_vm5 = vweird.f32 %v1001_v13  ;;  %v3620_v47 = vld [vmem:[%s2928_s26 + $0x170] sm:$0xff]  ;;  %v3644_v50 = vld [vmem:[%s2928_s26 + $0x120] sm:$0xff] }
 0x20e   : > { %v965_v45 = vsub.f32 1.0, %v964_v49  ;;  %vm989_vm1 = vmor %vm987_vm15, %vm988_vm13  ;;  %v1011_v15 = vand.u32 2147483647, %v1001_v13  ;;  %v1014_v17 = vor.u32 1.1754944e-38, %v1013_v14  ;;  %v3652_v49 = vld [vmem:[%s2928_s26 + $0x130] sm:$0xff]  ;;  %v3756_v14 = vld [vmem:[%s2928_s26 + $0x40] sm:$0xff] }
 0x20f   : > { %v984_v52 = vsub.f32 1.0, %v983_v44  ;;  %v3656_v44 = vld [vmem:[%s2928_s26 + $0x138] sm:$0xff]  ;;  %4316 = vst [vmem:[#allocation37_spill] sm:$0xff] %v3756_v14 }
 0x210   : > { %v966_v26 = vmul.f32 %v2315_v61, %v965_v45  ;;  %vm1012_vm7 = vcmp.eq.f32.partialorder %v1011_v15, 8.507059e+37  ;;  %v3660_v45 = vld [vmem:[%s2928_s26 + $0x100] sm:$0xff]  ;;  %v3760_v15 = vld [vmem:[%s2928_s26 + $0x48] sm:$0xff] }
 0x211   : > { %v985_v57 = vmul.f32 %v2317_v63, %v984_v52  ;;  %v3664_v52 = vld [vmem:[%s2928_s26 + $0x108] sm:$0xff]  ;;  %4317 = vst [vmem:[#allocation39_spill] sm:$0xff] %v3760_v15 }
 0x212   : > { %v2319_v59 = vpop.eup %2318  ;;  %v967_v58 = vadd.f32 %v2315_v61, %v966_v26  ;;  %v3676_v26 = vld [vmem:[%s2928_s26 + $0xe0] sm:$0xff] }
 0x213   : > { %v986_v55 = vadd.f32 %v2317_v63, %v985_v57  ;;  %v1003_v60 = vmul.f32 %v2319_v59, %v1001_v13  ;;  %v2321_v3 = vpop.eup %2320  ;;  %vm1008_vm4 = vweird.f32 %v2319_v59  ;;  %v3632_v13 = vld [vmem:[%s2928_s26 + $0x148] sm:$0xff]  ;;  %v3684_v57 = vld [vmem:[%s2928_s26 + $0xf0] sm:$0xff] }
 0x214   : > { %v971_v2 = vsel %vm970_vm0, %v2315_v61, %v967_v58  ;;  %vm1009_vm6 = vmor %vm1007_vm5, %vm1008_vm4  ;;  %v3636_v61 = vld [vmem:[%s2928_s26 + $0x150] sm:$0xff]  ;;  %v3696_v58 = vld [vmem:[%s2928_s26 + $0xc8] sm:$0xff] }
 0x215   : > { %v976_v4 = vsel %vm973_vm2, %v975_v62, %v971_v2  ;;  %v990_v5 = vsel %vm989_vm1, %v2317_v63, %v986_v55  ;;  %v1004_v6 = vsub.f32 1.0, %v1003_v60  ;;  %v3648_v63 = vld [vmem:[%s2928_s26 + $0x128] sm:$0xff]  ;;  %v3700_v62 = vld [vmem:[%s2928_s26 + $0xd0] sm:$0xff]  ;;  %v3704_v55 = vld [vmem:[%s2928_s26 + $0xd8] sm:$0xff] }
 0x216   : > { %v995_v7 = vsel %vm992_vm3, %v994_v1, %v990_v5  ;;  %v1018_v8 = vmul.f32 %v2321_v3, %v976_v4  ;;  %4302 = vst [vmem:[#allocation23_spill] sm:$0xff] %v3700_v62  ;;  %v3708_v60 = vld [vmem:[%s2928_s26 + $0xa0] sm:$0xff]  ;;  %v3712_v1 = vld [vmem:[%s2928_s26 + $0xa8] sm:$0xff]  ;;  %v3716_v2 = vld [vmem:[%s2928_s26 + $0xb0] sm:$0xff] }
 0x217   : > { %v1017_v9 = vmul.f32 %v995_v7, %v3466_v53  ;;  %v1005_v10 = vmul.f32 %v2319_v59, %v1004_v6  ;;  %4303 = vst [vmem:[#allocation24_spill] sm:$0xff] %v3704_v55  ;;  %v3720_v3 = vld [vmem:[%s2928_s26 + $0xb8] sm:$0xff]  ;;  %v3724_v4 = vld [vmem:[%s2928_s26 + $0x80] sm:$0xff]  ;;  %v3728_v5 = vld [vmem:[%s2928_s26 + $0x88] sm:$0xff] }
 0x218   : > { %4304 = vst [vmem:[#allocation25_spill] sm:$0xff] %v3708_v60  ;;  %v3732_v6 = vld [vmem:[%s2928_s26 + $0x90] sm:$0xff]  ;;  %v3736_v7 = vld [vmem:[%s2928_s26 + $0x98] sm:$0xff] }
 0x219   : > { %v3543_v11 = vadd.f32 %v1018_v8, %v1017_v9  ;;  %v1006_v12 = vadd.f32 %v2319_v59, %v1005_v10  ;;  %4305 = vst [vmem:[#allocation27_spill] sm:$0xff] %v3712_v1  ;;  %v3740_v8 = vld [vmem:[%s2928_s26 + $0x60] sm:$0xff]  ;;  %v3744_v9 = vld [vmem:[%s2928_s26 + $0x68] sm:$0xff]  ;;  %v3748_v10 = vld [vmem:[%s2928_s26 + $0x70] sm:$0xff] }
 0x21a   : > { %4306 = vst [vmem:[#allocation26_spill] sm:$0xff] %v3716_v2 }
 0x21b   : > { %2322 = vtanh.f32 %v3543_v11  ;;  %v1010_v16 = vsel %vm1009_vm6, %v2319_v59, %v1006_v12  ;;  %v3692_v59 = vld [vmem:[%s2928_s26 + $0xc0] sm:$0xff]  ;;  %4307 = vst [vmem:[#allocation28_spill] sm:$0xff] %v3720_v3  ;;  %v3752_v12 = vld [vmem:[%s2928_s26 + $0x78] sm:$0xff] }
 0x21c   : > { %v1015_v18 = vsel %vm1012_vm7, %v1014_v17, %v1010_v16  ;;  %4308 = vst [vmem:[#allocation29_spill] sm:$0xff] %v3724_v4  ;;  %v3764_v16 = vld [vmem:[%s2928_s26 + $0x50] sm:$0xff]  ;;  %v3768_v17 = vld [vmem:[%s2928_s26 + $0x58] sm:$0xff] }
 0x21d   : > { %4309 = vst [vmem:[#allocation31_spill] sm:$0xff] %v3728_v5 }
 0x21e   : > { %4310 = vst [vmem:[#allocation30_spill] sm:$0xff] %v3732_v6 }
 0x21f   : > { %4311 = vst [vmem:[#allocation32_spill] sm:$0xff] %v3736_v7 }
 0x220   : > { %4312 = vst [vmem:[#allocation33_spill] sm:$0xff] %v3740_v8 }
 0x221   : > { %v2323_v53 = vpop.eup %2322  ;;  %4313 = vst [vmem:[#allocation35_spill] sm:$0xff] %v3744_v9 }
 0x222   : > { %v1021_v19 = vmul.f32 %v2323_v53, %v1015_v18  ;;  %4314 = vst [vmem:[#allocation34_spill] sm:$0xff] %v3748_v10  ;;  %v3772_v53 = vld [vmem:[%s2928_s26 + $0x20] sm:$0xff]  ;;  %v3776_v18 = vld [vmem:[%s2928_s26 + $0x28] sm:$0xff] }
 0x223   : > { %4315 = vst [vmem:[#allocation36_spill] sm:$0xff] %v3752_v12 }
 0x224   : > { %2183 = vst [vmem:[%s3471_s28 + $0x8] sm:$0xff] %v1021_v19  ;;  %1045 = vmatmul.f32.vlgmr.msrb.gmra.mxu0 %v1021_v19  ;;  %1065 = vmatmul.f32.vlgmr.msrb.gmra.mxu1 %v1021_v19 }
 0x225   : > { %1085 = vmatmul.f32.vlgmr.msrb.gmra.mxu2 %v1021_v19  ;;  %1105 = vmatmul.f32.vlgmr.msrb.gmra.mxu3 %v1021_v19  ;;  %4318 = vst [vmem:[#allocation38_spill] sm:$0xff] %v3764_v16  ;;  %v3780_v19 = vld [vmem:[%s2928_s26 + $0x30] sm:$0xff] }
 0x226   : > { %1337 = vmatpush.msrb.mxu0 %v3548_v20  ;;  %1357 = vmatpush.msrb.mxu1 %v3552_v21  ;;  %4319 = vst [vmem:[#allocation40_spill] sm:$0xff] %v3768_v17 }
 0x227   : > { %1377 = vmatpush.msrb.mxu2 %v3556_v22  ;;  %1397 = vmatpush.msrb.mxu3 %v3560_v28  ;;  %4320 = vst [vmem:[#allocation41_spill] sm:$0xff] %v3772_v53 }
 0x228   : > { %1338 = vmatpush.msrb.mxu0 %v3564_v29  ;;  %1358 = vmatpush.msrb.mxu1 %v3568_v30  ;;  %4321 = vst [vmem:[#allocation42_spill] sm:$0xff] %v3776_v18 }
 0x229   : > { %1378 = vmatpush.msrb.mxu2 %v3572_v31  ;;  %1398 = vmatpush.msrb.mxu3 %v3576_v32  ;;  %4322 = vst [vmem:[#allocation43_spill] sm:$0xff] %v3780_v19 }
 0x22a   : > { %1339 = vmatpush.msrb.mxu0 %v3580_v33  ;;  %1359 = vmatpush.msrb.mxu1 %v3584_v34 }
 0x22b   : > { %1379 = vmatpush.msrb.mxu2 %v3588_v35  ;;  %1399 = vmatpush.msrb.mxu3 %v3592_v36 }
 0x22c   : > { %1340 = vmatpush.msrb.mxu0 %v3596_v37  ;;  %1360 = vmatpush.msrb.mxu1 %v3600_v38 }
 0x22d   : > { %1380 = vmatpush.msrb.mxu2 %v3604_v40  ;;  %1400 = vmatpush.msrb.mxu3 %v3608_v41 }
 0x22e   : > { %1341 = vmatpush.msrb.mxu0 %v3612_v42  ;;  %1361 = vmatpush.msrb.mxu1 %v3616_v43 }
 0x22f   : > { %1381 = vmatpush.msrb.mxu2 %v3620_v47  ;;  %1401 = vmatpush.msrb.mxu3 %v3624_v0 }
 0x230   : > { %1342 = vmatpush.msrb.mxu0 %v3628_v46  ;;  %1362 = vmatpush.msrb.mxu1 %v3632_v13 }
 0x231   : > { %1382 = vmatpush.msrb.mxu2 %v3636_v61  ;;  %1402 = vmatpush.msrb.mxu3 %v3640_v39 }
 0x232   : > { %1343 = vmatpush.msrb.mxu0 %v3644_v50  ;;  %1363 = vmatpush.msrb.mxu1 %v3648_v63 }
 0x233   : > { %1383 = vmatpush.msrb.mxu2 %v3652_v49  ;;  %1403 = vmatpush.msrb.mxu3 %v3656_v44 }
 0x234   : > { %1344 = vmatpush.msrb.mxu0 %v3660_v45  ;;  %1364 = vmatpush.msrb.mxu1 %v3664_v52 }
 0x235   : > { %1384 = vmatpush.msrb.mxu2 %v3668_v51  ;;  %1404 = vmatpush.msrb.mxu3 %v3672_v56 }
 0x236   : > { %1345 = vmatpush.msrb.mxu0 %v3676_v26  ;;  %1365 = vmatpush.msrb.mxu1 %v3680_v48 }
 0x237   : > { %1385 = vmatpush.msrb.mxu2 %v3684_v57  ;;  %1405 = vmatpush.msrb.mxu3 %v3688_v54 }
 0x238   : > { %1346 = vmatpush.msrb.mxu0 %v3692_v59  ;;  %1366 = vmatpush.msrb.mxu1 %v3696_v58 }
 0x239   : > { %1386 = vmatpush.msrb.mxu2 %v3700_v62  ;;  %1406 = vmatpush.msrb.mxu3 %v3704_v55 }
 0x23a   : > { %1347 = vmatpush.msrb.mxu0 %v3708_v60  ;;  %1367 = vmatpush.msrb.mxu1 %v3712_v1 }
 0x23b   : > { %1387 = vmatpush.msrb.mxu2 %v3716_v2  ;;  %1407 = vmatpush.msrb.mxu3 %v3720_v3 }
 0x23c   : > { %1348 = vmatpush.msrb.mxu0 %v3724_v4  ;;  %1368 = vmatpush.msrb.mxu1 %v3728_v5 }
 0x23d   : > { %1388 = vmatpush.msrb.mxu2 %v3732_v6  ;;  %1408 = vmatpush.msrb.mxu3 %v3736_v7 }
 0x23e   : > { %1349 = vmatpush.msrb.mxu0 %v3740_v8  ;;  %1369 = vmatpush.msrb.mxu1 %v3744_v9 }
 0x23f   : > { %1389 = vmatpush.msrb.mxu2 %v3748_v10  ;;  %1409 = vmatpush.msrb.mxu3 %v3752_v12 }
 0x240   : > { %1350 = vmatpush.msrb.mxu0 %v3756_v14  ;;  %1370 = vmatpush.msrb.mxu1 %v3760_v15  ;;  %v3784_v15 = vld [vmem:[%s2928_s26 + $0x38] sm:$0xff]  ;;  %v4325_v14 = vld [vmem:[#allocation53_spill] sm:$0xff] }
 0x241   : > { %1390 = vmatpush.msrb.mxu2 %v3764_v16  ;;  %1410 = vmatpush.msrb.mxu3 %v3768_v17  ;;  %4323 = vst [vmem:[#allocation44_spill] sm:$0xff] %v3784_v15  ;;  %v4324_v16 = vld [vmem:[#allocation52_spill] sm:$0xff] }
 0x242   : > { %1351 = vmatpush.msrb.mxu0 %v3772_v53  ;;  %1371 = vmatpush.msrb.mxu1 %v3776_v18 }
 0x243   : > { %1391 = vmatpush.msrb.mxu2 %v3780_v19  ;;  %1411 = vmatpush.msrb.mxu3 %v3784_v15  ;;  %v4326_v15 = vld [vmem:[#allocation55_spill] sm:$0xff] }
 0x244   : > { %1352 = vmatpush.msrb.mxu0 %v4294_v23  ;;  %1372 = vmatpush.msrb.mxu1 %v4295_v24 }
 0x245   : > { %1392 = vmatpush.msrb.mxu2 %v4296_v25  ;;  %1412 = vmatpush.msrb.mxu3 %v4297_v27 }
 0x2a1   : > { %v1046_v53 = vpop.f32.mrf.mxu0  ;;  %v1066_v17 = vpop.f32.mrf.mxu1 }
 0x2a2   : > { %v1109_v18 = vadd.f32 %v1046_v53, %v4324_v16  ;;  %v1110_v12 = vadd.f32 %v1066_v17, %v4325_v14  ;;  %v4327_v14 = vld [vmem:[#allocation54_spill] sm:$0xff] }
 0x2a4   : > { %v2184_v10 = vmul.f32 -1.442695, %v1109_v18  ;;  %v2185_v19 = vmul.f32 -1.442695, %v1110_v12 }
 0x2a6   : > { %2324 = vpow2.f32 %v2184_v10 }
 0x2a7   : > { %2326 = vpow2.f32 %v2185_v19 }
 0x2a8   : > { %v1106_v9 = vpop.f32.mrf.mxu3  ;;  %v1086_v27 = vpop.f32.mrf.mxu2 }
 0x2a9   : > { %v1112_v8 = vadd.f32 %v1106_v9, %v4326_v15  ;;  %v1111_v17 = vadd.f32 %v1086_v27, %v4327_v14 }
 0x2ab   : > { %v2186_v23 = vmul.f32 -1.442695, %v1112_v8 }
 0x2ac   : > { %v2325_v7 = vpop.eup %2324 }
 0x2ad   : > { %v2327_v24 = vpop.eup %2326  ;;  %v1116_v6 = vadd.f32 1.0, %v2325_v7  ;;  %2328 = vpow2.f32 %v2186_v23 }
 0x2ae   : > { %v1135_v25 = vadd.f32 1.0, %v2327_v24 }
 0x2af   : > { %2330 = vrcp.f32 %v1116_v6  ;;  %v1128_v8 = vand.u32 2147483648, %v1116_v6  ;;  %v1126_v23 = vand.u32 2147483647, %v1116_v6  ;;  %vm1122_vm10 = vweird.f32 %v1116_v6 }
 0x2b0   : > { %2332 = vrcp.f32 %v1135_v25  ;;  %v1147_v15 = vand.u32 2147483648, %v1135_v25  ;;  %v1145_v4 = vand.u32 2147483647, %v1135_v25  ;;  %vm1141_vm11 = vweird.f32 %v1135_v25 }
 0x2b1   : > { %v1129_v27 = vor.u32 1.1754944e-38, %v1128_v8  ;;  %vm1127_vm14 = vcmp.eq.f32.partialorder %v1126_v23, 8.507059e+37  ;;  %v4334_v23 = vld [vmem:[#allocation29_spill] sm:$0xff] }
 0x2b2   : > { %vm1146_vm15 = vcmp.eq.f32.partialorder %v1145_v4, 8.507059e+37 }
 0x2b3   : > { %v2329_v5 = vpop.eup %2328 }
 0x2b4   : > { %v1155_v16 = vadd.f32 1.0, %v2329_v5 }
 0x2b5   : > { %v2331_v53 = vpop.eup %2330 }
 0x2b6   : > { %v2333_v12 = vpop.eup %2332  ;;  %v1118_v10 = vmul.f32 %v2331_v53, %v1116_v6  ;;  %2334 = vrcp.f32 %v1155_v16  ;;  %vm1123_vm8 = vweird.f32 %v2331_v53  ;;  %vm1161_vm1 = vweird.f32 %v1155_v16 }
 0x2b7   : > { %v1137_v18 = vmul.f32 %v2333_v12, %v1135_v25  ;;  %2336 = vtanh.f32 %v1111_v17  ;;  %vm1142_vm9 = vweird.f32 %v2333_v12  ;;  %vm1124_vm12 = vmor %vm1122_vm10, %vm1123_vm8 }
 0x2b8   : > { %v1119_v19 = vsub.f32 1.0, %v1118_v10  ;;  %vm1143_vm13 = vmor %vm1141_vm11, %vm1142_vm9  ;;  %v1148_v10 = vor.u32 1.1754944e-38, %v1147_v15  ;;  %v1167_v15 = vand.u32 2147483648, %v1155_v16 }
 0x2b9   : > { %v1138_v9 = vsub.f32 1.0, %v1137_v18 }
 0x2ba   : > { %v1120_v7 = vmul.f32 %v2331_v53, %v1119_v19 }
 0x2bb   : > { %v1139_v24 = vmul.f32 %v2333_v12, %v1138_v9 }
 0x2bc   : > { %v2335_v3 = vpop.eup %2334  ;;  %v1121_v5 = vadd.f32 %v2331_v53, %v1120_v7 }
 0x2bd   : > { %v1140_v14 = vadd.f32 %v2333_v12, %v1139_v24  ;;  %v1157_v2 = vmul.f32 %v2335_v3, %v1155_v16  ;;  %v2337_v17 = vpop.eup %2336  ;;  %vm1162_vm0 = vweird.f32 %v2335_v3  ;;  %v4335_v24 = vld [vmem:[#allocation31_spill] sm:$0xff] }
 0x2be   : > { %v1125_v18 = vsel %vm1124_vm12, %v2331_v53, %v1121_v5  ;;  %v1165_v53 = vand.u32 2147483647, %v1155_v16  ;;  %vm1163_vm2 = vmor %vm1161_vm1, %vm1162_vm0  ;;  %v4333_v16 = vld [vmem:[#allocation28_spill] sm:$0xff]  ;;  %v4336_v5 = vld [vmem:[#allocation30_spill] sm:$0xff] }
 0x2bf   : > { %v1130_v1 = vsel %vm1127_vm14, %v1129_v27, %v1125_v18  ;;  %v1144_v19 = vsel %vm1143_vm13, %v2333_v12, %v1140_v14  ;;  %v1158_v60 = vsub.f32 1.0, %v1157_v2  ;;  %v1168_v12 = vor.u32 1.1754944e-38, %v1167_v15  ;;  %v4337_v27 = vld [vmem:[#allocation32_spill] sm:$0xff]  ;;  %v4338_v14 = vld [vmem:[#allocation33_spill] sm:$0xff]  ;;  %v4340_v18 = vld [vmem:[#allocation34_spill] sm:$0xff] }
 0x2c0   : > { %v1149_v9 = vsel %vm1146_vm15, %v1148_v10, %v1144_v19  ;;  %v1172_v55 = vmul.f32 %v2337_v17, %v1130_v1  ;;  %vm1166_vm3 = vcmp.eq.f32.partialorder %v1165_v53, 8.507059e+37  ;;  %v4339_v10 = vld [vmem:[#allocation35_spill] sm:$0xff]  ;;  %v4341_v17 = vld [vmem:[#allocation36_spill] sm:$0xff]  ;;  %v4342_v19 = vld [vmem:[#allocation37_spill] sm:$0xff] }
 0x2c1   : > { %v1171_v62 = vmul.f32 %v1149_v9, %v3543_v11  ;;  %v1159_v6 = vmul.f32 %v2335_v3, %v1158_v60  ;;  %v4328_v11 = vld [vmem:[#allocation23_spill] sm:$0xff]  ;;  %v4346_v15 = vld [vmem:[#allocation41_spill] sm:$0xff]  ;;  %v4347_v53 = vld [vmem:[#allocation42_spill] sm:$0xff] }
 0x2c2   : > { %v4331_v60 = vld [vmem:[#allocation27_spill] sm:$0xff] }
 0x2c3   : > { %v3796_v25 = vadd.f32 %v1172_v55, %v1171_v62  ;;  %v1160_v8 = vadd.f32 %v2335_v3, %v1159_v6  ;;  %v4329_v62 = vld [vmem:[#allocation24_spill] sm:$0xff]  ;;  %v4330_v55 = vld [vmem:[#allocation25_spill] sm:$0xff]  ;;  %v4343_v9 = vld [vmem:[#allocation39_spill] sm:$0xff] }
 0x2c4   : > { %v4344_v6 = vld [vmem:[#allocation38_spill] sm:$0xff] }
 0x2c5   : > { %2338 = vtanh.f32 %v3796_v25  ;;  %v1164_v7 = vsel %vm1163_vm2, %v2335_v3, %v1160_v8  ;;  %v4332_v3 = vld [vmem:[#allocation26_spill] sm:$0xff]  ;;  %v4345_v8 = vld [vmem:[#allocation40_spill] sm:$0xff] }
 0x2c6   : > { %v1169_v4 = vsel %vm1166_vm3, %v1168_v12, %v1164_v7  ;;  %v4348_v7 = vld [vmem:[#allocation43_spill] sm:$0xff]  ;;  %v4349_v12 = vld [vmem:[#allocation44_spill] sm:$0xff] }
 0x2cb   : > { %v2339_v2 = vpop.eup %2338 }
 0x2cc   : > { %v1175_v1 = vmul.f32 %v2339_v2, %v1169_v4  ;;  %v3861_v2 = vld [vmem:[%s2928_s26] sm:$0xff]  ;;  %v3865_v4 = vld [vmem:[%s2928_s26 + $0x8] sm:$0xff] }
 0x2cd   : > { %4350 = vst [vmem:[#allocation45_spill] sm:$0xff] %v3861_v2 }
 0x2ce   : > { %2187 = vst [vmem:[%s3471_s28 + $0x10] sm:$0xff] %v1175_v1  ;;  %1199 = vmatmul.f32.vlgmr.msra.gmra.mxu0 %v1175_v1  ;;  %1219 = vmatmul.f32.vlgmr.msra.gmra.mxu1 %v1175_v1 }
 0x2cf   : > { %1239 = vmatmul.f32.vlgmr.msra.gmra.mxu2 %v1175_v1  ;;  %1259 = vmatmul.f32.vlgmr.msra.gmra.mxu3 %v1175_v1  ;;  %4351 = vst [vmem:[#allocation46_spill] sm:$0xff] %v3865_v4  ;;  %v3869_v1 = vld [vmem:[%s2928_s26 + $0x10] sm:$0xff] }
 0x2d0   : > { %1491 = vmatpush.msra.mxu0 %v3548_v20  ;;  %1511 = vmatpush.msra.mxu1 %v3552_v21  ;;  %4352 = vst [vmem:[#allocation47_spill] sm:$0xff] %v3869_v1 }
 0x2d1   : > { %1531 = vmatpush.msra.mxu2 %v3556_v22  ;;  %1551 = vmatpush.msra.mxu3 %v3560_v28 }
 0x2d2   : > { %1492 = vmatpush.msra.mxu0 %v3564_v29  ;;  %1512 = vmatpush.msra.mxu1 %v3568_v30 }
 0x2d3   : > { %1532 = vmatpush.msra.mxu2 %v3572_v31  ;;  %1552 = vmatpush.msra.mxu3 %v3576_v32 }
 0x2d4   : > { %1493 = vmatpush.msra.mxu0 %v3580_v33  ;;  %1513 = vmatpush.msra.mxu1 %v3584_v34 }
 0x2d5   : > { %1533 = vmatpush.msra.mxu2 %v3588_v35  ;;  %1553 = vmatpush.msra.mxu3 %v3592_v36 }
 0x2d6   : > { %1494 = vmatpush.msra.mxu0 %v3596_v37  ;;  %1514 = vmatpush.msra.mxu1 %v3600_v38 }
 0x2d7   : > { %1534 = vmatpush.msra.mxu2 %v3604_v40  ;;  %1554 = vmatpush.msra.mxu3 %v3608_v41 }
 0x2d8   : > { %1495 = vmatpush.msra.mxu0 %v3612_v42  ;;  %1515 = vmatpush.msra.mxu1 %v3616_v43 }
 0x2d9   : > { %1535 = vmatpush.msra.mxu2 %v3620_v47  ;;  %1555 = vmatpush.msra.mxu3 %v3624_v0 }
 0x2da   : > { %1496 = vmatpush.msra.mxu0 %v3628_v46  ;;  %1516 = vmatpush.msra.mxu1 %v3632_v13 }
 0x2db   : > { %1536 = vmatpush.msra.mxu2 %v3636_v61  ;;  %1556 = vmatpush.msra.mxu3 %v3640_v39 }
 0x2dc   : > { %1497 = vmatpush.msra.mxu0 %v3644_v50  ;;  %1517 = vmatpush.msra.mxu1 %v3648_v63 }
 0x2dd   : > { %1537 = vmatpush.msra.mxu2 %v3652_v49  ;;  %1557 = vmatpush.msra.mxu3 %v3656_v44 }
 0x2de   : > { %1498 = vmatpush.msra.mxu0 %v3660_v45  ;;  %1518 = vmatpush.msra.mxu1 %v3664_v52 }
 0x2df   : > { %1538 = vmatpush.msra.mxu2 %v3668_v51  ;;  %1558 = vmatpush.msra.mxu3 %v3672_v56 }
 0x2e0   : > { %1499 = vmatpush.msra.mxu0 %v3676_v26  ;;  %1519 = vmatpush.msra.mxu1 %v3680_v48 }
 0x2e1   : > { %1539 = vmatpush.msra.mxu2 %v3684_v57  ;;  %1559 = vmatpush.msra.mxu3 %v3688_v54 }
 0x2e2   : > { %1500 = vmatpush.msra.mxu0 %v3692_v59  ;;  %1520 = vmatpush.msra.mxu1 %v3696_v58 }
 0x2e3   : > { %1540 = vmatpush.msra.mxu2 %v4328_v11  ;;  %1560 = vmatpush.msra.mxu3 %v4329_v62 }
 0x2e4   : > { %1501 = vmatpush.msra.mxu0 %v4330_v55  ;;  %1521 = vmatpush.msra.mxu1 %v4331_v60 }
 0x2e5   : > { %1541 = vmatpush.msra.mxu2 %v4332_v3  ;;  %1561 = vmatpush.msra.mxu3 %v4333_v16 }
 0x2e6   : > { %1502 = vmatpush.msra.mxu0 %v4334_v23  ;;  %1522 = vmatpush.msra.mxu1 %v4335_v24 }
 0x2e7   : > { %1542 = vmatpush.msra.mxu2 %v4336_v5  ;;  %1562 = vmatpush.msra.mxu3 %v4337_v27 }
 0x2e8   : > { %1503 = vmatpush.msra.mxu0 %v4338_v14  ;;  %1523 = vmatpush.msra.mxu1 %v4339_v10 }
 0x2e9   : > { %1543 = vmatpush.msra.mxu2 %v4340_v18  ;;  %1563 = vmatpush.msra.mxu3 %v4341_v17 }
 0x2ea   : > { %1504 = vmatpush.msra.mxu0 %v4342_v19  ;;  %1524 = vmatpush.msra.mxu1 %v4343_v9 }
 0x2eb   : > { %1544 = vmatpush.msra.mxu2 %v4344_v6  ;;  %1564 = vmatpush.msra.mxu3 %v4345_v8  ;;  %v3873_v8 = vld [vmem:[%s2928_s26 + $0x18] sm:$0xff]  ;;  %v4355_v6 = vld [vmem:[#allocation57_spill] sm:$0xff]  ;;  %s2624_s26 = scalar_lea.hbm %s4111_s5, 16 }
 0x2ec   : > { %1505 = vmatpush.msra.mxu0 %v4346_v15  ;;  %1525 = vmatpush.msra.mxu1 %v4347_v53  ;;  %4353 = vst [vmem:[#allocation48_spill] sm:$0xff] %v3873_v8  ;;  %v4354_v15 = vld [vmem:[#allocation56_spill] sm:$0xff]  ;;  %p2626_p10 = scmp.lt.s32.totalorder %s2624_s26, %s2620_s27 }
 0x2ed   : > { %1545 = vmatpush.msra.mxu2 %v4348_v7  ;;  %1565 = vmatpush.msra.mxu3 %v4349_v12 }
 0x2ee   : > { %1506 = vmatpush.msra.mxu0 %v3861_v2  ;;  %1526 = vmatpush.msra.mxu1 %v3865_v4  ;;  %v4356_v4 = vld [vmem:[#allocation59_spill] sm:$0xff]  ;;  %p2627_p9 = por %p2626_p10, %p2625_p2 }
 0x2ef   : > { %1546 = vmatpush.msra.mxu2 %v3869_v1  ;;  %1566 = vmatpush.msra.mxu3 %v3873_v8 }
 0x2f0   : > { %p2628_p0 = pnand %p2627_p9, %p2623_p1 }
 0x34b   : > { %v1200_v53 = vpop.f32.mrf.mxu0  ;;  %v1220_v7 = vpop.f32.mrf.mxu1 }
 0x34c   : > { %v1263_v12 = vadd.f32 %v1200_v53, %v4354_v15  ;;  %v1264_v9 = vadd.f32 %v1220_v7, %v4355_v6  ;;  %v4357_v6 = vld [vmem:[#allocation58_spill] sm:$0xff] }
 0x34e   : > { %v2188_v19 = vmul.f32 -1.442695, %v1263_v12  ;;  %v2189_v2 = vmul.f32 -1.442695, %v1264_v9 }
 0x350   : > { %2340 = vpow2.f32 %v2188_v19 }
 0x351   : > { %2342 = vpow2.f32 %v2189_v2 }
 0x352   : > { %v1260_v17 = vpop.f32.mrf.mxu3  ;;  %v1240_v8 = vpop.f32.mrf.mxu2 }
 0x353   : > { %v1266_v18 = vadd.f32 %v1260_v17, %v4356_v4  ;;  %v1265_v7 = vadd.f32 %v1240_v8, %v4357_v6 }
 0x355   : > { %v2190_v10 = vmul.f32 -1.442695, %v1266_v18 }
 0x356   : > { %v2341_v14 = vpop.eup %2340 }
 0x357   : > { %v2343_v1 = vpop.eup %2342  ;;  %v1270_v27 = vadd.f32 1.0, %v2341_v14  ;;  %2344 = vpow2.f32 %v2190_v10 }
 0x358   : > { %v1289_v5 = vadd.f32 1.0, %v2343_v1 }
 0x359   : > { %2346 = vrcp.f32 %v1270_v27  ;;  %v1282_v18 = vand.u32 2147483648, %v1270_v27  ;;  %v1280_v10 = vand.u32 2147483647, %v1270_v27  ;;  %vm1276_vm6 = vweird.f32 %v1270_v27 }
 0x35a   : > { %2348 = vrcp.f32 %v1289_v5  ;;  %v1301_v4 = vand.u32 2147483648, %v1289_v5  ;;  %v1299_v23 = vand.u32 2147483647, %v1289_v5  ;;  %vm1295_vm7 = vweird.f32 %v1289_v5 }
 0x35b   : > { %v1283_v8 = vor.u32 1.1754944e-38, %v1282_v18  ;;  %vm1281_vm10 = vcmp.eq.f32.partialorder %v1280_v10, 8.507059e+37  ;;  %v4364_v10 = vld [vmem:[#allocation29_spill] sm:$0xff] }
 0x35c   : > { %vm1300_vm11 = vcmp.eq.f32.partialorder %v1299_v23, 8.507059e+37 }
 0x35d   : > { %v2345_v24 = vpop.eup %2344 }
 0x35e   : > { %v1309_v15 = vadd.f32 1.0, %v2345_v24 }
 0x35f   : > { %v2347_v53 = vpop.eup %2346 }
 0x360   : > { %v2349_v9 = vpop.eup %2348  ;;  %v1272_v19 = vmul.f32 %v2347_v53, %v1270_v27  ;;  %2350 = vrcp.f32 %v1309_v15  ;;  %vm1277_vm4 = vweird.f32 %v2347_v53  ;;  %vm1315_vm13 = vweird.f32 %v1309_v15 }
 0x361   : > { %v1291_v12 = vmul.f32 %v2349_v9, %v1289_v5  ;;  %2352 = vtanh.f32 %v1265_v7  ;;  %vm1296_vm5 = vweird.f32 %v2349_v9  ;;  %vm1278_vm8 = vmor %vm1276_vm6, %vm1277_vm4 }
 0x362   : > { %v1273_v2 = vsub.f32 1.0, %v1272_v19  ;;  %vm1297_vm9 = vmor %vm1295_vm7, %vm1296_vm5  ;;  %v1302_v19 = vor.u32 1.1754944e-38, %v1301_v4  ;;  %v1321_v4 = vand.u32 2147483648, %v1309_v15 }
 0x363   : > { %v1292_v17 = vsub.f32 1.0, %v1291_v12 }
 0x364   : > { %v1274_v14 = vmul.f32 %v2347_v53, %v1273_v2 }
 0x365   : > { %v1293_v1 = vmul.f32 %v2349_v9, %v1292_v17 }
 0x366   : > { %v2351_v16 = vpop.eup %2350  ;;  %v1275_v24 = vadd.f32 %v2347_v53, %v1274_v14 }
 0x367   : > { %v1294_v6 = vadd.f32 %v2349_v9, %v1293_v1  ;;  %v1311_v3 = vmul.f32 %v2351_v16, %v1309_v15  ;;  %v2353_v7 = vpop.eup %2352  ;;  %vm1316_vm12 = vweird.f32 %v2351_v16  ;;  %v4365_v1 = vld [vmem:[#allocation31_spill] sm:$0xff] }
 0x368   : > { %v1279_v12 = vsel %vm1278_vm8, %v2347_v53, %v1275_v24  ;;  %v1319_v53 = vand.u32 2147483647, %v1309_v15  ;;  %vm1317_vm14 = vmor %vm1315_vm13, %vm1316_vm12  ;;  %v4363_v15 = vld [vmem:[#allocation28_spill] sm:$0xff]  ;;  %v4366_v24 = vld [vmem:[#allocation30_spill] sm:$0xff] }
 0x369   : > { %v1284_v60 = vsel %vm1281_vm10, %v1283_v8, %v1279_v12  ;;  %v1298_v2 = vsel %vm1297_vm9, %v2349_v9, %v1294_v6  ;;  %v1312_v55 = vsub.f32 1.0, %v1311_v3  ;;  %v1322_v9 = vor.u32 1.1754944e-38, %v1321_v4  ;;  %v4367_v8 = vld [vmem:[#allocation32_spill] sm:$0xff]  ;;  %v4368_v6 = vld [vmem:[#allocation33_spill] sm:$0xff]  ;;  %v4370_v12 = vld [vmem:[#allocation34_spill] sm:$0xff] }
 0x36a   : > { %v1303_v17 = vsel %vm1300_vm11, %v1302_v19, %v1298_v2  ;;  %v1326_v62 = vmul.f32 %v2353_v7, %v1284_v60  ;;  %vm1320_vm15 = vcmp.eq.f32.partialorder %v1319_v53, 8.507059e+37  ;;  %v4369_v19 = vld [vmem:[#allocation35_spill] sm:$0xff]  ;;  %v4371_v7 = vld [vmem:[#allocation36_spill] sm:$0xff]  ;;  %v4372_v2 = vld [vmem:[#allocation37_spill] sm:$0xff] }
 0x36b   : > { %v1325_v11 = vmul.f32 %v1303_v17, %v3796_v25  ;;  %v1313_v27 = vmul.f32 %v2351_v16, %v1312_v55  ;;  %v4358_v25 = vld [vmem:[#allocation23_spill] sm:$0xff]  ;;  %v4376_v4 = vld [vmem:[#allocation41_spill] sm:$0xff]  ;;  %v4377_v53 = vld [vmem:[#allocation42_spill] sm:$0xff] }
 0x36c   : > { %v4361_v55 = vld [vmem:[#allocation27_spill] sm:$0xff] }
 0x36d   : > { %v3881_v5 = vadd.f32 %v1326_v62, %v1325_v11  ;;  %v1314_v18 = vadd.f32 %v2351_v16, %v1313_v27  ;;  %v4359_v11 = vld [vmem:[#allocation24_spill] sm:$0xff]  ;;  %v4360_v62 = vld [vmem:[#allocation25_spill] sm:$0xff]  ;;  %v4373_v17 = vld [vmem:[#allocation39_spill] sm:$0xff] }
 0x36e   : > { %v4374_v27 = vld [vmem:[#allocation38_spill] sm:$0xff] }
 0x36f   : > { %2354 = vtanh.f32 %v3881_v5  ;;  %v1318_v14 = vsel %vm1317_vm14, %v2351_v16, %v1314_v18  ;;  %v4362_v16 = vld [vmem:[#allocation26_spill] sm:$0xff]  ;;  %v4375_v18 = vld [vmem:[#allocation40_spill] sm:$0xff] }
 0x370   : > { %v1323_v23 = vsel %vm1320_vm15, %v1322_v9, %v1318_v14  ;;  %v4378_v14 = vld [vmem:[#allocation43_spill] sm:$0xff]  ;;  %v4379_v9 = vld [vmem:[#allocation44_spill] sm:$0xff] }
 0x375   : > { %v2355_v3 = vpop.eup %2354 }
 0x376   : > { %v1329_v60 = vmul.f32 %v2355_v3, %v1323_v23  ;;  %v4380_v3 = vld [vmem:[#allocation45_spill] sm:$0xff]  ;;  %v4381_v23 = vld [vmem:[#allocation46_spill] sm:$0xff] }
 0x378   : > { %2191 = vst [vmem:[%s3471_s28 + $0x18] sm:$0xff] %v1329_v60  ;;  %1353 = vmatmul.f32.vlgmr.msrb.gmra.mxu0 %v1329_v60  ;;  %1373 = vmatmul.f32.vlgmr.msrb.gmra.mxu1 %v1329_v60 }
 0x379   : > { %1393 = vmatmul.f32.vlgmr.msrb.gmra.mxu2 %v1329_v60  ;;  %1413 = vmatmul.f32.vlgmr.msrb.gmra.mxu3 %v1329_v60  ;;  %v4382_v60 = vld [vmem:[#allocation47_spill] sm:$0xff] }
 0x37a   : > { %1645 = vmatpush.msrb.mxu0 %v3548_v20  ;;  %1665 = vmatpush.msrb.mxu1 %v3552_v21 }
 0x37b   : > { %1685 = vmatpush.msrb.mxu2 %v3556_v22  ;;  %1705 = vmatpush.msrb.mxu3 %v3560_v28 }
 0x37c   : > { %1646 = vmatpush.msrb.mxu0 %v3564_v29  ;;  %1666 = vmatpush.msrb.mxu1 %v3568_v30 }
 0x37d   : > { %1686 = vmatpush.msrb.mxu2 %v3572_v31  ;;  %1706 = vmatpush.msrb.mxu3 %v3576_v32 }
 0x37e   : > { %1647 = vmatpush.msrb.mxu0 %v3580_v33  ;;  %1667 = vmatpush.msrb.mxu1 %v3584_v34 }
 0x37f   : > { %1687 = vmatpush.msrb.mxu2 %v3588_v35  ;;  %1707 = vmatpush.msrb.mxu3 %v3592_v36 }
 0x380   : > { %1648 = vmatpush.msrb.mxu0 %v3596_v37  ;;  %1668 = vmatpush.msrb.mxu1 %v3600_v38 }
 0x381   : > { %1688 = vmatpush.msrb.mxu2 %v3604_v40  ;;  %1708 = vmatpush.msrb.mxu3 %v3608_v41 }
 0x382   : > { %1649 = vmatpush.msrb.mxu0 %v3612_v42  ;;  %1669 = vmatpush.msrb.mxu1 %v3616_v43 }
 0x383   : > { %1689 = vmatpush.msrb.mxu2 %v3620_v47  ;;  %1709 = vmatpush.msrb.mxu3 %v3624_v0 }
 0x384   : > { %1650 = vmatpush.msrb.mxu0 %v3628_v46  ;;  %1670 = vmatpush.msrb.mxu1 %v3632_v13 }
 0x385   : > { %1690 = vmatpush.msrb.mxu2 %v3636_v61  ;;  %1710 = vmatpush.msrb.mxu3 %v3640_v39 }
 0x386   : > { %1651 = vmatpush.msrb.mxu0 %v3644_v50  ;;  %1671 = vmatpush.msrb.mxu1 %v3648_v63 }
 0x387   : > { %1691 = vmatpush.msrb.mxu2 %v3652_v49  ;;  %1711 = vmatpush.msrb.mxu3 %v3656_v44 }
 0x388   : > { %1652 = vmatpush.msrb.mxu0 %v3660_v45  ;;  %1672 = vmatpush.msrb.mxu1 %v3664_v52 }
 0x389   : > { %1692 = vmatpush.msrb.mxu2 %v3668_v51  ;;  %1712 = vmatpush.msrb.mxu3 %v3672_v56 }
 0x38a   : > { %1653 = vmatpush.msrb.mxu0 %v3676_v26  ;;  %1673 = vmatpush.msrb.mxu1 %v3680_v48 }
 0x38b   : > { %1693 = vmatpush.msrb.mxu2 %v3684_v57  ;;  %1713 = vmatpush.msrb.mxu3 %v3688_v54 }
 0x38c   : > { %1654 = vmatpush.msrb.mxu0 %v3692_v59  ;;  %1674 = vmatpush.msrb.mxu1 %v3696_v58 }
 0x38d   : > { %1694 = vmatpush.msrb.mxu2 %v4358_v25  ;;  %1714 = vmatpush.msrb.mxu3 %v4359_v11 }
 0x38e   : > { %1655 = vmatpush.msrb.mxu0 %v4360_v62  ;;  %1675 = vmatpush.msrb.mxu1 %v4361_v55 }
 0x38f   : > { %1695 = vmatpush.msrb.mxu2 %v4362_v16  ;;  %1715 = vmatpush.msrb.mxu3 %v4363_v15 }
 0x390   : > { %1656 = vmatpush.msrb.mxu0 %v4364_v10  ;;  %1676 = vmatpush.msrb.mxu1 %v4365_v1 }
 0x391   : > { %1696 = vmatpush.msrb.mxu2 %v4366_v24  ;;  %1716 = vmatpush.msrb.mxu3 %v4367_v8 }
 0x392   : > { %1657 = vmatpush.msrb.mxu0 %v4368_v6  ;;  %1677 = vmatpush.msrb.mxu1 %v4369_v19 }
 0x393   : > { %1697 = vmatpush.msrb.mxu2 %v4370_v12  ;;  %1717 = vmatpush.msrb.mxu3 %v4371_v7  ;;  %v4384_v7 = vld [vmem:[#allocation60_spill] sm:$0xff]  ;;  %v4385_v12 = vld [vmem:[#allocation61_spill] sm:$0xff] }
 0x394   : > { %1658 = vmatpush.msrb.mxu0 %v4372_v2  ;;  %1678 = vmatpush.msrb.mxu1 %v4373_v17  ;;  %v4383_v2 = vld [vmem:[#allocation48_spill] sm:$0xff] }
 0x395   : > { %1698 = vmatpush.msrb.mxu2 %v4374_v27  ;;  %1718 = vmatpush.msrb.mxu3 %v4375_v18 }
 0x396   : > { %1659 = vmatpush.msrb.mxu0 %v4376_v4  ;;  %1679 = vmatpush.msrb.mxu1 %v4377_v53 }
 0x397   : > { %1699 = vmatpush.msrb.mxu2 %v4378_v14  ;;  %1719 = vmatpush.msrb.mxu3 %v4379_v9  ;;  %v4386_v9 = vld [vmem:[#allocation63_spill] sm:$0xff] }
 0x398   : > { %1660 = vmatpush.msrb.mxu0 %v4380_v3  ;;  %1680 = vmatpush.msrb.mxu1 %v4381_v23 }
 0x399   : > { %1700 = vmatpush.msrb.mxu2 %v4382_v60  ;;  %1720 = vmatpush.msrb.mxu3 %v4383_v2 }
 0x3f5   : > { %v1354_v17 = vpop.f32.mrf.mxu0  ;;  %v1374_v27 = vpop.f32.mrf.mxu1 }
 0x3f6   : > { %v1417_v18 = vadd.f32 %v1354_v17, %v4384_v7  ;;  %v1418_v4 = vadd.f32 %v1374_v27, %v4385_v12  ;;  %v4387_v12 = vld [vmem:[#allocation62_spill] sm:$0xff] }
 0x3f8   : > { %v2192_v19 = vmul.f32 -1.442695, %v1417_v18  ;;  %v2193_v53 = vmul.f32 -1.442695, %v1418_v4 }
 0x3fa   : > { %2356 = vpow2.f32 %v2192_v19 }
 0x3fb   : > { %2358 = vpow2.f32 %v2193_v53 }
 0x3fc   : > { %v1414_v14 = vpop.f32.mrf.mxu3  ;;  %v1394_v2 = vpop.f32.mrf.mxu2 }
 0x3fd   : > { %v1420_v6 = vadd.f32 %v1414_v14, %v4386_v9  ;;  %v1419_v27 = vadd.f32 %v1394_v2, %v4387_v12 }
 0x3ff   : > { %v2194_v3 = vmul.f32 -1.442695, %v1420_v6 }
 0x400   : > { %v2357_v8 = vpop.eup %2356 }
 0x401   : > { %v2359_v23 = vpop.eup %2358  ;;  %v1424_v24 = vadd.f32 1.0, %v2357_v8  ;;  %2360 = vpow2.f32 %v2194_v3 }
 0x402   : > { %v1443_v60 = vadd.f32 1.0, %v2359_v23 }
 0x403   : > { %2362 = vrcp.f32 %v1424_v24  ;;  %v1436_v6 = vand.u32 2147483648, %v1424_v24  ;;  %v1434_v3 = vand.u32 2147483647, %v1424_v24  ;;  %vm1430_vm2 = vweird.f32 %v1424_v24 }
 0x404   : > { %2364 = vrcp.f32 %v1443_v60  ;;  %v1455_v9 = vand.u32 2147483648, %v1443_v60  ;;  %v1453_v10 = vand.u32 2147483647, %v1443_v60  ;;  %vm1449_vm3 = vweird.f32 %v1443_v60 }
 0x405   : > { %v1437_v2 = vor.u32 1.1754944e-38, %v1436_v6  ;;  %vm1435_vm6 = vcmp.eq.f32.partialorder %v1434_v3, 8.507059e+37 }
 0x406   : > { %vm1454_vm7 = vcmp.eq.f32.partialorder %v1453_v10, 8.507059e+37 }
 0x407   : > { %v2361_v1 = vpop.eup %2360 }
 0x408   : > { %v1463_v7 = vadd.f32 1.0, %v2361_v1 }
 0x409   : > { %v2363_v17 = vpop.eup %2362 }
 0x40a   : > { %v2365_v18 = vpop.eup %2364  ;;  %v1426_v19 = vmul.f32 %v2363_v17, %v1424_v24  ;;  %2366 = vrcp.f32 %v1463_v7  ;;  %vm1431_vm0 = vweird.f32 %v2363_v17  ;;  %vm1469_vm9 = vweird.f32 %v1463_v7 }
 0x40b   : > { %v1445_v4 = vmul.f32 %v2365_v18, %v1443_v60  ;;  %2368 = vtanh.f32 %v1419_v27  ;;  %vm1450_vm1 = vweird.f32 %v2365_v18  ;;  %vm1432_vm4 = vmor %vm1430_vm2, %vm1431_vm0 }
 0x40c   : > { %v1427_v53 = vsub.f32 1.0, %v1426_v19  ;;  %vm1451_vm5 = vmor %vm1449_vm3, %vm1450_vm1  ;;  %v1456_v19 = vor.u32 1.1754944e-38, %v1455_v9  ;;  %v1475_v9 = vand.u32 2147483648, %v1463_v7 }
 0x40d   : > { %v1446_v14 = vsub.f32 1.0, %v1445_v4 }
 0x40e   : > { %v1428_v8 = vmul.f32 %v2363_v17, %v1427_v53 }
 0x40f   : > { %v1447_v23 = vmul.f32 %v2365_v18, %v1446_v14 }
 0x410   : > { %v2367_v15 = vpop.eup %2366  ;;  %v1429_v1 = vadd.f32 %v2363_v17, %v1428_v8 }
 0x411   : > { %v1448_v12 = vadd.f32 %v2365_v18, %v1447_v23  ;;  %v1465_v16 = vmul.f32 %v2367_v15, %v1463_v7  ;;  %v2369_v27 = vpop.eup %2368  ;;  %vm1470_vm8 = vweird.f32 %v2367_v15 }
 0x412   : > { %v1433_v4 = vsel %vm1432_vm4, %v2363_v17, %v1429_v1  ;;  %v1473_v17 = vand.u32 2147483647, %v1463_v7  ;;  %vm1471_vm10 = vmor %vm1469_vm9, %vm1470_vm8  ;;  %v4417_v1 = vld [vmem:[#allocation66_spill] sm:$0xff] }
 0x413   : > { %v1438_v55 = vsel %vm1435_vm6, %v1437_v2, %v1433_v4  ;;  %v1452_v53 = vsel %vm1451_vm5, %v2365_v18, %v1448_v12  ;;  %v1466_v62 = vsub.f32 1.0, %v1465_v16  ;;  %v1476_v18 = vor.u32 1.1754944e-38, %v1475_v9 }
 0x414   : > { %v1457_v14 = vsel %vm1454_vm7, %v1456_v19, %v1452_v53  ;;  %v1480_v11 = vmul.f32 %v2369_v27, %v1438_v55  ;;  %vm1474_vm11 = vcmp.eq.f32.partialorder %v1473_v17, 8.507059e+37 }
 0x415   : > { %v1479_v25 = vmul.f32 %v1457_v14, %v3881_v5  ;;  %v1467_v24 = vmul.f32 %v2367_v15, %v1466_v62 }
 0x417   : > { %v3954_v60 = vadd.f32 %v1480_v11, %v1479_v25  ;;  %v1468_v6 = vadd.f32 %v2367_v15, %v1467_v24 }
 0x419   : > { %2370 = vtanh.f32 %v3954_v60  ;;  %v1472_v8 = vsel %vm1471_vm10, %v2367_v15, %v1468_v6 }
 0x41a   : > { %v1477_v10 = vsel %vm1474_vm11, %v1476_v18, %v1472_v8 }
 0x41f   : > { %v2371_v16 = vpop.eup %2370 }
 0x420   : > { %v1483_v55 = vmul.f32 %v2371_v16, %v1477_v10 }
 0x422   : > { %2195 = vst [vmem:[%s3471_s28 + $0x20] sm:$0xff] %v1483_v55  ;;  %1507 = vmatmul.f32.vlgmr.msra.gmra.mxu0 %v1483_v55  ;;  %1527 = vmatmul.f32.vlgmr.msra.gmra.mxu1 %v1483_v55 }
 0x423   : > { %1547 = vmatmul.f32.vlgmr.msra.gmra.mxu2 %v1483_v55  ;;  %1567 = vmatmul.f32.vlgmr.msra.gmra.mxu3 %v1483_v55 }
 0x424   : > { %1799 = vmatpush.msra.mxu0 %v3548_v20  ;;  %1819 = vmatpush.msra.mxu1 %v3552_v21  ;;  %v4388_v20 = vld [vmem:[#allocation23_spill] sm:$0xff]  ;;  %v4389_v21 = vld [vmem:[#allocation24_spill] sm:$0xff] }
 0x425   : > { %1839 = vmatpush.msra.mxu2 %v3556_v22  ;;  %1859 = vmatpush.msra.mxu3 %v3560_v28  ;;  %v4390_v22 = vld [vmem:[#allocation25_spill] sm:$0xff]  ;;  %v4391_v28 = vld [vmem:[#allocation27_spill] sm:$0xff] }
 0x426   : > { %1800 = vmatpush.msra.mxu0 %v3564_v29  ;;  %1820 = vmatpush.msra.mxu1 %v3568_v30  ;;  %v4392_v29 = vld [vmem:[#allocation26_spill] sm:$0xff]  ;;  %v4393_v30 = vld [vmem:[#allocation28_spill] sm:$0xff] }
 0x427   : > { %1840 = vmatpush.msra.mxu2 %v3572_v31  ;;  %1860 = vmatpush.msra.mxu3 %v3576_v32  ;;  %v4394_v31 = vld [vmem:[#allocation29_spill] sm:$0xff]  ;;  %v4395_v32 = vld [vmem:[#allocation31_spill] sm:$0xff] }
 0x428   : > { %1801 = vmatpush.msra.mxu0 %v3580_v33  ;;  %1821 = vmatpush.msra.mxu1 %v3584_v34  ;;  %v4396_v33 = vld [vmem:[#allocation30_spill] sm:$0xff]  ;;  %v4397_v34 = vld [vmem:[#allocation32_spill] sm:$0xff] }
 0x429   : > { %1841 = vmatpush.msra.mxu2 %v3588_v35  ;;  %1861 = vmatpush.msra.mxu3 %v3592_v36  ;;  %v4398_v35 = vld [vmem:[#allocation33_spill] sm:$0xff]  ;;  %v4399_v36 = vld [vmem:[#allocation35_spill] sm:$0xff] }
 0x42a   : > { %1802 = vmatpush.msra.mxu0 %v3596_v37  ;;  %1822 = vmatpush.msra.mxu1 %v3600_v38  ;;  %v4400_v37 = vld [vmem:[#allocation34_spill] sm:$0xff]  ;;  %v4401_v38 = vld [vmem:[#allocation36_spill] sm:$0xff] }
 0x42b   : > { %1842 = vmatpush.msra.mxu2 %v3604_v40  ;;  %1862 = vmatpush.msra.mxu3 %v3608_v41  ;;  %v4402_v40 = vld [vmem:[#allocation37_spill] sm:$0xff]  ;;  %v4403_v41 = vld [vmem:[#allocation39_spill] sm:$0xff] }
 0x42c   : > { %1803 = vmatpush.msra.mxu0 %v3612_v42  ;;  %1823 = vmatpush.msra.mxu1 %v3616_v43  ;;  %v4404_v42 = vld [vmem:[#allocation38_spill] sm:$0xff]  ;;  %v4405_v43 = vld [vmem:[#allocation40_spill] sm:$0xff] }
 0x42d   : > { %1843 = vmatpush.msra.mxu2 %v3620_v47  ;;  %1863 = vmatpush.msra.mxu3 %v3624_v0  ;;  %v4406_v47 = vld [vmem:[#allocation41_spill] sm:$0xff]  ;;  %v4407_v0 = vld [vmem:[#allocation42_spill] sm:$0xff] }
 0x42e   : > { %1804 = vmatpush.msra.mxu0 %v3628_v46  ;;  %1824 = vmatpush.msra.mxu1 %v3632_v13  ;;  %v4408_v46 = vld [vmem:[#allocation43_spill] sm:$0xff]  ;;  %v4409_v13 = vld [vmem:[#allocation44_spill] sm:$0xff] }
 0x42f   : > { %1844 = vmatpush.msra.mxu2 %v3636_v61  ;;  %1864 = vmatpush.msra.mxu3 %v3640_v39  ;;  %v4410_v61 = vld [vmem:[#allocation45_spill] sm:$0xff]  ;;  %v4411_v39 = vld [vmem:[#allocation46_spill] sm:$0xff] }
 0x430   : > { %1805 = vmatpush.msra.mxu0 %v3644_v50  ;;  %1825 = vmatpush.msra.mxu1 %v3648_v63  ;;  %v4412_v50 = vld [vmem:[#allocation47_spill] sm:$0xff]  ;;  %v4413_v63 = vld [vmem:[#allocation48_spill] sm:$0xff] }
 0x431   : > { %1845 = vmatpush.msra.mxu2 %v3652_v49  ;;  %1865 = vmatpush.msra.mxu3 %v3656_v44 }
 0x432   : > { %1806 = vmatpush.msra.mxu0 %v3660_v45  ;;  %1826 = vmatpush.msra.mxu1 %v3664_v52  ;;  %v4414_v45 = vld [vmem:[#allocation64_spill] sm:$0xff] }
 0x433   : > { %1846 = vmatpush.msra.mxu2 %v3668_v51  ;;  %1866 = vmatpush.msra.mxu3 %v3672_v56  ;;  %v4415_v51 = vld [vmem:[#allocation65_spill] sm:$0xff] }
 0x434   : > { %1807 = vmatpush.msra.mxu0 %v3676_v26  ;;  %1827 = vmatpush.msra.mxu1 %v3680_v48 }
 0x435   : > { %1847 = vmatpush.msra.mxu2 %v3684_v57  ;;  %1867 = vmatpush.msra.mxu3 %v3688_v54  ;;  %v4416_v54 = vld [vmem:[#allocation67_spill] sm:$0xff] }
 0x436   : > { %1808 = vmatpush.msra.mxu0 %v3692_v59  ;;  %1828 = vmatpush.msra.mxu1 %v3696_v58 }
 0x437   : > { %1848 = vmatpush.msra.mxu2 %v4388_v20  ;;  %1868 = vmatpush.msra.mxu3 %v4389_v21 }
 0x438   : > { %1809 = vmatpush.msra.mxu0 %v4390_v22  ;;  %1829 = vmatpush.msra.mxu1 %v4391_v28 }
 0x439   : > { %1849 = vmatpush.msra.mxu2 %v4392_v29  ;;  %1869 = vmatpush.msra.mxu3 %v4393_v30 }
 0x43a   : > { %1810 = vmatpush.msra.mxu0 %v4394_v31  ;;  %1830 = vmatpush.msra.mxu1 %v4395_v32 }
 0x43b   : > { %1850 = vmatpush.msra.mxu2 %v4396_v33  ;;  %1870 = vmatpush.msra.mxu3 %v4397_v34 }
 0x43c   : > { %1811 = vmatpush.msra.mxu0 %v4398_v35  ;;  %1831 = vmatpush.msra.mxu1 %v4399_v36 }
 0x43d   : > { %1851 = vmatpush.msra.mxu2 %v4400_v37  ;;  %1871 = vmatpush.msra.mxu3 %v4401_v38 }
 0x43e   : > { %1812 = vmatpush.msra.mxu0 %v4402_v40  ;;  %1832 = vmatpush.msra.mxu1 %v4403_v41 }
 0x43f   : > { %1852 = vmatpush.msra.mxu2 %v4404_v42  ;;  %1872 = vmatpush.msra.mxu3 %v4405_v43 }
 0x440   : > { %1813 = vmatpush.msra.mxu0 %v4406_v47  ;;  %1833 = vmatpush.msra.mxu1 %v4407_v0 }
 0x441   : > { %1853 = vmatpush.msra.mxu2 %v4408_v46  ;;  %1873 = vmatpush.msra.mxu3 %v4409_v13  ;;  %v4418_v13 = vld [vmem:[#allocation68_spill] sm:$0xff] }
 0x442   : > { %1814 = vmatpush.msra.mxu0 %v4410_v61  ;;  %1834 = vmatpush.msra.mxu1 %v4411_v39  ;;  %v4419_v39 = vld [vmem:[#allocation69_spill] sm:$0xff] }
 0x443   : > { %1854 = vmatpush.msra.mxu2 %v4412_v50  ;;  %1874 = vmatpush.msra.mxu3 %v4413_v63 }
 0x49f   : > { %v1508_v49 = vpop.f32.mrf.mxu0  ;;  %v1528_v44 = vpop.f32.mrf.mxu1 }
 0x4a0   : > { %v1571_v52 = vadd.f32 %v1508_v49, %v4414_v45  ;;  %v1572_v56 = vadd.f32 %v1528_v44, %v4415_v51  ;;  %v4420_v45 = vld [vmem:[#allocation71_spill] sm:$0xff] }
 0x4a2   : > { %v2196_v26 = vmul.f32 -1.442695, %v1571_v52  ;;  %v2197_v48 = vmul.f32 -1.442695, %v1572_v56 }
 0x4a4   : > { %2372 = vpow2.f32 %v2196_v26 }
 0x4a5   : > { %2374 = vpow2.f32 %v2197_v48 }
 0x4a6   : > { %v1568_v57 = vpop.f32.mrf.mxu3  ;;  %v1548_v15 = vpop.f32.mrf.mxu2 }
 0x4a7   : > { %v1574_v59 = vadd.f32 %v1568_v57, %v4416_v54  ;;  %v1573_v2 = vadd.f32 %v1548_v15, %v4417_v1 }
 0x4a9   : > { %v2198_v58 = vmul.f32 -1.442695, %v1574_v59 }
 0x4aa   : > { %v2373_v5 = vpop.eup %2372 }
 0x4ab   : > { %v2375_v25 = vpop.eup %2374  ;;  %v1578_v11 = vadd.f32 1.0, %v2373_v5  ;;  %2376 = vpow2.f32 %v2198_v58 }
 0x4ac   : > { %v1597_v62 = vadd.f32 1.0, %v2375_v25  ;;  %v4421_v25 = vld [vmem:[#allocation70_spill] sm:$0xff] }
 0x4ad   : > { %2378 = vrcp.f32 %v1578_v11  ;;  %v1590_v14 = vand.u32 2147483648, %v1578_v11  ;;  %v1588_v9 = vand.u32 2147483647, %v1578_v11  ;;  %vm1584_vm14 = vweird.f32 %v1578_v11 }
 0x4ae   : > { %2380 = vrcp.f32 %v1597_v62  ;;  %v1609_v24 = vand.u32 2147483648, %v1597_v62  ;;  %v1607_v8 = vand.u32 2147483647, %v1597_v62  ;;  %vm1603_vm15 = vweird.f32 %v1597_v62 }
 0x4af   : > { %v1591_v10 = vor.u32 1.1754944e-38, %v1590_v14  ;;  %vm1589_vm2 = vcmp.eq.f32.partialorder %v1588_v9, 8.507059e+37 }
 0x4b0   : > { %v1610_v21 = vor.u32 1.1754944e-38, %v1609_v24  ;;  %vm1608_vm3 = vcmp.eq.f32.partialorder %v1607_v8, 8.507059e+37 }
 0x4b1   : > { %v2377_v7 = vpop.eup %2376 }
 0x4b2   : > { %v1617_v3 = vadd.f32 1.0, %v2377_v7 }
 0x4b3   : > { %v2379_v23 = vpop.eup %2378 }
 0x4b4   : > { %v2381_v12 = vpop.eup %2380  ;;  %v1580_v19 = vmul.f32 %v2379_v23, %v1578_v11  ;;  %2382 = vrcp.f32 %v1617_v3  ;;  %vm1585_vm12 = vweird.f32 %v2379_v23  ;;  %v1629_v38 = vand.u32 2147483648, %v1617_v3 }
 0x4b5   : > { %v1599_v4 = vmul.f32 %v2381_v12, %v1597_v62  ;;  %2384 = vtanh.f32 %v1573_v2  ;;  %vm1604_vm13 = vweird.f32 %v2381_v12  ;;  %vm1586_vm0 = vmor %vm1584_vm14, %vm1585_vm12  ;;  %vm1623_vm5 = vweird.f32 %v1617_v3 }
 0x4b6   : > { %v1581_v27 = vsub.f32 1.0, %v1580_v19  ;;  %vm1605_vm1 = vmor %vm1603_vm15, %vm1604_vm13  ;;  %v1627_v40 = vand.u32 2147483647, %v1617_v3  ;;  %v1630_v42 = vor.u32 1.1754944e-38, %v1629_v38 }
 0x4b7   : > { %v1600_v53 = vsub.f32 1.0, %v1599_v4 }
 0x4b8   : > { %v1582_v6 = vmul.f32 %v2379_v23, %v1581_v27  ;;  %vm1628_vm7 = vcmp.eq.f32.partialorder %v1627_v40, 8.507059e+37 }
 0x4b9   : > { %v1601_v17 = vmul.f32 %v2381_v12, %v1600_v53 }
 0x4ba   : > { %v2383_v18 = vpop.eup %2382  ;;  %v1583_v16 = vadd.f32 %v2379_v23, %v1582_v6 }
 0x4bb   : > { %v1602_v55 = vadd.f32 %v2381_v12, %v1601_v17  ;;  %v1619_v20 = vmul.f32 %v2383_v18, %v1617_v3  ;;  %v2385_v28 = vpop.eup %2384  ;;  %vm1624_vm4 = vweird.f32 %v2383_v18 }
 0x4bc   : > { %v1587_v22 = vsel %vm1586_vm0, %v2379_v23, %v1583_v16  ;;  %vm1625_vm6 = vmor %vm1623_vm5, %vm1624_vm4 }
 0x4bd   : > { %v1592_v29 = vsel %vm1589_vm2, %v1591_v10, %v1587_v22  ;;  %v1606_v30 = vsel %vm1605_vm1, %v2381_v12, %v1602_v55  ;;  %v1620_v31 = vsub.f32 1.0, %v1619_v20 }
 0x4be   : > { %v1611_v32 = vsel %vm1608_vm3, %v1610_v21, %v1606_v30  ;;  %v1634_v33 = vmul.f32 %v2385_v28, %v1592_v29 }
 0x4bf   : > { %v1633_v34 = vmul.f32 %v1611_v32, %v3954_v60  ;;  %v1621_v35 = vmul.f32 %v2383_v18, %v1620_v31 }
 0x4c1   : > { %v4027_v36 = vadd.f32 %v1634_v33, %v1633_v34  ;;  %v1622_v37 = vadd.f32 %v2383_v18, %v1621_v35 }
 0x4c3   : > { %2386 = vtanh.f32 %v4027_v36  ;;  %v1626_v41 = vsel %vm1625_vm6, %v2383_v18, %v1622_v37 }
 0x4c4   : > { %v1631_v47 = vsel %vm1628_vm7, %v1630_v42, %v1626_v41  ;;  %v4422_v41 = vld [vmem:[#allocation72_spill] sm:$0xff] }
 0x4c9   : > { %v2387_v43 = vpop.eup %2386 }
 0x4ca   : > { %v1637_v0 = vmul.f32 %v2387_v43, %v1631_v47  ;;  %v4423_v43 = vld [vmem:[#allocation73_spill] sm:$0xff] }
 0x4cc   : > { %2199 = vst [vmem:[%s3471_s28 + $0x28] sm:$0xff] %v1637_v0  ;;  %1661 = vmatmul.f32.vlgmr.msrb.gmra.mxu0 %v1637_v0  ;;  %1681 = vmatmul.f32.vlgmr.msrb.gmra.mxu1 %v1637_v0 }
 0x4cd   : > { %1701 = vmatmul.f32.vlgmr.msrb.gmra.mxu2 %v1637_v0  ;;  %1721 = vmatmul.f32.vlgmr.msrb.gmra.mxu3 %v1637_v0 }
 0x549   : > { %v1662_v60 = vpop.f32.mrf.mxu0  ;;  %v1682_v46 = vpop.f32.mrf.mxu1 }
 0x54a   : > { %v1725_v61 = vadd.f32 %v1662_v60, %v4418_v13  ;;  %v1726_v50 = vadd.f32 %v1682_v46, %v4419_v39  ;;  %v4424_v13 = vld [vmem:[#allocation75_spill] sm:$0xff] }
 0x54c   : > { %v2200_v63 = vmul.f32 -1.442695, %v1725_v61  ;;  %v2201_v49 = vmul.f32 -1.442695, %v1726_v50 }
 0x54e   : > { %2388 = vpow2.f32 %v2200_v63 }
 0x54f   : > { %2390 = vpow2.f32 %v2201_v49 }
 0x550   : > { %v1722_v44 = vpop.f32.mrf.mxu3  ;;  %v1702_v54 = vpop.f32.mrf.mxu2 }
 0x551   : > { %v1728_v52 = vadd.f32 %v1722_v44, %v4420_v45  ;;  %v1727_v11 = vadd.f32 %v1702_v54, %v4421_v25 }
 0x553   : > { %v2202_v51 = vmul.f32 -1.442695, %v1728_v52 }
 0x554   : > { %v2389_v56 = vpop.eup %2388 }
 0x555   : > { %v2391_v26 = vpop.eup %2390  ;;  %v1732_v48 = vadd.f32 1.0, %v2389_v56  ;;  %2392 = vpow2.f32 %v2202_v51 }
 0x556   : > { %v1751_v57 = vadd.f32 1.0, %v2391_v26  ;;  %v4425_v26 = vld [vmem:[#allocation74_spill] sm:$0xff] }
 0x557   : > { %2394 = vrcp.f32 %v1732_v48  ;;  %v1744_v1 = vand.u32 2147483648, %v1732_v48  ;;  %v1742_v19 = vand.u32 2147483647, %v1732_v48  ;;  %vm1738_vm10 = vweird.f32 %v1732_v48 }
 0x558   : > { %2396 = vrcp.f32 %v1751_v57  ;;  %v1763_v2 = vand.u32 2147483648, %v1751_v57  ;;  %v1761_v27 = vand.u32 2147483647, %v1751_v57  ;;  %vm1757_vm11 = vweird.f32 %v1751_v57 }
 0x559   : > { %v1745_v24 = vor.u32 1.1754944e-38, %v1744_v1  ;;  %vm1743_vm14 = vcmp.eq.f32.partialorder %v1742_v19, 8.507059e+37 }
 0x55a   : > { %v1764_v17 = vor.u32 1.1754944e-38, %v1763_v2  ;;  %vm1762_vm15 = vcmp.eq.f32.partialorder %v1761_v27, 8.507059e+37 }
 0x55b   : > { %v2393_v59 = vpop.eup %2392 }
 0x55c   : > { %v1771_v58 = vadd.f32 1.0, %v2393_v59 }
 0x55d   : > { %v2395_v5 = vpop.eup %2394 }
 0x55e   : > { %v2397_v62 = vpop.eup %2396  ;;  %v1734_v15 = vmul.f32 %v2395_v5, %v1732_v48  ;;  %2398 = vrcp.f32 %v1771_v58  ;;  %vm1739_vm8 = vweird.f32 %v2395_v5  ;;  %v1783_v31 = vand.u32 2147483648, %v1771_v58 }
 0x55f   : > { %v1753_v7 = vmul.f32 %v2397_v62, %v1751_v57  ;;  %2400 = vtanh.f32 %v1727_v11  ;;  %vm1758_vm9 = vweird.f32 %v2397_v62  ;;  %vm1740_vm12 = vmor %vm1738_vm10, %vm1739_vm8  ;;  %vm1777_vm1 = vweird.f32 %v1771_v58 }
 0x560   : > { %v1735_v3 = vsub.f32 1.0, %v1734_v15  ;;  %vm1759_vm13 = vmor %vm1757_vm11, %vm1758_vm9  ;;  %v1781_v32 = vand.u32 2147483647, %v1771_v58  ;;  %v1784_v34 = vor.u32 1.1754944e-38, %v1783_v31 }
 0x561   : > { %v1754_v23 = vsub.f32 1.0, %v1753_v7 }
 0x562   : > { %v1736_v12 = vmul.f32 %v2395_v5, %v1735_v3  ;;  %vm1782_vm3 = vcmp.eq.f32.partialorder %v1781_v32, 8.507059e+37 }
 0x563   : > { %v1755_v4 = vmul.f32 %v2397_v62, %v1754_v23 }
 0x564   : > { %v2399_v53 = vpop.eup %2398  ;;  %v1737_v14 = vadd.f32 %v2395_v5, %v1736_v12 }
 0x565   : > { %v1756_v6 = vadd.f32 %v2397_v62, %v1755_v4  ;;  %v1773_v9 = vmul.f32 %v2399_v53, %v1771_v58  ;;  %v2401_v18 = vpop.eup %2400  ;;  %vm1778_vm0 = vweird.f32 %v2399_v53 }
 0x566   : > { %v1741_v8 = vsel %vm1740_vm12, %v2395_v5, %v1737_v14  ;;  %vm1779_vm2 = vmor %vm1777_vm1, %vm1778_vm0 }
 0x567   : > { %v1746_v16 = vsel %vm1743_vm14, %v1745_v24, %v1741_v8  ;;  %v1760_v10 = vsel %vm1759_vm13, %v2397_v62, %v1756_v6  ;;  %v1774_v55 = vsub.f32 1.0, %v1773_v9 }
 0x568   : > { %v1765_v20 = vsel %vm1762_vm15, %v1764_v17, %v1760_v10  ;;  %v1788_v21 = vmul.f32 %v2401_v18, %v1746_v16 }
 0x569   : > { %v1787_v22 = vmul.f32 %v1765_v20, %v4027_v36  ;;  %v1775_v28 = vmul.f32 %v2399_v53, %v1774_v55 }
 0x56b   : > { %v4036_v29 = vadd.f32 %v1788_v21, %v1787_v22  ;;  %v1776_v30 = vadd.f32 %v2399_v53, %v1775_v28 }
 0x56d   : > { %2402 = vtanh.f32 %v4036_v29  ;;  %v1780_v33 = vsel %vm1779_vm2, %v2399_v53, %v1776_v30 }
 0x56e   : > { %v1785_v37 = vsel %vm1782_vm3, %v1784_v34, %v1780_v33 }
 0x573   : > { %v2403_v35 = vpop.eup %2402 }
 0x574   : > { %v1791_v38 = vmul.f32 %v2403_v35, %v1785_v37 }
 0x576   : > { %2203 = vst [vmem:[%s3471_s28 + $0x30] sm:$0xff] %v1791_v38  ;;  %1815 = vmatmul.f32.vlgmr.msra.gmra.mxu0 %v1791_v38  ;;  %1835 = vmatmul.f32.vlgmr.msra.gmra.mxu1 %v1791_v38 }
 0x577   : > { %1855 = vmatmul.f32.vlgmr.msra.gmra.mxu2 %v1791_v38  ;;  %1875 = vmatmul.f32.vlgmr.msra.gmra.mxu3 %v1791_v38 }
 0x5f3   : > { %v1816_v36 = vpop.f32.mrf.mxu0  ;;  %v1836_v40 = vpop.f32.mrf.mxu1 }
 0x5f4   : > { %v1879_v42 = vadd.f32 %v1816_v36, %v4422_v41  ;;  %v1880_v47 = vadd.f32 %v1836_v40, %v4423_v43 }
 0x5f6   : > { %v2204_v0 = vmul.f32 -1.442695, %v1879_v42  ;;  %v2205_v60 = vmul.f32 -1.442695, %v1880_v47 }
 0x5f8   : > { %2404 = vpow2.f32 %v2204_v0 }
 0x5f9   : > { %2406 = vpow2.f32 %v2205_v60 }
 0x5fa   : > { %v1876_v46 = vpop.f32.mrf.mxu3  ;;  %v1856_v45 = vpop.f32.mrf.mxu2 }
 0x5fb   : > { %v1882_v61 = vadd.f32 %v1876_v46, %v4424_v13  ;;  %v1881_v48 = vadd.f32 %v1856_v45, %v4425_v26 }
 0x5fd   : > { %v2206_v39 = vmul.f32 -1.442695, %v1882_v61 }
 0x5fe   : > { %v2405_v50 = vpop.eup %2404 }
 0x5ff   : > { %v2407_v63 = vpop.eup %2406  ;;  %v1886_v49 = vadd.f32 1.0, %v2405_v50  ;;  %2408 = vpow2.f32 %v2206_v39 }
 0x600   : > { %v1905_v44 = vadd.f32 1.0, %v2407_v63 }
 0x601   : > { %2410 = vrcp.f32 %v1886_v49  ;;  %v1898_v25 = vand.u32 2147483648, %v1886_v49  ;;  %v1896_v15 = vand.u32 2147483647, %v1886_v49  ;;  %vm1892_vm6 = vweird.f32 %v1886_v49 }
 0x602   : > { %2412 = vrcp.f32 %v1905_v44  ;;  %v1917_v11 = vand.u32 2147483648, %v1905_v44  ;;  %v1915_v3 = vand.u32 2147483647, %v1905_v44  ;;  %vm1911_vm7 = vweird.f32 %v1905_v44 }
 0x603   : > { %v1899_v2 = vor.u32 1.1754944e-38, %v1898_v25  ;;  %vm1897_vm10 = vcmp.eq.f32.partialorder %v1896_v15, 8.507059e+37 }
 0x604   : > { %v1918_v4 = vor.u32 1.1754944e-38, %v1917_v11  ;;  %vm1916_vm11 = vcmp.eq.f32.partialorder %v1915_v3, 8.507059e+37 }
 0x605   : > { %v2409_v52 = vpop.eup %2408 }
 0x606   : > { %v4043_v51 = vadd.f32 1.0, %v2409_v52 }
 0x607   : > { %v2411_v56 = vpop.eup %2410 }
 0x608   : > { %v2413_v57 = vpop.eup %2412  ;;  %v1888_v54 = vmul.f32 %v2411_v56, %v1886_v49  ;;  %2414 = vrcp.f32 %v4043_v51  ;;  %vm1893_vm4 = vweird.f32 %v2411_v56  ;;  %v1937_v55 = vand.u32 2147483648, %v4043_v51 }
 0x609   : > { %v1907_v59 = vmul.f32 %v2413_v57, %v1905_v44  ;;  %2416 = vtanh.f32 %v1881_v48  ;;  %vm1912_vm5 = vweird.f32 %v2413_v57  ;;  %vm1894_vm8 = vmor %vm1892_vm6, %vm1893_vm4  ;;  %vm1931_vm13 = vweird.f32 %v4043_v51 }
 0x60a   : > { %v1889_v58 = vsub.f32 1.0, %v1888_v54  ;;  %vm1913_vm9 = vmor %vm1911_vm7, %vm1912_vm5  ;;  %v1935_v20 = vand.u32 2147483647, %v4043_v51 }
 0x60b   : > { %v1908_v5 = vsub.f32 1.0, %v1907_v59 }
 0x60c   : > { %v1890_v62 = vmul.f32 %v2411_v56, %v1889_v58 }
 0x60d   : > { %v1909_v7 = vmul.f32 %v2413_v57, %v1908_v5 }
 0x60e   : > { %v2415_v23 = vpop.eup %2414  ;;  %v1891_v1 = vadd.f32 %v2411_v56, %v1890_v62 }
 0x60f   : > { %v1910_v12 = vadd.f32 %v2413_v57, %v1909_v7  ;;  %v1927_v19 = vmul.f32 %v2415_v23, %v4043_v51  ;;  %v2417_v53 = vpop.eup %2416  ;;  %vm1932_vm12 = vweird.f32 %v2415_v23 }
 0x610   : > { %v1895_v27 = vsel %vm1894_vm8, %v2411_v56, %v1891_v1 }
 0x611   : > { %v1900_v14 = vsel %vm1897_vm10, %v1899_v2, %v1895_v27  ;;  %v1914_v24 = vsel %vm1913_vm9, %v2413_v57, %v1910_v12  ;;  %v1928_v6 = vsub.f32 1.0, %v1927_v19 }
 0x612   : > { %v1919_v9 = vsel %vm1916_vm11, %v1918_v4, %v1914_v24  ;;  %v1942_v17 = vmul.f32 %v2417_v53, %v1900_v14 }
 0x613   : > { %v1941_v8 = vmul.f32 %v1919_v9, %v4036_v29  ;;  %v1929_v18 = vmul.f32 %v2415_v23, %v1928_v6 }
 0x615   : > { %v1943_v16 = vadd.f32 %v1942_v17, %v1941_v8  ;;  %v1930_v10 = vadd.f32 %v2415_v23, %v1929_v18 }
 0x617   : > { %2418 = vtanh.f32 %v1943_v16  ;;  %1948 = vst [vmem:[%s375_s13] sm:$0xff] %v1943_v16 }
 0x618   : > { %2631 = shalt.err (!%p2628_p0)
}
 0x619   : > { %2228 = dma.vmem_to_hbm [thread:$0]  (%p2795_p11), %s1985_s8, 128, %s1987_s11, %s1955_s15   ;;  %vm1933_vm14 = vmor %vm1931_vm13, %vm1932_vm12  ;;  %v1938_v22 = vor.u32 1.1754944e-38, %v1937_v55  ;;  %vm1936_vm15 = vcmp.eq.f32.partialorder %v1935_v20, 8.507059e+37 }
 0x61a   : > { %v1934_v21 = vsel %vm1933_vm14, %v2415_v23, %v1930_v10  ;;  %s1967_s24 = sshll.u32 %s3471_s28, 4  ;;  %s1969_s30 = sshll.u32 %s1966_s7, 4  ;;  %s1968_s24 = int_to_ptr.vmem [resolvable:$true] %s1967_s24  ;;  %s1970_s30 = int_to_ptr.hbm [resolvable:$true] %s1969_s30 }
 0x61b   : > { %v1939_v29 = vsel %vm1936_vm15, %v1938_v22, %v1934_v21  ;;  %s1950_s9 = scalar_lea.sflag [#allocation5], %s2907_s6  ;;  %s2646_s17 = sshra.s32 %s1970_s30, 4  ;;  %s2647_s17 = int_to_ptr.hbm [resolvable:$true] %s2646_s17 }
 0x61c   : > { %s2648_s14 = scalar_lea.hbm %s2647_s17, 64  ;;  %s2652_s11 = scalar_lea.hbm %s4110_s4, 128 }
 0x61d   : > { %v2419_v28 = vpop.eup %2418  ;;  %p2649_p3 = scmp.ne.s32.totalorder %s2647_s17, %s2648_s14  ;;  %p2653_p7 = scmp.lt.s32.totalorder %s2647_s17, %s4110_s4 }
 0x61e   : > { %v1945_v30 = vmul.f32 %v2419_v28, %v1939_v29  ;;  %p2654_p8 = scmp.lt.s32.totalorder %s2652_s11, %s2648_s14 }
 0x61f   : > { %p2650_p4 = pnand %p2649_p3, %p2795_p11 }
 0x620   : > { %2207 = vst [vmem:[%s3471_s28 + $0x38] sm:$0xff] %v1945_v30  ;;  %p2655_p6 = por %p2654_p8, %p2653_p7 }
 0x621   : > { %p2651_p5 = pneg %p2650_p4 }
 0x623   : > { %p2656_p13 = pnand %p2655_p6, %p2651_p5 }
 0x625   : > { %2659 = shalt.err (!%p2656_p13)
}
 0x626   : > { %s2717_s6 = smov 128   ;;  %s2718_s28 = smov 8  }
 0x627   : > { %2227 = dma.vmem_to_hbm [thread:$0]  (%p2795_p11), %s1968_s24, 1024, %s1970_s30, %s1950_s9, %s2717_s6, %s2717_s6, %s2718_s28  }
 0x628 PF: > { %s1998_s7 = sand.u32 1, %s2698_s18   ;;  %p4427_p1 = scmp.ge.s32.totalorder %s2710_s21, 2 }
 0x629   : > { %s1999_s15 = scalar_lea.sflag [#allocation5], %s1998_s7 }
 0x62a   : > { %p2245_p2 = pnand %p4427_p1, %p2799_p12 }
 0x62c   : > { %p2246_p10 = pneg %p2245_p2 }
 0x62e   : > { %2689 = dma.done.wait (%p2246_p10), %s1999_s15, 1024  }
 0x62f   : > { %2691 = vsyncadd (%p2246_p10), %s1999_s15, 4294966272  ;;  %s2009_s22 = scalar_lea.sflag [#allocation13], %s1998_s7 }
 0x630   : > { %2693 = dma.done.wait (%p2246_p10), %s2009_s22, 128  }
 0x631   : > { %2695 = vsyncadd (%p2246_p10), %s2009_s22, 4294967168  ;;  %s4428_s21 = sld [smem:[#allocation20_spill]]  ;;  %s4431_s18 = smov %s2702_s19 }
 0x632   : > { %s4429_s27 = sld [smem:[#allocation19_spill]] }
 0x633   : > { %s4430_s20 = sld [smem:[#allocation21_spill]] }
 0x637   : > { %p28_p11 = scmp.ge.s32.totalorder %s4428_s21, 4  }
 0x638   : > { %s4432_s19 = smov %s4429_s27 }
 0x639   :  { %30 = sbr.rel (!%p28_p11) target bundleno = 13 (0xd), region = 149 }
 0x63e   :  { %2015 = vsyncpa [#allocation4], 1 }
 0x63f   :  { %2017 = vsyncpa [#allocation4 + $0x1], 1 }
 0x640   :  { %2018 = vsyncpa [#allocation7], 1 }
 0x641   :  { %2020 = vsyncpa [#allocation7 + $0x1], 1 }
 0x642   :  { %2021 = vsyncpa [#allocation10], 1 }
 0x643   :  { %2023 = vsyncpa [#allocation10 + $0x1], 1 }
 0x644   :  { %2024 = vsyncpa [#allocation5], 1 }
 0x645   :  { %2026 = vsyncpa [#allocation5 + $0x1], 1 }
 0x646   :  { %2027 = vsyncpa [#allocation13], 1 }
 0x647   :  { %2029 = vsyncpa [#allocation13 + $0x1], 1 }

</bundles_post_ra>
